<compile_context>
chip_gen: v7x
topology: tpu7x:2x2x1
jax: 0.10.0
libtpu: 0.0.40
codegen_flags: <defaults>
</compile_context>

<pallas_src>
import jax
import jax.numpy as jnp
from jax.experimental import pallas as pl
from jax.experimental.pallas import tpu as pltpu


def _conv3x3_taps(p, w_ref, rows_out):
    """'Valid' 3x3 conv of p (R, C, Cin) as 9 MXU matmuls over flattened rows.

    Returns acc of shape (rows_out * C, Cout) f32 with
      acc[i*C + j] = sum_{ky,kx} p[i+ky, j+kx, :] @ w[ky, kx]
    valid for j <= C-3 (larger j wraps across rows; callers discard/mask it).
    Requires p to have at least rows_out + 3 rows.
    """
    R, C, _ = p.shape
    assert R >= rows_out + 3
    cout = w_ref.shape[-1]
    L = rows_out * C
    acc = jnp.zeros((L, cout), jnp.float32)
    for ky in range(3):
        # One row-slab flatten per ky; kx becomes a cheap sublane-offset slice.
        flat = p[ky:ky + rows_out + 1].reshape((rows_out + 1) * C, -1)
        for kx in range(3):
            acc = acc + jnp.dot(
                flat[kx:kx + L].astype(jnp.bfloat16),   # bf16 -> MXU
                w_ref[ky, kx],                          # (Cin, Cout) bf16
                preferred_element_type=jnp.float32)
    return acc


def _basic_block_kernel(xp_ref, w1_ref, w2_ref, s1_ref, b1_ref,
                        s2_ref, b2_ref, mask_ref, o_ref):
    """Fused BasicBlock forward for one image.

    xp_ref  : (1, H+6, Wc, Cin) f32   2-halo zero-padded NHWC input (+ spare
                                      rows/cols for the flattened-tap trick)
    w*_ref  : (3, 3, Cin, Cout) bf16
    s*/b*   : (1, C) f32              folded BN scale / bias
    mask_ref: (H+3, Wc, 1) f32        1 on the valid conv1 output region
    o_ref   : (1, H, W, Cout) f32
    """
    H, W, Cout = o_ref.shape[1], o_ref.shape[2], o_ref.shape[3]
    Wc = xp_ref.shape[2]
    Cmid = w1_ref.shape[3]
    R1 = H + 3                      # rows of conv2's padded input canvas

    xp = xp_ref[0]                  # (H+6, Wc, Cin) f32, stays in VMEM

    # ---- conv1 -> bn1 -> relu, produced directly on conv2's padded canvas ---
    acc1 = _conv3x3_taps(xp, w1_ref, R1)                   # (R1*Wc, Cmid) f32
    a1 = jnp.maximum(acc1 * s1_ref[...] + b1_ref[...], 0.0)
    # Mask zeroes the 1-wide halo and the flatten garbage -> exact zero padding.
    m = a1.reshape(R1, Wc, Cmid) * mask_ref[...]           # (R1, Wc, Cmid) f32

    # ---- conv2 -> bn2 -> + residual -> relu ---------------------------------
    acc2 = _conv3x3_taps(m, w2_ref, H)                     # (H*Wc, Cout) f32
    a2 = acc2 * s2_ref[...] + b2_ref[...]
    out = a2.reshape(H, Wc, Cout)[:, :W, :] + xp[2:H + 2, 2:W + 2, :]
    o_ref[0] = jnp.maximum(out, 0.0).astype(o_ref.dtype)


def _bn_fold(gamma, beta, mean, var, eps=1e-5):
    scale = gamma / jnp.sqrt(var + eps)
    return scale, beta - mean * scale


def basic_block_forward(x_nchw, params):
    """BasicBlock forward (stride=1, downsample=None). NCHW in / NCHW out."""
    N, Cin, H, W = x_nchw.shape
    Cmid = params["w1"].shape[-1]
    Cout = params["w2"].shape[-1]
    assert Cin == Cout, "identity residual requires inplanes == planes"

    # NCHW -> NHWC (channels on the lane axis).  The halo pad below fuses with
    # this layout conversion into a single HBM pass.
    x = jnp.transpose(x_nchw, (0, 2, 3, 1)).astype(jnp.float32)

    Hp = H + 6                            # 2-halo + spare rows for flatten trick
    Wc = ((W + 4 + 7) // 8) * 8           # 2-halo width, rounded to sublane=8
    xp = jnp.pad(x, ((0, 0), (2, Hp - H - 2), (2, Wc - W - 2), (0, 0)))

    s1, b1 = _bn_fold(params["bn1_gamma"], params["bn1_beta"],
                      params["bn1_mean"], params["bn1_var"])
    s2, b2 = _bn_fold(params["bn2_gamma"], params["bn2_beta"],
                      params["bn2_mean"], params["bn2_var"])
    s1 = s1.reshape(1, Cmid).astype(jnp.float32)
    b1 = b1.reshape(1, Cmid).astype(jnp.float32)
    s2 = s2.reshape(1, Cout).astype(jnp.float32)
    b2 = b2.reshape(1, Cout).astype(jnp.float32)

    # bf16 weights: MXU-native, half the weight DMA bytes.
    w1 = params["w1"].astype(jnp.bfloat16)
    w2 = params["w2"].astype(jnp.bfloat16)

    # 0/1 mask for the valid conv1 output region (rows 1..H, cols 1..W of the
    # (H+3, Wc) canvas); everything else must be exactly zero for conv2's pad.
    R1 = H + 3
    rows = jnp.arange(R1)[:, None, None]
    cols = jnp.arange(Wc)[None, :, None]
    mask = (((rows >= 1) & (rows <= H)) &
            ((cols >= 1) & (cols <= W))).astype(jnp.float32)   # (R1, Wc, 1)

    out_nhwc = pl.pallas_call(
        _basic_block_kernel,
        out_shape=jax.ShapeDtypeStruct((N, H, W, Cout), jnp.float32),
        grid_spec=pltpu.PrefetchScalarGridSpec(
            num_scalar_prefetch=0,
            grid=(N,),
            in_specs=[
                pl.BlockSpec((1, Hp, Wc, Cin), lambda n: (n, 0, 0, 0)),
                pl.BlockSpec((3, 3, Cin, Cmid), lambda n: (0, 0, 0, 0)),
                pl.BlockSpec((3, 3, Cmid, Cout), lambda n: (0, 0, 0, 0)),
                pl.BlockSpec((1, Cmid), lambda n: (0, 0)),
                pl.BlockSpec((1, Cmid), lambda n: (0, 0)),
                pl.BlockSpec((1, Cout), lambda n: (0, 0)),
                pl.BlockSpec((1, Cout), lambda n: (0, 0)),
                pl.BlockSpec((R1, Wc, 1), lambda n: (0, 0, 0)),
            ],
            out_specs=pl.BlockSpec((1, H, W, Cout), lambda n: (n, 0, 0, 0)),
        ),
        compiler_params=pltpu.CompilerParams(
            dimension_semantics=("parallel",),
            vmem_limit_bytes=32 * 1024 * 1024,
        ),
    )(xp, w1, w2, s1, b1, s2, b2, mask)

    return jnp.transpose(out_nhwc, (0, 3, 1, 2))   # NHWC -> NCHW


def _reference_forward(x_nchw, params):
    """Pure-JAX reference with matching numerics (bf16 conv inputs, f32 accum)."""
    x = jnp.transpose(x_nchw, (0, 2, 3, 1)).astype(jnp.float32)
    s1, b1 = _bn_fold(params["bn1_gamma"], params["bn1_beta"],
                      params["bn1_mean"], params["bn1_var"])
    s2, b2 = _bn_fold(params["bn2_gamma"], params["bn2_beta"],
                      params["bn2_mean"], params["bn2_var"])
    dn = jax.lax.conv_dimension_numbers(x.shape, params["w1"].shape,
                                        ("NHWC", "HWIO", "NHWC"))

    def conv(inp, w):
        return jax.lax.conv_general_dilated(
            inp.astype(jnp.bfloat16).astype(jnp.float32),
            w.astype(jnp.bfloat16).astype(jnp.float32),
            (1, 1), "SAME", dimension_numbers=dn,
            precision=jax.lax.Precision.HIGHEST)

    o1 = jnp.maximum(conv(x, params["w1"]) * s1 + b1, 0.0)
    o2 = jnp.maximum(conv(o1, params["w2"]) * s2 + b2 + x, 0.0)
    return jnp.transpose(o2, (0, 3, 1, 2))


def make_params(key, inplanes, planes):
    ks = jax.random.split(key, 8)
    # conv weights stored HWIO (3,3,Cin,Cout) for the NHWC kernel.
    w1 = 0.1 * jax.random.normal(ks[0], (3, 3, inplanes, planes), jnp.float32)
    w2 = 0.1 * jax.random.normal(ks[1], (3, 3, planes, planes), jnp.float32)
    return dict(
        w1=w1, w2=w2,
        bn1_gamma=1.0 + 0.1 * jax.random.normal(ks[2], (planes,), jnp.float32),
        bn1_beta=0.1 * jax.random.normal(ks[3], (planes,), jnp.float32),
        bn1_mean=0.05 * jax.random.normal(ks[4], (planes,), jnp.float32),
        bn1_var=jnp.abs(jax.random.normal(ks[5], (planes,), jnp.float32)) + 1.0,
        bn2_gamma=1.0 + 0.1 * jax.random.normal(ks[6], (planes,), jnp.float32),
        bn2_beta=0.1 * jax.random.normal(ks[7], (planes,), jnp.float32),
        bn2_mean=jnp.zeros((planes,), jnp.float32),
        bn2_var=jnp.ones((planes,), jnp.float32),
    )


if __name__ == "__main__":
    N, C, H, W = 2, 4, 16, 16   # inplanes == planes (stride=1, no downsample)
    key = jax.random.PRNGKey(0)
    k_x, k_p = jax.random.split(key)
    x = jax.random.normal(k_x, (N, C, H, W), jnp.float32)
    params = make_params(k_p, inplanes=C, planes=C)

    out = jax.block_until_ready(basic_block_forward(x, params))
    ref = jax.block_until_ready(_reference_forward(x, params))

    assert out.shape == (N, C, H, W)
    max_diff = float(jnp.max(jnp.abs(out - ref)))
    assert jnp.allclose(out, ref, atol=2e-3, rtol=2e-3), (
        "mismatch vs reference: max abs diff = %e" % max_diff)
    print("KERNEL_OK")
</pallas_src>

<mosaic_0001>
module attributes {stable_mosaic.version = 11 : i64} {
  func.func @_basic_block_kernel(%arg0: i32, %arg1: memref<1x22x24x4xf32, #tpu.memory_space<vmem>>, %arg2: memref<3x3x4x4xbf16, #tpu.memory_space<vmem>>, %arg3: memref<3x3x4x4xbf16, #tpu.memory_space<vmem>>, %arg4: memref<1x4xf32, #tpu.memory_space<vmem>>, %arg5: memref<1x4xf32, #tpu.memory_space<vmem>>, %arg6: memref<1x4xf32, #tpu.memory_space<vmem>>, %arg7: memref<1x4xf32, #tpu.memory_space<vmem>>, %arg8: memref<19x24x1xf32, #tpu.memory_space<vmem>>, %arg9: memref<1x16x16x4xf32, #tpu.memory_space<vmem>>) attributes {dimension_semantics = [#tpu.dimension_semantics<parallel>], iteration_bounds = array<i64: 2>, scalar_prefetch = 0 : i64, scratch_operands = 0 : i64, tpu.core_type = #tpu.core_type<tc>, window_params = [{transform_indices = @transform_0, window_bounds = array<i64: 1, 22, 24, 4>}, {pipeline_mode = #tpu.pipeline_mode<synchronous>, transform_indices = @transform_1, window_bounds = array<i64: 3, 3, 4, 4>}, {pipeline_mode = #tpu.pipeline_mode<synchronous>, transform_indices = @transform_2, window_bounds = array<i64: 3, 3, 4, 4>}, {pipeline_mode = #tpu.pipeline_mode<synchronous>, transform_indices = @transform_3, window_bounds = array<i64: 1, 4>}, {pipeline_mode = #tpu.pipeline_mode<synchronous>, transform_indices = @transform_4, window_bounds = array<i64: 1, 4>}, {pipeline_mode = #tpu.pipeline_mode<synchronous>, transform_indices = @transform_5, window_bounds = array<i64: 1, 4>}, {pipeline_mode = #tpu.pipeline_mode<synchronous>, transform_indices = @transform_6, window_bounds = array<i64: 1, 4>}, {pipeline_mode = #tpu.pipeline_mode<synchronous>, transform_indices = @transform_7, window_bounds = array<i64: 19, 24, 1>}, {transform_indices = @transform_8, window_bounds = array<i64: 1, 16, 16, 4>}]} {
    %c0 = arith.constant 0 : index
    %c0_0 = arith.constant 0 : index
    %c0_1 = arith.constant 0 : index
    %c0_2 = arith.constant 0 : index
    %0 = vector.load %arg1[%c0, %c0_0, %c0_1, %c0_2] : memref<1x22x24x4xf32, #tpu.memory_space<vmem>>, vector<1x22x24x4xf32>
    %1 = vector.shape_cast %0 : vector<1x22x24x4xf32> to vector<22x24x4xf32>
    %cst = arith.constant 0.000000e+00 : f32
    %2 = vector.broadcast %cst : f32 to vector<456x4xf32>
    %3 = vector.extract_strided_slice %1 {offsets = [0, 0, 0], sizes = [20, 24, 4], strides = [1, 1, 1]} : vector<22x24x4xf32> to vector<20x24x4xf32>
    %4 = vector.shape_cast %3 : vector<20x24x4xf32> to vector<480x4xf32>
    %5 = vector.extract_strided_slice %4 {offsets = [0, 0], sizes = [456, 4], strides = [1, 1]} : vector<480x4xf32> to vector<456x4xf32>
    %6 = arith.truncf %5 : vector<456x4xf32> to vector<456x4xbf16>
    %c0_3 = arith.constant 0 : index
    %c0_4 = arith.constant 0 : index
    %c0_5 = arith.constant 0 : index
    %c0_6 = arith.constant 0 : index
    %7 = vector.load %arg2[%c0_3, %c0_4, %c0_5, %c0_6] : memref<3x3x4x4xbf16, #tpu.memory_space<vmem>>, vector<1x1x4x4xbf16>
    %8 = vector.shape_cast %7 : vector<1x1x4x4xbf16> to vector<4x4xbf16>
    %cst_7 = arith.constant dense<0.000000e+00> : vector<456x4xf32>
    %9 = tpu.matmul %6, %8, %cst_7 {dimension_numbers = #tpu.dot_dimension_numbers<[1], [0], [0], [1], [0, 0, 1, 1], [], []>} : vector<456x4xbf16>, vector<4x4xbf16>, vector<456x4xf32> -> vector<456x4xf32>
    %10 = arith.addf %2, %9 : vector<456x4xf32>
    %11 = vector.extract_strided_slice %4 {offsets = [1, 0], sizes = [456, 4], strides = [1, 1]} : vector<480x4xf32> to vector<456x4xf32>
    %12 = arith.truncf %11 : vector<456x4xf32> to vector<456x4xbf16>
    %c0_8 = arith.constant 0 : index
    %c1 = arith.constant 1 : index
    %c0_9 = arith.constant 0 : index
    %c0_10 = arith.constant 0 : index
    %13 = vector.load %arg2[%c0_8, %c1, %c0_9, %c0_10] : memref<3x3x4x4xbf16, #tpu.memory_space<vmem>>, vector<1x1x4x4xbf16>
    %14 = vector.shape_cast %13 : vector<1x1x4x4xbf16> to vector<4x4xbf16>
    %cst_11 = arith.constant dense<0.000000e+00> : vector<456x4xf32>
    %15 = tpu.matmul %12, %14, %cst_11 {dimension_numbers = #tpu.dot_dimension_numbers<[1], [0], [0], [1], [0, 0, 1, 1], [], []>} : vector<456x4xbf16>, vector<4x4xbf16>, vector<456x4xf32> -> vector<456x4xf32>
    %16 = arith.addf %10, %15 : vector<456x4xf32>
    %17 = vector.extract_strided_slice %4 {offsets = [2, 0], sizes = [456, 4], strides = [1, 1]} : vector<480x4xf32> to vector<456x4xf32>
    %18 = arith.truncf %17 : vector<456x4xf32> to vector<456x4xbf16>
    %c0_12 = arith.constant 0 : index
    %c2 = arith.constant 2 : index
    %c0_13 = arith.constant 0 : index
    %c0_14 = arith.constant 0 : index
    %19 = vector.load %arg2[%c0_12, %c2, %c0_13, %c0_14] : memref<3x3x4x4xbf16, #tpu.memory_space<vmem>>, vector<1x1x4x4xbf16>
    %20 = vector.shape_cast %19 : vector<1x1x4x4xbf16> to vector<4x4xbf16>
    %cst_15 = arith.constant dense<0.000000e+00> : vector<456x4xf32>
    %21 = tpu.matmul %18, %20, %cst_15 {dimension_numbers = #tpu.dot_dimension_numbers<[1], [0], [0], [1], [0, 0, 1, 1], [], []>} : vector<456x4xbf16>, vector<4x4xbf16>, vector<456x4xf32> -> vector<456x4xf32>
    %22 = arith.addf %16, %21 : vector<456x4xf32>
    %23 = vector.extract_strided_slice %1 {offsets = [1, 0, 0], sizes = [20, 24, 4], strides = [1, 1, 1]} : vector<22x24x4xf32> to vector<20x24x4xf32>
    %24 = vector.shape_cast %23 : vector<20x24x4xf32> to vector<480x4xf32>
    %25 = vector.extract_strided_slice %24 {offsets = [0, 0], sizes = [456, 4], strides = [1, 1]} : vector<480x4xf32> to vector<456x4xf32>
    %26 = arith.truncf %25 : vector<456x4xf32> to vector<456x4xbf16>
    %c1_16 = arith.constant 1 : index
    %c0_17 = arith.constant 0 : index
    %c0_18 = arith.constant 0 : index
    %c0_19 = arith.constant 0 : index
    %27 = vector.load %arg2[%c1_16, %c0_17, %c0_18, %c0_19] : memref<3x3x4x4xbf16, #tpu.memory_space<vmem>>, vector<1x1x4x4xbf16>
    %28 = vector.shape_cast %27 : vector<1x1x4x4xbf16> to vector<4x4xbf16>
    %cst_20 = arith.constant dense<0.000000e+00> : vector<456x4xf32>
    %29 = tpu.matmul %26, %28, %cst_20 {dimension_numbers = #tpu.dot_dimension_numbers<[1], [0], [0], [1], [0, 0, 1, 1], [], []>} : vector<456x4xbf16>, vector<4x4xbf16>, vector<456x4xf32> -> vector<456x4xf32>
    %30 = arith.addf %22, %29 : vector<456x4xf32>
    %31 = vector.extract_strided_slice %24 {offsets = [1, 0], sizes = [456, 4], strides = [1, 1]} : vector<480x4xf32> to vector<456x4xf32>
    %32 = arith.truncf %31 : vector<456x4xf32> to vector<456x4xbf16>
    %c1_21 = arith.constant 1 : index
    %c1_22 = arith.constant 1 : index
    %c0_23 = arith.constant 0 : index
    %c0_24 = arith.constant 0 : index
    %33 = vector.load %arg2[%c1_21, %c1_22, %c0_23, %c0_24] : memref<3x3x4x4xbf16, #tpu.memory_space<vmem>>, vector<1x1x4x4xbf16>
    %34 = vector.shape_cast %33 : vector<1x1x4x4xbf16> to vector<4x4xbf16>
    %cst_25 = arith.constant dense<0.000000e+00> : vector<456x4xf32>
    %35 = tpu.matmul %32, %34, %cst_25 {dimension_numbers = #tpu.dot_dimension_numbers<[1], [0], [0], [1], [0, 0, 1, 1], [], []>} : vector<456x4xbf16>, vector<4x4xbf16>, vector<456x4xf32> -> vector<456x4xf32>
    %36 = arith.addf %30, %35 : vector<456x4xf32>
    %37 = vector.extract_strided_slice %24 {offsets = [2, 0], sizes = [456, 4], strides = [1, 1]} : vector<480x4xf32> to vector<456x4xf32>
    %38 = arith.truncf %37 : vector<456x4xf32> to vector<456x4xbf16>
    %c1_26 = arith.constant 1 : index
    %c2_27 = arith.constant 2 : index
    %c0_28 = arith.constant 0 : index
    %c0_29 = arith.constant 0 : index
    %39 = vector.load %arg2[%c1_26, %c2_27, %c0_28, %c0_29] : memref<3x3x4x4xbf16, #tpu.memory_space<vmem>>, vector<1x1x4x4xbf16>
    %40 = vector.shape_cast %39 : vector<1x1x4x4xbf16> to vector<4x4xbf16>
    %cst_30 = arith.constant dense<0.000000e+00> : vector<456x4xf32>
    %41 = tpu.matmul %38, %40, %cst_30 {dimension_numbers = #tpu.dot_dimension_numbers<[1], [0], [0], [1], [0, 0, 1, 1], [], []>} : vector<456x4xbf16>, vector<4x4xbf16>, vector<456x4xf32> -> vector<456x4xf32>
    %42 = arith.addf %36, %41 : vector<456x4xf32>
    %43 = vector.extract_strided_slice %1 {offsets = [2, 0, 0], sizes = [20, 24, 4], strides = [1, 1, 1]} : vector<22x24x4xf32> to vector<20x24x4xf32>
    %44 = vector.shape_cast %43 : vector<20x24x4xf32> to vector<480x4xf32>
    %45 = vector.extract_strided_slice %44 {offsets = [0, 0], sizes = [456, 4], strides = [1, 1]} : vector<480x4xf32> to vector<456x4xf32>
    %46 = arith.truncf %45 : vector<456x4xf32> to vector<456x4xbf16>
    %c2_31 = arith.constant 2 : index
    %c0_32 = arith.constant 0 : index
    %c0_33 = arith.constant 0 : index
    %c0_34 = arith.constant 0 : index
    %47 = vector.load %arg2[%c2_31, %c0_32, %c0_33, %c0_34] : memref<3x3x4x4xbf16, #tpu.memory_space<vmem>>, vector<1x1x4x4xbf16>
    %48 = vector.shape_cast %47 : vector<1x1x4x4xbf16> to vector<4x4xbf16>
    %cst_35 = arith.constant dense<0.000000e+00> : vector<456x4xf32>
    %49 = tpu.matmul %46, %48, %cst_35 {dimension_numbers = #tpu.dot_dimension_numbers<[1], [0], [0], [1], [0, 0, 1, 1], [], []>} : vector<456x4xbf16>, vector<4x4xbf16>, vector<456x4xf32> -> vector<456x4xf32>
    %50 = arith.addf %42, %49 : vector<456x4xf32>
    %51 = vector.extract_strided_slice %44 {offsets = [1, 0], sizes = [456, 4], strides = [1, 1]} : vector<480x4xf32> to vector<456x4xf32>
    %52 = arith.truncf %51 : vector<456x4xf32> to vector<456x4xbf16>
    %c2_36 = arith.constant 2 : index
    %c1_37 = arith.constant 1 : index
    %c0_38 = arith.constant 0 : index
    %c0_39 = arith.constant 0 : index
    %53 = vector.load %arg2[%c2_36, %c1_37, %c0_38, %c0_39] : memref<3x3x4x4xbf16, #tpu.memory_space<vmem>>, vector<1x1x4x4xbf16>
    %54 = vector.shape_cast %53 : vector<1x1x4x4xbf16> to vector<4x4xbf16>
    %cst_40 = arith.constant dense<0.000000e+00> : vector<456x4xf32>
    %55 = tpu.matmul %52, %54, %cst_40 {dimension_numbers = #tpu.dot_dimension_numbers<[1], [0], [0], [1], [0, 0, 1, 1], [], []>} : vector<456x4xbf16>, vector<4x4xbf16>, vector<456x4xf32> -> vector<456x4xf32>
    %56 = arith.addf %50, %55 : vector<456x4xf32>
    %57 = vector.extract_strided_slice %44 {offsets = [2, 0], sizes = [456, 4], strides = [1, 1]} : vector<480x4xf32> to vector<456x4xf32>
    %58 = arith.truncf %57 : vector<456x4xf32> to vector<456x4xbf16>
    %c2_41 = arith.constant 2 : index
    %c2_42 = arith.constant 2 : index
    %c0_43 = arith.constant 0 : index
    %c0_44 = arith.constant 0 : index
    %59 = vector.load %arg2[%c2_41, %c2_42, %c0_43, %c0_44] : memref<3x3x4x4xbf16, #tpu.memory_space<vmem>>, vector<1x1x4x4xbf16>
    %60 = vector.shape_cast %59 : vector<1x1x4x4xbf16> to vector<4x4xbf16>
    %cst_45 = arith.constant dense<0.000000e+00> : vector<456x4xf32>
    %61 = tpu.matmul %58, %60, %cst_45 {dimension_numbers = #tpu.dot_dimension_numbers<[1], [0], [0], [1], [0, 0, 1, 1], [], []>} : vector<456x4xbf16>, vector<4x4xbf16>, vector<456x4xf32> -> vector<456x4xf32>
    %62 = arith.addf %56, %61 : vector<456x4xf32>
    %c0_46 = arith.constant 0 : index
    %c0_47 = arith.constant 0 : index
    %63 = vector.load %arg4[%c0_46, %c0_47] : memref<1x4xf32, #tpu.memory_space<vmem>>, vector<1x4xf32>
    %64 = vector.broadcast %63 : vector<1x4xf32> to vector<456x4xf32>
    %65 = arith.mulf %62, %64 : vector<456x4xf32>
    %c0_48 = arith.constant 0 : index
    %c0_49 = arith.constant 0 : index
    %66 = vector.load %arg5[%c0_48, %c0_49] : memref<1x4xf32, #tpu.memory_space<vmem>>, vector<1x4xf32>
    %67 = vector.broadcast %66 : vector<1x4xf32> to vector<456x4xf32>
    %68 = arith.addf %65, %67 : vector<456x4xf32>
    %cst_50 = arith.constant 0.000000e+00 : f32
    %69 = vector.broadcast %cst_50 : f32 to vector<456x4xf32>
    %70 = arith.maximumf %68, %69 : vector<456x4xf32>
    %71 = vector.shape_cast %70 : vector<456x4xf32> to vector<19x24x4xf32>
    %c0_51 = arith.constant 0 : index
    %c0_52 = arith.constant 0 : index
    %c0_53 = arith.constant 0 : index
    %72 = vector.load %arg8[%c0_51, %c0_52, %c0_53] : memref<19x24x1xf32, #tpu.memory_space<vmem>>, vector<19x24x1xf32>
    %73 = vector.broadcast %72 : vector<19x24x1xf32> to vector<19x24x4xf32>
    %74 = arith.mulf %71, %73 : vector<19x24x4xf32>
    %cst_54 = arith.constant 0.000000e+00 : f32
    %75 = vector.broadcast %cst_54 : f32 to vector<384x4xf32>
    %76 = vector.extract_strided_slice %74 {offsets = [0, 0, 0], sizes = [17, 24, 4], strides = [1, 1, 1]} : vector<19x24x4xf32> to vector<17x24x4xf32>
    %77 = vector.shape_cast %76 : vector<17x24x4xf32> to vector<408x4xf32>
    %78 = vector.extract_strided_slice %77 {offsets = [0, 0], sizes = [384, 4], strides = [1, 1]} : vector<408x4xf32> to vector<384x4xf32>
    %79 = arith.truncf %78 : vector<384x4xf32> to vector<384x4xbf16>
    %c0_55 = arith.constant 0 : index
    %c0_56 = arith.constant 0 : index
    %c0_57 = arith.constant 0 : index
    %c0_58 = arith.constant 0 : index
    %80 = vector.load %arg3[%c0_55, %c0_56, %c0_57, %c0_58] : memref<3x3x4x4xbf16, #tpu.memory_space<vmem>>, vector<1x1x4x4xbf16>
    %81 = vector.shape_cast %80 : vector<1x1x4x4xbf16> to vector<4x4xbf16>
    %cst_59 = arith.constant dense<0.000000e+00> : vector<384x4xf32>
    %82 = tpu.matmul %79, %81, %cst_59 {dimension_numbers = #tpu.dot_dimension_numbers<[1], [0], [0], [1], [0, 0, 1, 1], [], []>} : vector<384x4xbf16>, vector<4x4xbf16>, vector<384x4xf32> -> vector<384x4xf32>
    %83 = arith.addf %75, %82 : vector<384x4xf32>
    %84 = vector.extract_strided_slice %77 {offsets = [1, 0], sizes = [384, 4], strides = [1, 1]} : vector<408x4xf32> to vector<384x4xf32>
    %85 = arith.truncf %84 : vector<384x4xf32> to vector<384x4xbf16>
    %c0_60 = arith.constant 0 : index
    %c1_61 = arith.constant 1 : index
    %c0_62 = arith.constant 0 : index
    %c0_63 = arith.constant 0 : index
    %86 = vector.load %arg3[%c0_60, %c1_61, %c0_62, %c0_63] : memref<3x3x4x4xbf16, #tpu.memory_space<vmem>>, vector<1x1x4x4xbf16>
    %87 = vector.shape_cast %86 : vector<1x1x4x4xbf16> to vector<4x4xbf16>
    %cst_64 = arith.constant dense<0.000000e+00> : vector<384x4xf32>
    %88 = tpu.matmul %85, %87, %cst_64 {dimension_numbers = #tpu.dot_dimension_numbers<[1], [0], [0], [1], [0, 0, 1, 1], [], []>} : vector<384x4xbf16>, vector<4x4xbf16>, vector<384x4xf32> -> vector<384x4xf32>
    %89 = arith.addf %83, %88 : vector<384x4xf32>
    %90 = vector.extract_strided_slice %77 {offsets = [2, 0], sizes = [384, 4], strides = [1, 1]} : vector<408x4xf32> to vector<384x4xf32>
    %91 = arith.truncf %90 : vector<384x4xf32> to vector<384x4xbf16>
    %c0_65 = arith.constant 0 : index
    %c2_66 = arith.constant 2 : index
    %c0_67 = arith.constant 0 : index
    %c0_68 = arith.constant 0 : index
    %92 = vector.load %arg3[%c0_65, %c2_66, %c0_67, %c0_68] : memref<3x3x4x4xbf16, #tpu.memory_space<vmem>>, vector<1x1x4x4xbf16>
    %93 = vector.shape_cast %92 : vector<1x1x4x4xbf16> to vector<4x4xbf16>
    %cst_69 = arith.constant dense<0.000000e+00> : vector<384x4xf32>
    %94 = tpu.matmul %91, %93, %cst_69 {dimension_numbers = #tpu.dot_dimension_numbers<[1], [0], [0], [1], [0, 0, 1, 1], [], []>} : vector<384x4xbf16>, vector<4x4xbf16>, vector<384x4xf32> -> vector<384x4xf32>
    %95 = arith.addf %89, %94 : vector<384x4xf32>
    %96 = vector.extract_strided_slice %74 {offsets = [1, 0, 0], sizes = [17, 24, 4], strides = [1, 1, 1]} : vector<19x24x4xf32> to vector<17x24x4xf32>
    %97 = vector.shape_cast %96 : vector<17x24x4xf32> to vector<408x4xf32>
    %98 = vector.extract_strided_slice %97 {offsets = [0, 0], sizes = [384, 4], strides = [1, 1]} : vector<408x4xf32> to vector<384x4xf32>
    %99 = arith.truncf %98 : vector<384x4xf32> to vector<384x4xbf16>
    %c1_70 = arith.constant 1 : index
    %c0_71 = arith.constant 0 : index
    %c0_72 = arith.constant 0 : index
    %c0_73 = arith.constant 0 : index
    %100 = vector.load %arg3[%c1_70, %c0_71, %c0_72, %c0_73] : memref<3x3x4x4xbf16, #tpu.memory_space<vmem>>, vector<1x1x4x4xbf16>
    %101 = vector.shape_cast %100 : vector<1x1x4x4xbf16> to vector<4x4xbf16>
    %cst_74 = arith.constant dense<0.000000e+00> : vector<384x4xf32>
    %102 = tpu.matmul %99, %101, %cst_74 {dimension_numbers = #tpu.dot_dimension_numbers<[1], [0], [0], [1], [0, 0, 1, 1], [], []>} : vector<384x4xbf16>, vector<4x4xbf16>, vector<384x4xf32> -> vector<384x4xf32>
    %103 = arith.addf %95, %102 : vector<384x4xf32>
    %104 = vector.extract_strided_slice %97 {offsets = [1, 0], sizes = [384, 4], strides = [1, 1]} : vector<408x4xf32> to vector<384x4xf32>
    %105 = arith.truncf %104 : vector<384x4xf32> to vector<384x4xbf16>
    %c1_75 = arith.constant 1 : index
    %c1_76 = arith.constant 1 : index
    %c0_77 = arith.constant 0 : index
    %c0_78 = arith.constant 0 : index
    %106 = vector.load %arg3[%c1_75, %c1_76, %c0_77, %c0_78] : memref<3x3x4x4xbf16, #tpu.memory_space<vmem>>, vector<1x1x4x4xbf16>
    %107 = vector.shape_cast %106 : vector<1x1x4x4xbf16> to vector<4x4xbf16>
    %cst_79 = arith.constant dense<0.000000e+00> : vector<384x4xf32>
    %108 = tpu.matmul %105, %107, %cst_79 {dimension_numbers = #tpu.dot_dimension_numbers<[1], [0], [0], [1], [0, 0, 1, 1], [], []>} : vector<384x4xbf16>, vector<4x4xbf16>, vector<384x4xf32> -> vector<384x4xf32>
    %109 = arith.addf %103, %108 : vector<384x4xf32>
    %110 = vector.extract_strided_slice %97 {offsets = [2, 0], sizes = [384, 4], strides = [1, 1]} : vector<408x4xf32> to vector<384x4xf32>
    %111 = arith.truncf %110 : vector<384x4xf32> to vector<384x4xbf16>
    %c1_80 = arith.constant 1 : index
    %c2_81 = arith.constant 2 : index
    %c0_82 = arith.constant 0 : index
    %c0_83 = arith.constant 0 : index
    %112 = vector.load %arg3[%c1_80, %c2_81, %c0_82, %c0_83] : memref<3x3x4x4xbf16, #tpu.memory_space<vmem>>, vector<1x1x4x4xbf16>
    %113 = vector.shape_cast %112 : vector<1x1x4x4xbf16> to vector<4x4xbf16>
    %cst_84 = arith.constant dense<0.000000e+00> : vector<384x4xf32>
    %114 = tpu.matmul %111, %113, %cst_84 {dimension_numbers = #tpu.dot_dimension_numbers<[1], [0], [0], [1], [0, 0, 1, 1], [], []>} : vector<384x4xbf16>, vector<4x4xbf16>, vector<384x4xf32> -> vector<384x4xf32>
    %115 = arith.addf %109, %114 : vector<384x4xf32>
    %116 = vector.extract_strided_slice %74 {offsets = [2, 0, 0], sizes = [17, 24, 4], strides = [1, 1, 1]} : vector<19x24x4xf32> to vector<17x24x4xf32>
    %117 = vector.shape_cast %116 : vector<17x24x4xf32> to vector<408x4xf32>
    %118 = vector.extract_strided_slice %117 {offsets = [0, 0], sizes = [384, 4], strides = [1, 1]} : vector<408x4xf32> to vector<384x4xf32>
    %119 = arith.truncf %118 : vector<384x4xf32> to vector<384x4xbf16>
    %c2_85 = arith.constant 2 : index
    %c0_86 = arith.constant 0 : index
    %c0_87 = arith.constant 0 : index
    %c0_88 = arith.constant 0 : index
    %120 = vector.load %arg3[%c2_85, %c0_86, %c0_87, %c0_88] : memref<3x3x4x4xbf16, #tpu.memory_space<vmem>>, vector<1x1x4x4xbf16>
    %121 = vector.shape_cast %120 : vector<1x1x4x4xbf16> to vector<4x4xbf16>
    %cst_89 = arith.constant dense<0.000000e+00> : vector<384x4xf32>
    %122 = tpu.matmul %119, %121, %cst_89 {dimension_numbers = #tpu.dot_dimension_numbers<[1], [0], [0], [1], [0, 0, 1, 1], [], []>} : vector<384x4xbf16>, vector<4x4xbf16>, vector<384x4xf32> -> vector<384x4xf32>
    %123 = arith.addf %115, %122 : vector<384x4xf32>
    %124 = vector.extract_strided_slice %117 {offsets = [1, 0], sizes = [384, 4], strides = [1, 1]} : vector<408x4xf32> to vector<384x4xf32>
    %125 = arith.truncf %124 : vector<384x4xf32> to vector<384x4xbf16>
    %c2_90 = arith.constant 2 : index
    %c1_91 = arith.constant 1 : index
    %c0_92 = arith.constant 0 : index
    %c0_93 = arith.constant 0 : index
    %126 = vector.load %arg3[%c2_90, %c1_91, %c0_92, %c0_93] : memref<3x3x4x4xbf16, #tpu.memory_space<vmem>>, vector<1x1x4x4xbf16>
    %127 = vector.shape_cast %126 : vector<1x1x4x4xbf16> to vector<4x4xbf16>
    %cst_94 = arith.constant dense<0.000000e+00> : vector<384x4xf32>
    %128 = tpu.matmul %125, %127, %cst_94 {dimension_numbers = #tpu.dot_dimension_numbers<[1], [0], [0], [1], [0, 0, 1, 1], [], []>} : vector<384x4xbf16>, vector<4x4xbf16>, vector<384x4xf32> -> vector<384x4xf32>
    %129 = arith.addf %123, %128 : vector<384x4xf32>
    %130 = vector.extract_strided_slice %117 {offsets = [2, 0], sizes = [384, 4], strides = [1, 1]} : vector<408x4xf32> to vector<384x4xf32>
    %131 = arith.truncf %130 : vector<384x4xf32> to vector<384x4xbf16>
    %c2_95 = arith.constant 2 : index
    %c2_96 = arith.constant 2 : index
    %c0_97 = arith.constant 0 : index
    %c0_98 = arith.constant 0 : index
    %132 = vector.load %arg3[%c2_95, %c2_96, %c0_97, %c0_98] : memref<3x3x4x4xbf16, #tpu.memory_space<vmem>>, vector<1x1x4x4xbf16>
    %133 = vector.shape_cast %132 : vector<1x1x4x4xbf16> to vector<4x4xbf16>
    %cst_99 = arith.constant dense<0.000000e+00> : vector<384x4xf32>
    %134 = tpu.matmul %131, %133, %cst_99 {dimension_numbers = #tpu.dot_dimension_numbers<[1], [0], [0], [1], [0, 0, 1, 1], [], []>} : vector<384x4xbf16>, vector<4x4xbf16>, vector<384x4xf32> -> vector<384x4xf32>
    %135 = arith.addf %129, %134 : vector<384x4xf32>
    %c0_100 = arith.constant 0 : index
    %c0_101 = arith.constant 0 : index
    %136 = vector.load %arg6[%c0_100, %c0_101] : memref<1x4xf32, #tpu.memory_space<vmem>>, vector<1x4xf32>
    %137 = vector.broadcast %136 : vector<1x4xf32> to vector<384x4xf32>
    %138 = arith.mulf %135, %137 : vector<384x4xf32>
    %c0_102 = arith.constant 0 : index
    %c0_103 = arith.constant 0 : index
    %139 = vector.load %arg7[%c0_102, %c0_103] : memref<1x4xf32, #tpu.memory_space<vmem>>, vector<1x4xf32>
    %140 = vector.broadcast %139 : vector<1x4xf32> to vector<384x4xf32>
    %141 = arith.addf %138, %140 : vector<384x4xf32>
    %142 = vector.shape_cast %141 : vector<384x4xf32> to vector<16x24x4xf32>
    %143 = vector.extract_strided_slice %142 {offsets = [0, 0, 0], sizes = [16, 16, 4], strides = [1, 1, 1]} : vector<16x24x4xf32> to vector<16x16x4xf32>
    %144 = vector.extract_strided_slice %1 {offsets = [2, 2, 0], sizes = [16, 16, 4], strides = [1, 1, 1]} : vector<22x24x4xf32> to vector<16x16x4xf32>
    %145 = arith.addf %143, %144 : vector<16x16x4xf32>
    %cst_104 = arith.constant 0.000000e+00 : f32
    %146 = vector.broadcast %cst_104 : f32 to vector<16x16x4xf32>
    %147 = arith.maximumf %145, %146 : vector<16x16x4xf32>
    %c0_105 = arith.constant 0 : index
    %c0_106 = arith.constant 0 : index
    %c0_107 = arith.constant 0 : index
    %c0_108 = arith.constant 0 : index
    %148 = vector.load %arg9[%c0_105, %c0_106, %c0_107, %c0_108] : memref<1x16x16x4xf32, #tpu.memory_space<vmem>>, vector<1x16x16x4xf32>
    %149 = vector.shape_cast %148 : vector<1x16x16x4xf32> to vector<16x16x4xf32>
    %150 = vector.shape_cast %147 : vector<16x16x4xf32> to vector<1x16x16x4xf32>
    tpu.vector_store %arg9[%c0_105, %c0_106, %c0_107, %c0_108], %150 {strides = array<i32>} : memref<1x16x16x4xf32, #tpu.memory_space<vmem>>, vector<1x16x16x4xf32>,
    return
  }
  func.func @transform_0(%arg0: i32) -> (i32, i32, i32, i32) {
    %c0_i32 = arith.constant 0 : i32
    %c0_i32_0 = arith.constant 0 : i32
    %c0_i32_1 = arith.constant 0 : i32
    %c0_i32_2 = arith.constant 0 : i32
    return %arg0, %c0_i32, %c0_i32_0, %c0_i32_1 : i32, i32, i32, i32
  }
  func.func @transform_1(%arg0: i32) -> (i32, i32, i32, i32) {
    %c0_i32 = arith.constant 0 : i32
    %c0_i32_0 = arith.constant 0 : i32
    %c0_i32_1 = arith.constant 0 : i32
    %c0_i32_2 = arith.constant 0 : i32
    %c0_i32_3 = arith.constant 0 : i32
    return %c0_i32, %c0_i32_0, %c0_i32_1, %c0_i32_2 : i32, i32, i32, i32
  }
  func.func @transform_2(%arg0: i32) -> (i32, i32, i32, i32) {
    %c0_i32 = arith.constant 0 : i32
    %c0_i32_0 = arith.constant 0 : i32
    %c0_i32_1 = arith.constant 0 : i32
    %c0_i32_2 = arith.constant 0 : i32
    %c0_i32_3 = arith.constant 0 : i32
    return %c0_i32, %c0_i32_0, %c0_i32_1, %c0_i32_2 : i32, i32, i32, i32
  }
  func.func @transform_3(%arg0: i32) -> (i32, i32) {
    %c0_i32 = arith.constant 0 : i32
    %c0_i32_0 = arith.constant 0 : i32
    %c0_i32_1 = arith.constant 0 : i32
    return %c0_i32, %c0_i32_0 : i32, i32
  }
  func.func @transform_4(%arg0: i32) -> (i32, i32) {
    %c0_i32 = arith.constant 0 : i32
    %c0_i32_0 = arith.constant 0 : i32
    %c0_i32_1 = arith.constant 0 : i32
    return %c0_i32, %c0_i32_0 : i32, i32
  }
  func.func @transform_5(%arg0: i32) -> (i32, i32) {
    %c0_i32 = arith.constant 0 : i32
    %c0_i32_0 = arith.constant 0 : i32
    %c0_i32_1 = arith.constant 0 : i32
    return %c0_i32, %c0_i32_0 : i32, i32
  }
  func.func @transform_6(%arg0: i32) -> (i32, i32) {
    %c0_i32 = arith.constant 0 : i32
    %c0_i32_0 = arith.constant 0 : i32
    %c0_i32_1 = arith.constant 0 : i32
    return %c0_i32, %c0_i32_0 : i32, i32
  }
  func.func @transform_7(%arg0: i32) -> (i32, i32, i32) {
    %c0_i32 = arith.constant 0 : i32
    %c0_i32_0 = arith.constant 0 : i32
    %c0_i32_1 = arith.constant 0 : i32
    %c0_i32_2 = arith.constant 0 : i32
    return %c0_i32, %c0_i32_0, %c0_i32_1 : i32, i32, i32
  }
  func.func @transform_8(%arg0: i32) -> (i32, i32, i32, i32) {
    %c0_i32 = arith.constant 0 : i32
    %c0_i32_0 = arith.constant 0 : i32
    %c0_i32_1 = arith.constant 0 : i32
    %c0_i32_2 = arith.constant 0 : i32
    return %arg0, %c0_i32, %c0_i32_0, %c0_i32_1 : i32, i32, i32, i32
  }
}

</mosaic_0001>

<bundles_post_ra>
// kernel: tpu_custom_call.1
= control target key start
LH: loop header
LB: loop body
LE: loop exit
PB: predicated region body
PF: predicated region fallthrough
CT: control target
= control target key end

     0   :  { %s12418_s27 = smov 0   ;;  %s15820_s0 = inlined_call_operand.vmem [shape: f32[2,22,24,4], index: 0, kind: input, shape index: {}]   ;;  %s15821_s1 = inlined_call_operand.vmem [shape: bf16[3,3,4,4], index: 1, kind: input, shape index: {}]   ;;  %s15822_s2 = inlined_call_operand.vmem [shape: bf16[3,3,4,4], index: 2, kind: input, shape index: {}]   ;;  %s15823_s3 = inlined_call_operand.vmem [shape: f32[1,4], index: 3, kind: input, shape index: {}]   ;;  %s15824_s4 = inlined_call_operand.vmem [shape: f32[1,4], index: 4, kind: input, shape index: {}]   ;;  %s15825_s5 = inlined_call_operand.vmem [shape: f32[1,4], index: 5, kind: input, shape index: {}]   ;;  %s15826_s6 = inlined_call_operand.vmem [shape: f32[1,4], index: 6, kind: input, shape index: {}]   ;;  %s15827_s7 = inlined_call_operand.vmem [shape: f32[19,24,1], index: 7, kind: input, shape index: {}]   ;;  %s15828_s8 = inlined_call_operand.vmem [shape: f32[2,16,16,4], index: 8, kind: output, shape index: {}]  }
   0x1 LB: > { %s8544_s28 = sadd.s32 4294967295, %s12368_s27   ;;  %p8548_p0 = scmp.ge.s32.totalorder %s12368_s27, 1  ;;  %s12368_s27 = sphi %s12418_s27, %s18_s27  }
   0x2   : > { %p262_p1 = scmp.lt.s32.totalorder %s12368_s27, 3 }
   0x4   : > { %p263_p2 = pnand %p8548_p0, %p262_p1 }
   0x6   : > { %266 = sbr.rel (%p263_p2) target bundleno = 2688 (0xa80), region = 52 }
   0xd   : > { %vm724_vm0 = vcmask 1041408   ;;  %v8611_v0 = vld [vmem:[%s15821_s1 + $0x4] sm:$0x3]  ;;  %p296_p3 = scmp.lt.s32.totalorder %s8544_s28, 1  ;;  %v15889_v1 = vmov 0.0   ;;  %vm12371_vm1 = vmmov 0  }
   0xe   : > { %9783 = vmatprep.subr.bf16.mxu0 %v15889_v1  ;;  %v12431_v2 = vsel %vm724_vm0, %v8611_v0, 0  ;;  %9785 = vmatprep.mubr.msk.bf16.mxu0 %vm12371_vm1, %v15889_v1  ;;  %v8641_v11 = vld [vmem:[%s15821_s1 + $0x6] sm:$0x3]  ;;  %vm1345_vm2 = vcmask 1046528   ;;  %vm636_vm3 = vcmask 31744   ;;  %vm8280_vm5 = vcmask 1045504  }
   0xf   : > { %15947 = vst [vmem:[#allocation2_spill] sm:$0xff] %v12431_v2  ;;  %9784 = vmatpush3.bf16.msra.mxu0 %v12431_v2  ;;  %s16228_s28 = smov (!%p296_p3, %s8544_s28), 1  ;;  %9547 = vmatprep.subr.bf16.mxu1 %v15889_v1  ;;  %v1929_v16 = vsel %vm724_vm0, %v8641_v11, 0  ;;  %vm404_vm4 = vsmask.f32 7424 }
  0x10   : > { %9901 = vmatprep.subr.bf16.mxu0 %v15889_v1  ;;  %9549 = vmatprep.mubr.msk.bf16.mxu1 %vm12371_vm1, %v15889_v1  ;;  %s12293_s9 = smul.u32 528, %s16228_s28  ;;  %s9051_s21 = sshll.u32 %s16228_s28, 8 }
  0x11   : > { %s15623_s23 = scalar_lea.vmem %s15828_s8, %s9051_s21 }
  0x12   : > { %s12446_s12 = scalar_lea.vmem %s15820_s0, %s12293_s9 }
  0x13   : > { %v307_v3 = vld [vmem:[%s12446_s12] sm:$0xff]  ;;  %v308_v4 = vld [vmem:[%s12446_s12 + $0x8] sm:$0xff]  ;;  %v309_v5 = vld [vmem:[%s12446_s12 + $0x10] sm:$0xff] }
  0x14   : > { %v310_v6 = vld [vmem:[%s12446_s12 + $0x18] sm:$0xff]  ;;  %v12452_v7 = vpack.c.bf16 %v308_v4, %v307_v3  ;;  %v311_v8 = vld [vmem:[%s12446_s12 + $0x20] sm:$0xff]  ;;  %v12456_v9 = vld [vmem:[%s12446_s12 + $0x28] sm:$0xff] }
  0x15   : > { %v12458_v10 = vpack.c.bf16 %v310_v6, %v309_v5  ;;  %v12463_v12 = vpack.c.bf16 %v311_v8, %v310_v6  ;;  %v12468_v15 = vpack.c.bf16 %v12456_v9, %v311_v8  ;;  %v12477_v19 = vld [vmem:[%s12446_s12 + $0x30] sm:$0xff]  ;;  %v12480_v20 = vld [vmem:[%s12446_s12 + $0x38] sm:$0xff]  ;;  %v12493_v24 = vld [vmem:[%s12446_s12 + $0x40] sm:$0xff] }
  0x16   : > { %15948 = vst [vmem:[#allocation3_spill] sm:$0xff] %v12452_v7  ;;  %v1346_v13 = vrot.slane %v12452_v7, 1  ;;  %v12486_v22 = vpack.c.bf16 %v12480_v20, %v12477_v19  ;;  %v12496_v25 = vld [vmem:[%s12446_s12 + $0x48] sm:$0xff]  ;;  %v12508_v29 = vld [vmem:[%s12446_s12 + $0x50] sm:$0xff]  ;;  %v12511_v30 = vld [vmem:[%s12446_s12 + $0x58] sm:$0xff]  ;;  %v12617_v5 = vpack.c.bf16 %v12477_v19, %v12456_v9  ;;  %v12625_v6 = vpack.c.bf16 %v12493_v24, %v12480_v20 }
  0x17   : > { %15949 = vst [vmem:[#allocation4_spill] sm:$0xff] %v12463_v12  ;;  %v1347_v14 = vrot.slane %v12458_v10, 1  ;;  %v1349_v18 = vrot.slane %v12468_v15, 1  ;;  %v12501_v27 = vpack.c.bf16 %v12496_v25, %v12493_v24  ;;  %v12518_v32 = vpack.c.bf16 %v12511_v30, %v12508_v29  ;;  %v319_v34 = vld [vmem:[%s12446_s12 + $0x60] sm:$0xff]  ;;  %v320_v35 = vld [vmem:[%s12446_s12 + $0x68] sm:$0xff]  ;;  %v321_v39 = vld [vmem:[%s12446_s12 + $0x70] sm:$0xff] }
  0x18   : > { %v1351_v23 = vrot.slane %v12486_v22, 1  ;;  %v12530_v37 = vpack.c.bf16 %v320_v35, %v319_v34  ;;  %v322_v40 = vld [vmem:[%s12446_s12 + $0x78] sm:$0xff]  ;;  %v323_v44 = vld [vmem:[%s12446_s12 + $0x80] sm:$0xff]  ;;  %v324_v45 = vld [vmem:[%s12446_s12 + $0x88] sm:$0xff]  ;;  %15958 = vst [vmem:[#allocation13_spill] sm:$0xff] %v12625_v6  ;;  %v12633_v8 = vpack.c.bf16 %v12508_v29, %v12496_v25  ;;  %v12640_v9 = vpack.c.bf16 %v319_v34, %v12511_v30 }
  0x19   : > { %v1348_v17 = vsel %vm1345_vm2, %v1346_v13, %v1347_v14  ;;  %v1350_v21 = vsel %vm1345_vm2, %v1347_v14, %v1349_v18  ;;  %v1353_v28 = vrot.slane %v12501_v27, 1  ;;  %v1355_v33 = vrot.slane %v12518_v32, 1  ;;  %v325_v49 = vld [vmem:[%s12446_s12 + $0x90] sm:$0xff]  ;;  %v326_v50 = vld [vmem:[%s12446_s12 + $0x98] sm:$0xff]  ;;  %v327_v54 = vld [vmem:[%s12446_s12 + $0xa0] sm:$0xff] }
  0x1a   : > { %9786 = vmatmul.mubr.msk.bf16.vlgmr.msra.gmra.mrb[0].mxu0 %vm636_vm3, %v1348_v17  ;;  %v1352_v26 = vsel %vm1345_vm2, %v1349_v18, %v1351_v23  ;;  %v1357_v38 = vrot.slane %v12530_v37, 1  ;;  %v12542_v42 = vpack.c.bf16 %v322_v40, %v321_v39  ;;  %v12554_v47 = vpack.c.bf16 %v324_v45, %v323_v44  ;;  %v328_v55 = vld [vmem:[%s12446_s12 + $0xa8] sm:$0xff]  ;;  %v329_v59 = vld [vmem:[%s12446_s12 + $0xb0] sm:$0xff]  ;;  %v330_v60 = vld [vmem:[%s12446_s12 + $0xb8] sm:$0xff]  ;;  %15959 = vst [vmem:[#allocation14_spill] sm:$0xff] %v12640_v9 }
  0x1b   : > { %9902 = vmatpush3.bf16.msra.mxu0 %v1929_v16  ;;  %9789 = vmatprep.mubr.msk.bf16.mxu0 %vm12371_vm1, %v15889_v1  ;;  %v12514_v31 = vsel %vm1345_vm2, %v1351_v23, %v1353_v28  ;;  %v12528_v36 = vsel %vm1345_vm2, %v1353_v28, %v1355_v33  ;;  %v12566_v52 = vpack.c.bf16 %v326_v50, %v325_v49  ;;  %v8671_v3 = vld [vmem:[%s15821_s1 + $0x8] sm:$0x3]  ;;  %v12677_v18 = vld [vmem:[%s12446_s12 + $0xc0] sm:$0xff]  ;;  %v12680_v19 = vld [vmem:[%s12446_s12 + $0x1b0] sm:$0xff] }
  0x1c   : > { %10019 = vmatprep.subr.bf16.mxu0 %v15889_v1  ;;  %15950 = vst [vmem:[#allocation5_spill] sm:$0xff] %v12514_v31  ;;  %15951 = vst [vmem:[#allocation6_spill] sm:$0xff] %v12528_v36  ;;  %v12540_v41 = vsel %vm1345_vm2, %v1355_v33, %v1357_v38  ;;  %v1359_v43 = vrot.slane %v12542_v42, 1  ;;  %v1361_v48 = vrot.slane %v12554_v47, 1  ;;  %v12578_v57 = vpack.c.bf16 %v328_v55, %v327_v54  ;;  %v12683_v20 = vld [vmem:[%s12446_s12 + $0x1b8] sm:$0xff]  ;;  %v12697_v24 = vld [vmem:[%s12446_s12 + $0xc8] sm:$0xff] }
  0x1d   : > { %15952 = vst [vmem:[#allocation7_spill] sm:$0xff] %v12540_v41  ;;  %v1363_v53 = vrot.slane %v12566_v52, 1  ;;  %v12590_v62 = vpack.c.bf16 %v330_v60, %v329_v59  ;;  %v2542_v4 = vsel %vm724_vm0, %v8671_v3, 0  ;;  %v12646_v11 = vpack.c.bf16 %v321_v39, %v320_v35  ;;  %v12700_v25 = vld [vmem:[%s12446_s12 + $0xd0] sm:$0xff]  ;;  %v12711_v28 = vld [vmem:[%s12446_s12 + $0xd8] sm:$0xff]  ;;  %v12714_v29 = vld [vmem:[%s12446_s12 + $0xe0] sm:$0xff] }
  0x1e   : > { %v12552_v46 = vsel %vm1345_vm2, %v1357_v38, %v1359_v43  ;;  %v12564_v51 = vsel %vm1345_vm2, %v1359_v43, %v1361_v48  ;;  %v1365_v58 = vrot.slane %v12578_v57, 1  ;;  %v12652_v13 = vpack.c.bf16 %v323_v44, %v322_v40  ;;  %v12725_v33 = vld [vmem:[%s12446_s12 + $0xe8] sm:$0xff]  ;;  %v12728_v34 = vld [vmem:[%s12446_s12 + $0xf0] sm:$0xff]  ;;  %v12739_v38 = vld [vmem:[%s12446_s12 + $0xf8] sm:$0xff] }
  0x1f   : > { %15953 = vst [vmem:[#allocation8_spill] sm:$0xff] %v12552_v46  ;;  %15954 = vst [vmem:[#allocation9_spill] sm:$0xff] %v12564_v51  ;;  %v12576_v56 = vsel %vm1345_vm2, %v1361_v48, %v1363_v53  ;;  %v15829_v63 = vrot.slane %v12590_v62, 1  ;;  %v12658_v14 = vpack.c.bf16 %v325_v49, %v324_v45  ;;  %v12664_v16 = vpack.c.bf16 %v327_v54, %v326_v50  ;;  %v12742_v39 = vld [vmem:[%s12446_s12 + $0x100] sm:$0xff]  ;;  %v12753_v43 = vld [vmem:[%s12446_s12 + $0x108] sm:$0xff] }
  0x20   : > { %15955 = vst [vmem:[#allocation10_spill] sm:$0xff] %v12576_v56  ;;  %v12588_v61 = vsel %vm1345_vm2, %v1363_v53, %v1365_v58  ;;  %15960 = vst [vmem:[#allocation15_spill] sm:$0xff] %v12646_v11  ;;  %v12670_v17 = vpack.c.bf16 %v329_v59, %v328_v55  ;;  %v12690_v23 = vpack.c.bf16 %v12677_v18, %v330_v60  ;;  %v12756_v44 = vld [vmem:[%s12446_s12 + $0x110] sm:$0xff]  ;;  %v12767_v48 = vld [vmem:[%s12446_s12 + $0x118] sm:$0xff] }
  0x21   : > { %15956 = vst [vmem:[#allocation11_spill] sm:$0xff] %v12588_v61  ;;  %v12600_v0 = vsel %vm1345_vm2, %v1365_v58, %v15829_v63  ;;  %15961 = vst [vmem:[#allocation16_spill] sm:$0xff] %v12652_v13  ;;  %v12718_v30 = vpack.c.bf16 %v12714_v29, %v12711_v28  ;;  %v12732_v35 = vpack.c.bf16 %v12728_v34, %v12725_v33  ;;  %v12770_v49 = vld [vmem:[%s12446_s12 + $0x120] sm:$0xff]  ;;  %v12781_v53 = vld [vmem:[%s12446_s12 + $0x128] sm:$0xff] }
  0x22   : > { %9790 = vmatmul.mubr.msk.bf16.gmra.mrb[4].mxu0 %vm636_vm3, %v1350_v21  ;;  %15957 = vst [vmem:[#allocation12_spill] sm:$0xff] %v12600_v0  ;;  %v12687_v21 = vpack.c.bf16 %v12683_v20, %v12680_v19  ;;  %v12746_v40 = vpack.c.bf16 %v12742_v39, %v12739_v38  ;;  %v12760_v45 = vpack.c.bf16 %v12756_v44, %v12753_v43  ;;  %v12784_v54 = vld [vmem:[%s12446_s12 + $0x130] sm:$0xff]  ;;  %v12795_v58 = vld [vmem:[%s12446_s12 + $0x138] sm:$0xff]  ;;  %v12798_v59 = vld [vmem:[%s12446_s12 + $0x140] sm:$0xff] }
  0x23   : > { %9793 = vmatprep.mubr.msk.bf16.mxu0 %vm12371_vm1, %v15889_v1  ;;  %v12774_v50 = vpack.c.bf16 %v12770_v49, %v12767_v48  ;;  %v12788_v55 = vpack.c.bf16 %v12784_v54, %v12781_v53  ;;  %15963 = vst [vmem:[#allocation18_spill] sm:$0xff] %v12798_v59  ;;  %v12802_v60 = vpack.c.bf16 %v12798_v59, %v12795_v58  ;;  %v12809_v3 = vld [vmem:[%s12446_s12 + $0x148] sm:$0xff]  ;;  %v2257_v59 = vshll.u32 %v12617_v5, 16 }
  0x24   : > { %15962 = vst [vmem:[#allocation17_spill] sm:$0xff] %v12687_v21  ;;  %15964 = vst [vmem:[#allocation19_spill] sm:$0xff] %v12809_v3  ;;  %v12865_v21 = vld [vmem:[%s12446_s12 + $0x188] sm:$0xff] }
  0x25   : > { %15972 = vst [vmem:[#allocation27_spill] sm:$0xff] %v12865_v21 }
  0x2a   : > { %9794 = vmatmul.mubr.msk.bf16.gmra.mrb[8].mxu0 %vm636_vm3, %v1352_v26  ;;  %v12704_v26 = vpack.c.bf16 %v12700_v25, %v12697_v24 }
  0x2b   : > { %9797 = vmatprep.mubr.msk.bf16.mxu0 %vm12371_vm1, %v15889_v1 }
  0x32   : > { %9798 = vmatmul.mubr.msk.bf16.gmra.mrb[12].mxu0 %vm636_vm3, %v12514_v31  ;;  %v12854_v31 = vld [vmem:[%s12446_s12 + $0x180] sm:$0xff] }
  0x33   : > { %9801 = vmatprep.mubr.msk.bf16.mxu0 %vm12371_vm1, %v15889_v1  ;;  %15971 = vst [vmem:[#allocation26_spill] sm:$0xff] %v12854_v31 }
  0x3a   : > { %9802 = vmatmul.mubr.msk.bf16.gmra.mrb[16].mxu0 %vm636_vm3, %v12528_v36  ;;  %v12851_v36 = vld [vmem:[%s12446_s12 + $0x178] sm:$0xff] }
  0x3b   : > { %9805 = vmatprep.mubr.msk.bf16.mxu0 %vm12371_vm1, %v15889_v1  ;;  %15970 = vst [vmem:[#allocation25_spill] sm:$0xff] %v12851_v36  ;;  %v12858_v2 = vpack.c.bf16 %v12854_v31, %v12851_v36  ;;  %v12879_v31 = vld [vmem:[%s12446_s12 + $0x198] sm:$0xff]  ;;  %v12882_v36 = vld [vmem:[%s12446_s12 + $0x1a0] sm:$0xff] }
  0x3c   : > { %15974 = vst [vmem:[#allocation29_spill] sm:$0xff] %v12879_v31  ;;  %15975 = vst [vmem:[#allocation30_spill] sm:$0xff] %v12882_v36 }
  0x42   : > { %9806 = vmatmul.mubr.msk.bf16.gmra.mrb[20].mxu0 %vm636_vm3, %v12540_v41 }
  0x43   : > { %9809 = vmatprep.mubr.msk.bf16.mxu0 %vm12371_vm1, %v15889_v1 }
  0x4a   : > { %9810 = vmatmul.mubr.msk.bf16.gmra.mrb[24].mxu0 %vm636_vm3, %v12552_v46  ;;  %v12840_v46 = vld [vmem:[%s12446_s12 + $0x170] sm:$0xff] }
  0x4b   : > { %9813 = vmatprep.mubr.msk.bf16.mxu0 %vm12371_vm1, %v15889_v1  ;;  %15969 = vst [vmem:[#allocation24_spill] sm:$0xff] %v12840_v46 }
  0x52   : > { %9814 = vmatmul.mubr.msk.bf16.gmra.mrb[28].mxu0 %vm636_vm3, %v12564_v51  ;;  %v12837_v51 = vld [vmem:[%s12446_s12 + $0x168] sm:$0xff] }
  0x53   : > { %9817 = vmatprep.mubr.msk.bf16.mxu0 %vm12371_vm1, %v15889_v1  ;;  %15968 = vst [vmem:[#allocation23_spill] sm:$0xff] %v12837_v51  ;;  %v12844_v41 = vpack.c.bf16 %v12840_v46, %v12837_v51  ;;  %v12868_v46 = vld [vmem:[%s12446_s12 + $0x190] sm:$0xff] }
  0x54   : > { %15973 = vst [vmem:[#allocation28_spill] sm:$0xff] %v12868_v46  ;;  %v12872_v51 = vpack.c.bf16 %v12868_v46, %v12865_v21  ;;  %v12893_v46 = vld [vmem:[%s12446_s12 + $0x1a8] sm:$0xff] }
  0x55   : > { %15976 = vst [vmem:[#allocation31_spill] sm:$0xff] %v12893_v46  ;;  %v12897_v21 = vpack.c.bf16 %v12680_v19, %v12893_v46  ;;  %v12915_v19 = vld [vmem:[%s12446_s12 + $0x1c8] sm:$0xff]  ;;  %v365_v46 = vld [vmem:[%s12446_s12 + $0x1d0] sm:$0xff] }
  0x56   : > { %15980 = vst [vmem:[#allocation35_spill] sm:$0xff] %v12915_v19 }
  0x57   : > { %15977 = vst [vmem:[#allocation32_spill] sm:$0xff] %v12897_v21 }
  0x5a   : > { %9818 = vmatmul.mubr.msk.bf16.gmra.mrb[32].mxu0 %vm636_vm3, %v12576_v56 }
  0x5b   : > { %9821 = vmatprep.mubr.msk.bf16.mxu0 %vm12371_vm1, %v15889_v1 }
  0x62   : > { %9822 = vmatmul.mubr.msk.bf16.gmra.mrb[36].mxu0 %vm636_vm3, %v12588_v61  ;;  %v12826_v61 = vld [vmem:[%s12446_s12 + $0x160] sm:$0xff] }
  0x63   : > { %9825 = vmatprep.mubr.msk.bf16.mxu0 %vm12371_vm1, %v15889_v1  ;;  %15967 = vst [vmem:[#allocation22_spill] sm:$0xff] %v12826_v61 }
  0x6a   : > { %9826 = vmatmul.mubr.msk.bf16.gmra.mrb[40].mxu0 %vm636_vm3, %v12600_v0  ;;  %v12823_v0 = vld [vmem:[%s12446_s12 + $0x158] sm:$0xff] }
  0x6b   : > { %9903 = vmatprep.mubr.msk.bf16.mxu0 %vm12371_vm1, %v15889_v1  ;;  %15966 = vst [vmem:[#allocation21_spill] sm:$0xff] %v12823_v0  ;;  %v12830_v56 = vpack.c.bf16 %v12826_v61, %v12823_v0  ;;  %v12886_v61 = vpack.c.bf16 %v12882_v36, %v12879_v31  ;;  %v12904_v36 = vld [vmem:[%s12446_s12 + $0x1c0] sm:$0xff]  ;;  %v12919_v0 = vpack.c.bf16 %v365_v46, %v12915_v19  ;;  %v2259_v19 = vrot.slane %v2257_v59, 1 }
  0x6c   : > { %15978 = vst [vmem:[#allocation33_spill] sm:$0xff] %v12904_v36  ;;  %v12908_v31 = vpack.c.bf16 %v12904_v36, %v12683_v20  ;;  %v12926_v20 = vld [vmem:[%s12446_s12 + $0x1d8] sm:$0xff]  ;;  %v2253_v36 = vshll.u32 %v12463_v12, 16 }
  0x6d   : > { %15981 = vst [vmem:[#allocation36_spill] sm:$0xff] %v12919_v0  ;;  %15982 = vst [vmem:[#allocation37_spill] sm:$0xff] %v12926_v20 }
  0x6e   : > { %15979 = vst [vmem:[#allocation34_spill] sm:$0xff] %v12908_v31 }
  0x72   : > { %9904 = vmatmul.mubr.msk.bf16.vlgmr.msra.gmra.mrb[0].mxu0 %vm636_vm3, %v12463_v12 }
  0x73   : > { %10020 = vmatpush3.bf16.msra.mxu0 %v2542_v4  ;;  %9907 = vmatprep.mubr.msk.bf16.mxu0 %vm12371_vm1, %v15889_v1  ;;  %v12812_v4 = vld [vmem:[%s12446_s12 + $0x150] sm:$0xff] }
  0x74   : > { %10137 = vmatprep.subr.bf16.mxu0 %v15889_v1  ;;  %15965 = vst [vmem:[#allocation20_spill] sm:$0xff] %v12812_v4  ;;  %v12816_v63 = vpack.c.bf16 %v12812_v4, %v12809_v3  ;;  %v1838_v4 = vpack.c.bf16 %v12926_v20, %v12926_v20  ;;  %v2255_v3 = vrot.slane %v2253_v36, 1  ;;  %v2261_v20 = vshrl.u32 %v12617_v5, 16 }
  0x75   : > { %v2264_v36 = vshll.u32 %v12625_v6, 16 }
  0x77   : > { %v2266_v59 = vrot.slane %v2264_v36, 1 }
  0x7a   : > { %9908 = vmatmul.mubr.msk.bf16.gmra.mrb[4].mxu0 %vm636_vm3, %v12617_v5 }
  0x7b   : > { %9911 = vmatprep.mubr.msk.bf16.mxu0 %vm12371_vm1, %v15889_v1 }
  0x82   : > { %9912 = vmatmul.mubr.msk.bf16.gmra.mrb[8].mxu0 %vm636_vm3, %v12625_v6 }
  0x83   : > { %9915 = vmatprep.mubr.msk.bf16.mxu0 %vm12371_vm1, %v15889_v1 }
  0x8a   : > { %9916 = vmatmul.mubr.msk.bf16.gmra.mrb[12].mxu0 %vm636_vm3, %v12633_v8 }
  0x8b   : > { %9919 = vmatprep.mubr.msk.bf16.mxu0 %vm12371_vm1, %v15889_v1 }
  0x92   : > { %9920 = vmatmul.mubr.msk.bf16.gmra.mrb[16].mxu0 %vm636_vm3, %v12640_v9 }
  0x93   : > { %9923 = vmatprep.mubr.msk.bf16.mxu0 %vm12371_vm1, %v15889_v1 }
  0x9a   : > { %9924 = vmatmul.mubr.msk.bf16.gmra.mrb[20].mxu0 %vm636_vm3, %v12646_v11 }
  0x9b   : > { %9927 = vmatprep.mubr.msk.bf16.mxu0 %vm12371_vm1, %v15889_v1 }
  0xa2   : > { %9928 = vmatmul.mubr.msk.bf16.gmra.mrb[24].mxu0 %vm636_vm3, %v12652_v13 }
  0xa3   : > { %9931 = vmatprep.mubr.msk.bf16.mxu0 %vm12371_vm1, %v15889_v1 }
  0xaa   : > { %9932 = vmatmul.mubr.msk.bf16.gmra.mrb[28].mxu0 %vm636_vm3, %v12658_v14 }
  0xab   : > { %9935 = vmatprep.mubr.msk.bf16.mxu0 %vm12371_vm1, %v15889_v1 }
  0xb2   : > { %9936 = vmatmul.mubr.msk.bf16.gmra.mrb[32].mxu0 %vm636_vm3, %v12664_v16 }
  0xb3   : > { %9939 = vmatprep.mubr.msk.bf16.mxu0 %vm12371_vm1, %v15889_v1 }
  0xba   : > { %9940 = vmatmul.mubr.msk.bf16.gmra.mrb[36].mxu0 %vm636_vm3, %v12670_v17 }
  0xbb   : > { %9943 = vmatprep.mubr.msk.bf16.mxu0 %vm12371_vm1, %v15889_v1 }
  0xc2   : > { %9944 = vmatmul.mubr.msk.bf16.gmra.mrb[40].mxu0 %vm636_vm3, %v12690_v23 }
  0xc3   : > { %9947 = vmatprep.mubr.msk.bf16.mxu0 %vm12371_vm1, %v15889_v1 }
  0xca   : > { %9948 = vmatmul.mubr.msk.bf16.gmra.mrb[44].mxu0 %vm636_vm3, %v12704_v26 }
  0xcb   : > { %9951 = vmatprep.mubr.msk.bf16.mxu0 %vm12371_vm1, %v15889_v1 }
  0xd2   : > { %9952 = vmatmul.mubr.msk.bf16.gmra.mrb[48].mxu0 %vm636_vm3, %v12718_v30 }
  0xd3   : > { %9955 = vmatprep.mubr.msk.bf16.mxu0 %vm12371_vm1, %v15889_v1 }
  0xda   : > { %9956 = vmatmul.mubr.msk.bf16.gmra.mrb[52].mxu0 %vm636_vm3, %v12732_v35 }
  0xdb   : > { %9959 = vmatprep.mubr.msk.bf16.mxu0 %vm12371_vm1, %v15889_v1 }
  0xe2   : > { %9960 = vmatmul.mubr.msk.bf16.gmra.mrb[56].mxu0 %vm636_vm3, %v12746_v40 }
  0xe3   : > { %9963 = vmatprep.mubr.msk.bf16.mxu0 %vm12371_vm1, %v15889_v1 }
  0xea   : > { %9964 = vmatmul.mubr.msk.bf16.gmra.mrb[60].mxu0 %vm636_vm3, %v12760_v45 }
  0xeb   : > { %9967 = vmatprep.mubr.msk.bf16.mxu0 %vm12371_vm1, %v15889_v1 }
  0xf2   : > { %9968 = vmatmul.mubr.msk.bf16.gmra.mrb[64].mxu0 %vm636_vm3, %v12774_v50 }
  0xf3   : > { %9971 = vmatprep.mubr.msk.bf16.mxu0 %vm12371_vm1, %v15889_v1 }
  0xfa   : > { %9972 = vmatmul.mubr.msk.bf16.gmra.mrb[68].mxu0 %vm636_vm3, %v12788_v55 }
  0xfb   : > { %9975 = vmatprep.mubr.msk.bf16.mxu0 %vm12371_vm1, %v15889_v1 }
 0x102   : > { %9976 = vmatmul.mubr.msk.bf16.gmra.mrb[72].mxu0 %vm636_vm3, %v12802_v60 }
 0x103   : > { %9979 = vmatprep.mubr.msk.bf16.mxu0 %vm12371_vm1, %v15889_v1 }
 0x10a   : > { %9980 = vmatmul.mubr.msk.bf16.gmra.mrb[76].mxu0 %vm636_vm3, %v12816_v63 }
 0x10b   : > { %9983 = vmatprep.mubr.msk.bf16.mxu0 %vm12371_vm1, %v15889_v1 }
 0x112   : > { %9984 = vmatmul.mubr.msk.bf16.gmra.mrb[80].mxu0 %vm636_vm3, %v12830_v56 }
 0x113   : > { %9987 = vmatprep.mubr.msk.bf16.mxu0 %vm12371_vm1, %v15889_v1 }
 0x11a   : > { %9988 = vmatmul.mubr.msk.bf16.gmra.mrb[84].mxu0 %vm636_vm3, %v12844_v41 }
 0x11b   : > { %9991 = vmatprep.mubr.msk.bf16.mxu0 %vm12371_vm1, %v15889_v1 }
 0x122   : > { %9992 = vmatmul.mubr.msk.bf16.gmra.mrb[88].mxu0 %vm636_vm3, %v12858_v2 }
 0x123   : > { %9995 = vmatprep.mubr.msk.bf16.mxu0 %vm12371_vm1, %v15889_v1 }
 0x12a   : > { %9996 = vmatmul.mubr.msk.bf16.gmra.mrb[92].mxu0 %vm636_vm3, %v12872_v51 }
 0x12b   : > { %9999 = vmatprep.mubr.msk.bf16.mxu0 %vm12371_vm1, %v15889_v1 }
 0x132   : > { %10000 = vmatmul.mubr.msk.bf16.gmra.mrb[96].mxu0 %vm636_vm3, %v12886_v61 }
 0x133   : > { %10003 = vmatprep.mubr.msk.bf16.mxu0 %vm12371_vm1, %v15889_v1 }
 0x13a   : > { %10004 = vmatmul.mubr.msk.bf16.gmra.mrb[100].mxu0 %vm636_vm3, %v12897_v21 }
 0x13b   : > { %10007 = vmatprep.mubr.msk.bf16.mxu0 %vm12371_vm1, %v15889_v1 }
 0x142   : > { %10008 = vmatmul.mubr.msk.bf16.gmra.mrb[104].mxu0 %vm636_vm3, %v12908_v31  ;;  %v2251_v31 = vshrl.u32 %v12463_v12, 16 }
 0x143   : > { %10011 = vmatprep.mubr.msk.bf16.mxu0 %vm12371_vm1, %v15889_v1 }
 0x144   : > { %v2256_v46 = vor.u32 %v2255_v3, %v2251_v31  ;;  %v2263_v31 = vor.u32 %v2261_v20, %v2259_v19  ;;  %v2278_v20 = vshll.u32 %v12640_v9, 16 }
 0x146   : > { %v2260_v21 = vsel %vm404_vm4, %v2256_v46, %v2259_v19  ;;  %v2267_v3 = vsel %vm404_vm4, %v2263_v31, %v2266_v59  ;;  %v2271_v46 = vshll.u32 %v12633_v8, 16  ;;  %v2275_v19 = vshrl.u32 %v12633_v8, 16 }
 0x147   : > { %v2280_v31 = vrot.slane %v2278_v20, 1 }
 0x14a   : > { %10012 = vmatmul.mubr.msk.bf16.gmra.mrb[108].mxu0 %vm636_vm3, %v12919_v0  ;;  %v8701_v0 = vld [vmem:[%s15821_s1 + $0xa] sm:$0x3] }
 0x14b   : > { %10015 = vmatprep.mubr.msk.bf16.mxu0 %vm12371_vm1, %v15889_v1  ;;  %v3037_v12 = vsel %vm724_vm0, %v8701_v0, 0 }
 0x152   : > { %10016 = vmatmul.mubr.msk.bf16.gmra.mrb[112].mxu0 %vm636_vm3, %v1838_v4  ;;  %v2268_v4 = vshrl.u32 %v12625_v6, 16  ;;  %v2282_v6 = vshrl.u32 %v12640_v9, 16 }
 0x153   : > { %10021 = vmatprep.mubr.msk.bf16.mxu0 %vm12371_vm1, %v15889_v1 }
 0x154   : > { %v2270_v0 = vor.u32 %v2268_v4, %v2266_v59  ;;  %v2285_v59 = vshll.u32 %v12646_v11, 16  ;;  %v2284_v4 = vor.u32 %v2282_v6, %v2280_v31  ;;  %v2299_v6 = vshll.u32 %v12658_v14, 16 }
 0x15a   : > { %10022 = vmatmul.mubr.msk.bf16.vlgmr.msra.gmra.mrb[0].mxu0 %vm636_vm3, %v2260_v21 }
 0x15b   : > { %10138 = vmatpush3.bf16.msra.mxu0 %v3037_v12  ;;  %10025 = vmatprep.mubr.msk.bf16.mxu0 %vm12371_vm1, %v15889_v1  ;;  %v2273_v12 = vrot.slane %v2271_v46, 1  ;;  %v2287_v46 = vrot.slane %v2285_v59, 1  ;;  %v8552_v59 = vld [vmem:[%s15821_s1 + $0x2] sm:$0x3] }
 0x15c   : > { %10255 = vmatprep.subr.bf16.mxu0 %v15889_v1 }
 0x15d   : > { %v2274_v21 = vsel %vm404_vm4, %v2270_v0, %v2273_v12  ;;  %v2277_v36 = vor.u32 %v2275_v19, %v2273_v12  ;;  %v2288_v0 = vsel %vm404_vm4, %v2284_v4, %v2287_v46  ;;  %v2292_v12 = vshll.u32 %v12652_v13, 16 }
 0x15e   : > { %v406_v4 = vshrl.u32 %v12452_v7, 16 }
 0x15f   : > { %v2294_v20 = vrot.slane %v2292_v12, 1  ;;  %v2301_v12 = vrot.slane %v2299_v6, 1 }
 0x162   : > { %10026 = vmatmul.mubr.msk.bf16.gmra.mrb[4].mxu0 %vm636_vm3, %v2267_v3  ;;  %v2281_v3 = vsel %vm404_vm4, %v2277_v36, %v2280_v31  ;;  %v408_v31 = vshll.u32 %v12452_v7, 16  ;;  %v2306_v7 = vshll.u32 %v12664_v16, 16 }
 0x163   : > { %10029 = vmatprep.mubr.msk.bf16.mxu0 %vm12371_vm1, %v15889_v1 }
 0x164   : > { %v2308_v6 = vrot.slane %v2306_v7, 1  ;;  %v429_v7 = vshll.u32 %v12486_v22, 16 }
 0x16a   : > { %10030 = vmatmul.mubr.msk.bf16.gmra.mrb[8].mxu0 %vm636_vm3, %v2274_v21  ;;  %v2289_v21 = vshrl.u32 %v12646_v11, 16 }
 0x16b   : > { %10033 = vmatprep.mubr.msk.bf16.mxu0 %vm12371_vm1, %v15889_v1 }
 0x16c   : > { %v2291_v19 = vor.u32 %v2289_v21, %v2287_v46  ;;  %v413_v46 = vshll.u32 %v12458_v10, 16 }
 0x16e   : > { %v2295_v36 = vsel %vm404_vm4, %v2291_v19, %v2294_v20  ;;  %v726_v19 = vsel %vm724_vm0, %v8552_v59, 0  ;;  %v415_v11 = vrot.slane %v413_v46, 1 }
 0x16f   : > { %9548 = vmatpush3.bf16.msra.mxu1 %v726_v19  ;;  %v2313_v19 = vshll.u32 %v12670_v17, 16 }
 0x170   : > { %9665 = vmatprep.subr.bf16.mxu1 %v15889_v1 }
 0x172   : > { %10034 = vmatmul.mubr.msk.bf16.gmra.mrb[12].mxu0 %vm636_vm3, %v2281_v3  ;;  %v2296_v3 = vshrl.u32 %v12652_v13, 16 }
 0x173   : > { %10037 = vmatprep.mubr.msk.bf16.mxu0 %vm12371_vm1, %v15889_v1 }
 0x174   : > { %v2298_v21 = vor.u32 %v2296_v3, %v2294_v20  ;;  %v417_v20 = vshrl.u32 %v12458_v10, 16  ;;  %v421_v3 = vshll.u32 %v12468_v15, 16 }
 0x176   : > { %v2302_v9 = vsel %vm404_vm4, %v2298_v21, %v2301_v12  ;;  %v419_v59 = vor.u32 %v417_v20, %v415_v11  ;;  %v2310_v21 = vshrl.u32 %v12664_v16, 16 }
 0x17a   : > { %10038 = vmatmul.mubr.msk.bf16.gmra.mrb[16].mxu0 %vm636_vm3, %v2288_v0  ;;  %v410_v0 = vrot.slane %v408_v31, 1  ;;  %v2303_v31 = vshrl.u32 %v12658_v14, 16 }
 0x17b   : > { %10041 = vmatprep.mubr.msk.bf16.mxu0 %vm12371_vm1, %v15889_v1 }
 0x17c   : > { %v411_v13 = vor.u32 %v410_v0, %v406_v4  ;;  %v423_v4 = vrot.slane %v421_v3, 1 }
 0x17e   : > { %v424_v0 = vsel %vm404_vm4, %v419_v59, %v423_v4  ;;  %v2320_v59 = vshll.u32 %v12690_v23, 16 }
 0x182   : > { %10042 = vmatmul.mubr.msk.bf16.gmra.mrb[20].mxu0 %vm636_vm3, %v2295_v36  ;;  %v416_v36 = vsel %vm404_vm4, %v411_v13, %v415_v11  ;;  %v2305_v13 = vor.u32 %v2303_v31, %v2301_v12  ;;  %v2312_v11 = vor.u32 %v2310_v21, %v2308_v6  ;;  %v2315_v12 = vrot.slane %v2313_v19, 1 }
 0x183   : > { %10045 = vmatprep.mubr.msk.bf16.mxu0 %vm12371_vm1, %v15889_v1  ;;  %9550 = vmatmul.mubr.msk.bf16.vlgmr.msra.gmra.mrb[0].mxu1 %vm636_vm3, %v416_v36  ;;  %v431_v31 = vrot.slane %v429_v7, 1 }
 0x184   : > { %9553 = vmatprep.mubr.msk.bf16.mxu1 %vm12371_vm1, %v15889_v1  ;;  %v2309_v46 = vsel %vm404_vm4, %v2305_v13, %v2308_v6  ;;  %v2316_v3 = vsel %vm404_vm4, %v2312_v11, %v2315_v12  ;;  %v2317_v13 = vshrl.u32 %v12670_v17, 16  ;;  %v433_v6 = vshrl.u32 %v12486_v22, 16 }
 0x185   : > { %v2324_v11 = vshrl.u32 %v12690_v23, 16 }
 0x186   : > { %v435_v21 = vor.u32 %v433_v6, %v431_v31 }
 0x18a   : > { %10046 = vmatmul.mubr.msk.bf16.gmra.mrb[24].mxu0 %vm636_vm3, %v2302_v9  ;;  %v425_v9 = vshrl.u32 %v12468_v15, 16 }
 0x18b   : > { %10049 = vmatprep.mubr.msk.bf16.mxu0 %vm12371_vm1, %v15889_v1  ;;  %9554 = vmatmul.mubr.msk.bf16.gmra.mrb[4].mxu1 %vm636_vm3, %v424_v0  ;;  %v2319_v0 = vor.u32 %v2317_v13, %v2315_v12  ;;  %v441_v12 = vshrl.u32 %v12501_v27, 16 }
 0x18c   : > { %9557 = vmatprep.mubr.msk.bf16.mxu1 %vm12371_vm1, %v15889_v1  ;;  %v427_v36 = vor.u32 %v425_v9, %v423_v4  ;;  %v437_v4 = vshll.u32 %v12501_v27, 16 }
 0x18e   : > { %v432_v20 = vsel %vm404_vm4, %v427_v36, %v431_v31  ;;  %v439_v19 = vrot.slane %v437_v4, 1  ;;  %v2327_v36 = vshll.u32 %v12704_v26, 16  ;;  %v445_v31 = vshll.u32 %v12518_v32, 16 }
 0x190   : > { %v13022_v9 = vsel %vm404_vm4, %v435_v21, %v439_v19  ;;  %v443_v13 = vor.u32 %v441_v12, %v439_v19  ;;  %v2334_v21 = vshll.u32 %v12718_v30, 16  ;;  %v453_v19 = vshll.u32 %v12530_v37, 16 }
 0x191   : > { %15983 = vst [vmem:[#allocation38_spill] sm:$0xff] %v13022_v9 }
 0x192   : > { %10050 = vmatmul.mubr.msk.bf16.gmra.mrb[28].mxu0 %vm636_vm3, %v2309_v46  ;;  %v2322_v46 = vrot.slane %v2320_v59, 1  ;;  %v447_v59 = vrot.slane %v445_v31, 1  ;;  %v455_v12 = vrot.slane %v453_v19, 1 }
 0x193   : > { %10053 = vmatprep.mubr.msk.bf16.mxu0 %vm12371_vm1, %v15889_v1  ;;  %9558 = vmatmul.mubr.msk.bf16.gmra.mrb[8].mxu1 %vm636_vm3, %v432_v20 }
 0x194   : > { %9561 = vmatprep.mubr.msk.bf16.mxu1 %vm12371_vm1, %v15889_v1  ;;  %v2323_v7 = vsel %vm404_vm4, %v2319_v0, %v2322_v46  ;;  %v2326_v20 = vor.u32 %v2324_v11, %v2322_v46  ;;  %v13037_v6 = vsel %vm404_vm4, %v443_v13, %v447_v59  ;;  %v2331_v0 = vshrl.u32 %v12704_v26, 16 }
 0x195   : > { %15984 = vst [vmem:[#allocation39_spill] sm:$0xff] %v13037_v6  ;;  %v449_v46 = vshrl.u32 %v12518_v32, 16  ;;  %v2336_v11 = vrot.slane %v2334_v21, 1  ;;  %v2338_v13 = vshrl.u32 %v12718_v30, 16 }
 0x19a   : > { %10054 = vmatmul.mubr.msk.bf16.gmra.mrb[32].mxu0 %vm636_vm3, %v2316_v3  ;;  %v2329_v3 = vrot.slane %v2327_v36, 1  ;;  %v451_v36 = vor.u32 %v449_v46, %v447_v59  ;;  %v461_v59 = vshll.u32 %v12542_v42, 16 }
 0x19b   : > { %10057 = vmatprep.mubr.msk.bf16.mxu0 %vm12371_vm1, %v15889_v1  ;;  %9562 = vmatmul.mubr.msk.bf16.gmra.mrb[12].mxu1 %vm636_vm3, %v13022_v9 }
 0x19c   : > { %9565 = vmatprep.mubr.msk.bf16.mxu1 %vm12371_vm1, %v15889_v1  ;;  %v2330_v4 = vsel %vm404_vm4, %v2326_v20, %v2329_v3  ;;  %v13052_v31 = vsel %vm404_vm4, %v451_v36, %v455_v12  ;;  %v463_v19 = vrot.slane %v461_v59, 1 }
 0x19d   : > { %15985 = vst [vmem:[#allocation40_spill] sm:$0xff] %v13052_v31 }
 0x1a2   : > { %10058 = vmatmul.mubr.msk.bf16.gmra.mrb[36].mxu0 %vm636_vm3, %v2323_v7  ;;  %v2333_v7 = vor.u32 %v2331_v0, %v2329_v3  ;;  %v457_v3 = vshrl.u32 %v12530_v37, 16  ;;  %v2340_v0 = vor.u32 %v2338_v13, %v2336_v11 }
 0x1a3   : > { %10061 = vmatprep.mubr.msk.bf16.mxu0 %vm12371_vm1, %v15889_v1  ;;  %9566 = vmatmul.mubr.msk.bf16.gmra.mrb[16].mxu1 %vm636_vm3, %v13037_v6  ;;  %v2376_v6 = vshll.u32 %v12802_v60, 16 }
 0x1a4   : > { %9569 = vmatprep.mubr.msk.bf16.mxu1 %vm12371_vm1, %v15889_v1  ;;  %v2337_v20 = vsel %vm404_vm4, %v2333_v7, %v2336_v11  ;;  %v459_v46 = vor.u32 %v457_v3, %v455_v12  ;;  %v465_v11 = vshrl.u32 %v12542_v42, 16  ;;  %v469_v12 = vshll.u32 %v12554_v47, 16 }
 0x1a6   : > { %v13067_v7 = vsel %vm404_vm4, %v459_v46, %v463_v19  ;;  %v467_v3 = vor.u32 %v465_v11, %v463_v19  ;;  %v471_v59 = vrot.slane %v469_v12, 1 }
 0x1a7   : > { %15986 = vst [vmem:[#allocation41_spill] sm:$0xff] %v13067_v7 }
 0x1aa   : > { %10062 = vmatmul.mubr.msk.bf16.gmra.mrb[40].mxu0 %vm636_vm3, %v2330_v4  ;;  %v2341_v4 = vshll.u32 %v12732_v35, 16 }
 0x1ab   : > { %10065 = vmatprep.mubr.msk.bf16.mxu0 %vm12371_vm1, %v15889_v1  ;;  %9570 = vmatmul.mubr.msk.bf16.gmra.mrb[20].mxu1 %vm636_vm3, %v13052_v31  ;;  %v2345_v31 = vshrl.u32 %v12732_v35, 16 }
 0x1ac   : > { %9573 = vmatprep.mubr.msk.bf16.mxu1 %vm12371_vm1, %v15889_v1  ;;  %v2343_v21 = vrot.slane %v2341_v4, 1 }
 0x1ae   : > { %v2344_v36 = vsel %vm404_vm4, %v2340_v0, %v2343_v21  ;;  %v2347_v13 = vor.u32 %v2345_v31, %v2343_v21  ;;  %v13082_v0 = vsel %vm404_vm4, %v467_v3, %v471_v59  ;;  %v473_v31 = vshrl.u32 %v12554_v47, 16 }
 0x1af   : > { %15987 = vst [vmem:[#allocation42_spill] sm:$0xff] %v13082_v0  ;;  %v477_v21 = vshll.u32 %v12566_v52, 16 }
 0x1b0   : > { %v475_v11 = vor.u32 %v473_v31, %v471_v59 }
 0x1b1   : > { %v479_v12 = vrot.slane %v477_v21, 1 }
 0x1b2   : > { %10066 = vmatmul.mubr.msk.bf16.gmra.mrb[44].mxu0 %vm636_vm3, %v2337_v20  ;;  %v2348_v20 = vshll.u32 %v12746_v40, 16 }
 0x1b3   : > { %10069 = vmatprep.mubr.msk.bf16.mxu0 %vm12371_vm1, %v15889_v1  ;;  %9574 = vmatmul.mubr.msk.bf16.gmra.mrb[24].mxu1 %vm636_vm3, %v13067_v7  ;;  %v2352_v7 = vshrl.u32 %v12746_v40, 16 }
 0x1b4   : > { %9577 = vmatprep.mubr.msk.bf16.mxu1 %vm12371_vm1, %v15889_v1  ;;  %v2350_v4 = vrot.slane %v2348_v20, 1 }
 0x1b6   : > { %v2351_v46 = vsel %vm404_vm4, %v2347_v13, %v2350_v4  ;;  %v2354_v19 = vor.u32 %v2352_v7, %v2350_v4  ;;  %v13097_v13 = vsel %vm404_vm4, %v475_v11, %v479_v12  ;;  %v481_v7 = vshrl.u32 %v12566_v52, 16 }
 0x1b7   : > { %15988 = vst [vmem:[#allocation43_spill] sm:$0xff] %v13097_v13  ;;  %v485_v4 = vshll.u32 %v12578_v57, 16 }
 0x1b8   : > { %v483_v31 = vor.u32 %v481_v7, %v479_v12 }
 0x1b9   : > { %v487_v21 = vrot.slane %v485_v4, 1 }
 0x1ba   : > { %10070 = vmatmul.mubr.msk.bf16.gmra.mrb[48].mxu0 %vm636_vm3, %v2344_v36  ;;  %v2355_v36 = vshll.u32 %v12760_v45, 16 }
 0x1bb   : > { %10073 = vmatprep.mubr.msk.bf16.mxu0 %vm12371_vm1, %v15889_v1  ;;  %9578 = vmatmul.mubr.msk.bf16.gmra.mrb[28].mxu1 %vm636_vm3, %v13082_v0  ;;  %v2359_v0 = vshrl.u32 %v12760_v45, 16 }
 0x1bc   : > { %9581 = vmatprep.mubr.msk.bf16.mxu1 %vm12371_vm1, %v15889_v1  ;;  %v2357_v20 = vrot.slane %v2355_v36, 1 }
 0x1be   : > { %v2358_v3 = vsel %vm404_vm4, %v2354_v19, %v2357_v20  ;;  %v2361_v59 = vor.u32 %v2359_v0, %v2357_v20  ;;  %v13112_v19 = vsel %vm404_vm4, %v483_v31, %v487_v21  ;;  %v489_v0 = vshrl.u32 %v12578_v57, 16 }
 0x1bf   : > { %15989 = vst [vmem:[#allocation44_spill] sm:$0xff] %v13112_v19  ;;  %v493_v20 = vshll.u32 %v12590_v62, 16 }
 0x1c0   : > { %v491_v7 = vor.u32 %v489_v0, %v487_v21  ;;  %v13147_v0 = vpack.c.bf16 %v12711_v28, %v12700_v25 }
 0x1c1   : > { %v495_v4 = vrot.slane %v493_v20, 1 }
 0x1c2   : > { %10074 = vmatmul.mubr.msk.bf16.gmra.mrb[52].mxu0 %vm636_vm3, %v2351_v46  ;;  %v2362_v46 = vshll.u32 %v12774_v50, 16  ;;  %v509_v28 = vshll.u32 %v13147_v0, 16 }
 0x1c3   : > { %10077 = vmatprep.mubr.msk.bf16.mxu0 %vm12371_vm1, %v15889_v1  ;;  %9582 = vmatmul.mubr.msk.bf16.gmra.mrb[32].mxu1 %vm636_vm3, %v13097_v13  ;;  %v2366_v13 = vshrl.u32 %v12774_v50, 16  ;;  %v13131_v31 = vsel %vm404_vm4, %v491_v7, %v495_v4  ;;  %v2380_v7 = vshrl.u32 %v12802_v60, 16 }
 0x1c4   : > { %9585 = vmatprep.mubr.msk.bf16.mxu1 %vm12371_vm1, %v15889_v1  ;;  %v2364_v36 = vrot.slane %v2362_v46, 1  ;;  %15990 = vst [vmem:[#allocation45_spill] sm:$0xff] %v13131_v31 }
 0x1c6   : > { %v2365_v11 = vsel %vm404_vm4, %v2361_v59, %v2364_v36  ;;  %v2368_v12 = vor.u32 %v2366_v13, %v2364_v36  ;;  %v13128_v59 = vpack.c.bf16 %v12697_v24, %v12677_v18  ;;  %v497_v18 = vshrl.u32 %v12590_v62, 16 }
 0x1c7   : > { %v2378_v36 = vrot.slane %v2376_v6, 1 }
 0x1c8   : > { %v501_v24 = vshll.u32 %v13128_v59, 16  ;;  %v499_v21 = vor.u32 %v497_v18, %v495_v4  ;;  %v505_v25 = vshrl.u32 %v13128_v59, 16  ;;  %v511_v4 = vrot.slane %v509_v28, 1 }
 0x1c9   : > { %v2382_v6 = vor.u32 %v2380_v7, %v2378_v36  ;;  %v13166_v18 = vpack.c.bf16 %v12725_v33, %v12714_v29  ;;  %v513_v29 = vshrl.u32 %v13147_v0, 16 }
 0x1ca   : > { %10078 = vmatmul.mubr.msk.bf16.gmra.mrb[56].mxu0 %vm636_vm3, %v2358_v3  ;;  %v2369_v3 = vshll.u32 %v12788_v55, 16 }
 0x1cb   : > { %10081 = vmatprep.mubr.msk.bf16.mxu0 %vm12371_vm1, %v15889_v1  ;;  %9586 = vmatmul.mubr.msk.bf16.gmra.mrb[36].mxu1 %vm636_vm3, %v13112_v19  ;;  %v2373_v19 = vshrl.u32 %v12788_v55, 16  ;;  %v517_v33 = vshll.u32 %v13166_v18, 16  ;;  %v515_v7 = vor.u32 %v513_v29, %v511_v4  ;;  %v13204_v29 = vpack.c.bf16 %v12753_v43, %v12742_v39 }
 0x1cc   : > { %9589 = vmatprep.mubr.msk.bf16.mxu1 %vm12371_vm1, %v15889_v1  ;;  %v2371_v46 = vrot.slane %v2369_v3, 1  ;;  %v503_v3 = vrot.slane %v501_v24, 1 }
 0x1cd   : > { %v533_v43 = vshll.u32 %v13204_v29, 16 }
 0x1ce   : > { %v2375_v13 = vor.u32 %v2373_v19, %v2371_v46  ;;  %v13150_v20 = vsel %vm404_vm4, %v499_v21, %v503_v3  ;;  %v2387_v21 = vshrl.u32 %v12816_v63, 16 }
 0x1cf   : > { %15991 = vst [vmem:[#allocation46_spill] sm:$0xff] %v13150_v20 }
 0x1d2   : > { %10082 = vmatmul.mubr.msk.bf16.gmra.mrb[60].mxu0 %vm636_vm3, %v2365_v11  ;;  %v2372_v11 = vsel %vm404_vm4, %v2368_v12, %v2371_v46  ;;  %v2379_v12 = vsel %vm404_vm4, %v2375_v13, %v2378_v36  ;;  %v507_v46 = vor.u32 %v505_v25, %v503_v3  ;;  %v13185_v25 = vpack.c.bf16 %v12739_v38, %v12728_v34 }
 0x1d3   : > { %10085 = vmatprep.mubr.msk.bf16.mxu0 %vm12371_vm1, %v15889_v1  ;;  %9590 = vmatmul.mubr.msk.bf16.gmra.mrb[40].mxu1 %vm636_vm3, %v13131_v31  ;;  %v521_v34 = vshrl.u32 %v13166_v18, 16 }
 0x1d4   : > { %9593 = vmatprep.mubr.msk.bf16.mxu1 %vm12371_vm1, %v15889_v1  ;;  %v13169_v24 = vsel %vm404_vm4, %v507_v46, %v511_v4  ;;  %v2394_v46 = vshrl.u32 %v12830_v56, 16  ;;  %v525_v38 = vshll.u32 %v13185_v25, 16  ;;  %v529_v39 = vshrl.u32 %v13185_v25, 16 }
 0x1d5   : > { %15992 = vst [vmem:[#allocation47_spill] sm:$0xff] %v13169_v24 }
 0x1da   : > { %10086 = vmatmul.mubr.msk.bf16.gmra.mrb[64].mxu0 %vm636_vm3, %v2372_v11  ;;  %v2383_v11 = vshll.u32 %v12816_v63, 16 }
 0x1db   : > { %10089 = vmatprep.mubr.msk.bf16.mxu0 %vm12371_vm1, %v15889_v1  ;;  %9594 = vmatmul.mubr.msk.bf16.gmra.mrb[44].mxu1 %vm636_vm3, %v13150_v20  ;;  %v16011_v20 = vld [vmem:[#allocation23_spill] sm:$0xff] }
 0x1dc   : > { %9597 = vmatprep.mubr.msk.bf16.mxu1 %vm12371_vm1, %v15889_v1  ;;  %v2385_v19 = vrot.slane %v2383_v11, 1  ;;  %v519_v11 = vrot.slane %v517_v33, 1 }
 0x1de   : > { %v2386_v13 = vsel %vm404_vm4, %v2382_v6, %v2385_v19  ;;  %v2389_v36 = vor.u32 %v2387_v21, %v2385_v19  ;;  %v13188_v28 = vsel %vm404_vm4, %v515_v7, %v519_v11  ;;  %v523_v21 = vor.u32 %v521_v34, %v519_v11 }
 0x1df   : > { %15993 = vst [vmem:[#allocation48_spill] sm:$0xff] %v13188_v28  ;;  %v2401_v7 = vshrl.u32 %v12844_v41, 16  ;;  %v13223_v34 = vpack.c.bf16 %v12767_v48, %v12756_v44  ;;  %v537_v44 = vshrl.u32 %v13204_v29, 16 }
 0x1e1   : > { %v541_v48 = vshll.u32 %v13223_v34, 16 }
 0x1e2   : > { %10090 = vmatmul.mubr.msk.bf16.gmra.mrb[68].mxu0 %vm636_vm3, %v2379_v12  ;;  %v2390_v12 = vshll.u32 %v12830_v56, 16 }
 0x1e3   : > { %10093 = vmatprep.mubr.msk.bf16.mxu0 %vm12371_vm1, %v15889_v1  ;;  %9598 = vmatmul.mubr.msk.bf16.gmra.mrb[48].mxu1 %vm636_vm3, %v13169_v24 }
 0x1e4   : > { %9601 = vmatprep.mubr.msk.bf16.mxu1 %vm12371_vm1, %v15889_v1  ;;  %v2392_v3 = vrot.slane %v2390_v12, 1  ;;  %v527_v12 = vrot.slane %v525_v38, 1 }
 0x1e6   : > { %v2393_v6 = vsel %vm404_vm4, %v2389_v36, %v2392_v3  ;;  %v2396_v19 = vor.u32 %v2394_v46, %v2392_v3  ;;  %v13207_v33 = vsel %vm404_vm4, %v523_v21, %v527_v12  ;;  %v531_v46 = vor.u32 %v529_v39, %v527_v12 }
 0x1e7   : > { %15994 = vst [vmem:[#allocation49_spill] sm:$0xff] %v13207_v33  ;;  %v2408_v21 = vshrl.u32 %v12858_v2, 16  ;;  %v13242_v39 = vpack.c.bf16 %v12781_v53, %v12770_v49  ;;  %v545_v49 = vshrl.u32 %v13223_v34, 16 }
 0x1e9   : > { %v549_v53 = vshll.u32 %v13242_v39, 16 }
 0x1ea   : > { %10094 = vmatmul.mubr.msk.bf16.gmra.mrb[72].mxu0 %vm636_vm3, %v2386_v13  ;;  %v2397_v13 = vshll.u32 %v12844_v41, 16 }
 0x1eb   : > { %10097 = vmatprep.mubr.msk.bf16.mxu0 %vm12371_vm1, %v15889_v1  ;;  %9602 = vmatmul.mubr.msk.bf16.gmra.mrb[52].mxu1 %vm636_vm3, %v13188_v28  ;;  %v16007_v28 = vld [vmem:[#allocation36_spill] sm:$0xff] }
 0x1ec   : > { %9605 = vmatprep.mubr.msk.bf16.mxu1 %vm12371_vm1, %v15889_v1  ;;  %v2399_v4 = vrot.slane %v2397_v13, 1  ;;  %v535_v13 = vrot.slane %v533_v43, 1  ;;  %v2439_v24 = vshll.u32 %v16007_v28, 16 }
 0x1ee   : > { %v2400_v36 = vsel %vm404_vm4, %v2396_v19, %v2399_v4  ;;  %v2403_v3 = vor.u32 %v2401_v7, %v2399_v4  ;;  %v13226_v38 = vsel %vm404_vm4, %v531_v46, %v535_v13  ;;  %v539_v7 = vor.u32 %v537_v44, %v535_v13 }
 0x1ef   : > { %15995 = vst [vmem:[#allocation50_spill] sm:$0xff] %v13226_v38  ;;  %v2415_v46 = vshrl.u32 %v12872_v51, 16  ;;  %v13261_v44 = vpack.c.bf16 %v12795_v58, %v12784_v54  ;;  %v553_v54 = vshrl.u32 %v13242_v39, 16 }
 0x1f1   : > { %v557_v58 = vshll.u32 %v13261_v44, 16 }
 0x1f2   : > { %10098 = vmatmul.mubr.msk.bf16.gmra.mrb[76].mxu0 %vm636_vm3, %v2393_v6  ;;  %v2404_v6 = vshll.u32 %v12858_v2, 16 }
 0x1f3   : > { %10101 = vmatprep.mubr.msk.bf16.mxu0 %vm12371_vm1, %v15889_v1  ;;  %9606 = vmatmul.mubr.msk.bf16.gmra.mrb[56].mxu1 %vm636_vm3, %v13207_v33 }
 0x1f4   : > { %9609 = vmatprep.mubr.msk.bf16.mxu1 %vm12371_vm1, %v15889_v1  ;;  %v2406_v11 = vrot.slane %v2404_v6, 1  ;;  %v543_v6 = vrot.slane %v541_v48, 1 }
 0x1f6   : > { %v2407_v19 = vsel %vm404_vm4, %v2403_v3, %v2406_v11  ;;  %v2410_v4 = vor.u32 %v2408_v21, %v2406_v11  ;;  %v13245_v43 = vsel %vm404_vm4, %v539_v7, %v543_v6  ;;  %v547_v21 = vor.u32 %v545_v49, %v543_v6  ;;  %v15999_v49 = vld [vmem:[#allocation18_spill] sm:$0xff] }
 0x1f7   : > { %15996 = vst [vmem:[#allocation51_spill] sm:$0xff] %v13245_v43  ;;  %v2422_v7 = vshrl.u32 %v12886_v61, 16 }
 0x1fa   : > { %10102 = vmatmul.mubr.msk.bf16.gmra.mrb[80].mxu0 %vm636_vm3, %v2400_v36  ;;  %v2411_v36 = vshll.u32 %v12872_v51, 16 }
 0x1fb   : > { %10105 = vmatprep.mubr.msk.bf16.mxu0 %vm12371_vm1, %v15889_v1  ;;  %9610 = vmatmul.mubr.msk.bf16.gmra.mrb[60].mxu1 %vm636_vm3, %v13226_v38  ;;  %v16003_v38 = vld [vmem:[#allocation34_spill] sm:$0xff] }
 0x1fc   : > { %9613 = vmatprep.mubr.msk.bf16.mxu1 %vm12371_vm1, %v15889_v1  ;;  %v2413_v12 = vrot.slane %v2411_v36, 1  ;;  %v551_v36 = vrot.slane %v549_v53, 1  ;;  %v16000_v53 = vld [vmem:[#allocation19_spill] sm:$0xff]  ;;  %v2432_v33 = vshll.u32 %v16003_v38, 16 }
 0x1fe   : > { %v2414_v3 = vsel %vm404_vm4, %v2410_v4, %v2413_v12  ;;  %v2417_v11 = vor.u32 %v2415_v46, %v2413_v12  ;;  %v13264_v48 = vsel %vm404_vm4, %v547_v21, %v551_v36  ;;  %v555_v46 = vor.u32 %v553_v54, %v551_v36 }
 0x1ff   : > { %15997 = vst [vmem:[#allocation52_spill] sm:$0xff] %v13264_v48 }
 0x202   : > { %10106 = vmatmul.mubr.msk.bf16.gmra.mrb[84].mxu0 %vm636_vm3, %v2407_v19  ;;  %v2418_v19 = vshll.u32 %v12886_v61, 16 }
 0x203   : > { %10109 = vmatprep.mubr.msk.bf16.mxu0 %vm12371_vm1, %v15889_v1  ;;  %9614 = vmatmul.mubr.msk.bf16.gmra.mrb[64].mxu1 %vm636_vm3, %v13245_v43 }
 0x204   : > { %9617 = vmatprep.mubr.msk.bf16.mxu1 %vm12371_vm1, %v15889_v1  ;;  %v2420_v13 = vrot.slane %v2418_v19, 1  ;;  %v559_v19 = vrot.slane %v557_v58, 1 }
 0x206   : > { %v2421_v4 = vsel %vm404_vm4, %v2417_v11, %v2420_v13  ;;  %v2424_v12 = vor.u32 %v2422_v7, %v2420_v13  ;;  %v13280_v11 = vpack.c.bf16 %v16000_v53, %v15999_v49  ;;  %v13283_v21 = vsel %vm404_vm4, %v555_v46, %v559_v19  ;;  %v16005_v46 = vld [vmem:[#allocation21_spill] sm:$0xff] }
 0x207   : > { %16002 = vst [vmem:[#allocation18_spill] sm:$0xff] %v13283_v21  ;;  %v2434_v7 = vrot.slane %v2432_v33, 1 }
 0x208   : > { %v565_v13 = vshll.u32 %v13280_v11, 16  ;;  %v569_v33 = vshrl.u32 %v13280_v11, 16 }
 0x20a   : > { %10110 = vmatmul.mubr.msk.bf16.gmra.mrb[88].mxu0 %vm636_vm3, %v2414_v3  ;;  %v15998_v3 = vld [vmem:[#allocation32_spill] sm:$0xff]  ;;  %v567_v58 = vrot.slane %v565_v13, 1 }
 0x20b   : > { %10113 = vmatprep.mubr.msk.bf16.mxu0 %vm12371_vm1, %v15889_v1  ;;  %v2425_v43 = vshll.u32 %v15998_v3, 16  ;;  %9618 = vmatmul.mubr.msk.bf16.gmra.mrb[68].mxu1 %vm636_vm3, %v13264_v48  ;;  %16001 = vst [vmem:[#allocation32_spill] sm:$0xff] %v13280_v11  ;;  %v2429_v48 = vshrl.u32 %v15998_v3, 16 }
 0x20c   : > { %9621 = vmatprep.mubr.msk.bf16.mxu1 %vm12371_vm1, %v15889_v1 }
 0x20d   : > { %v2427_v6 = vrot.slane %v2425_v43, 1  ;;  %v561_v43 = vshrl.u32 %v13261_v44, 16 }
 0x20f   : > { %v2431_v36 = vor.u32 %v2429_v48, %v2427_v6  ;;  %v563_v54 = vor.u32 %v561_v43, %v559_v19  ;;  %v13310_v48 = vld [vmem:[%s12446_s12 + $0x1e0] sm:$0xff]  ;;  %v16009_v19 = vld [vmem:[#allocation37_spill] sm:$0xff] }
 0x210   : > { %16008 = vst [vmem:[#allocation34_spill] sm:$0xff] %v13310_v48  ;;  %v13319_v43 = vpack.c.bf16 %v13310_v48, %v16009_v19  ;;  %v2443_v48 = vshrl.u32 %v16007_v28, 16 }
 0x211   : > { %v13302_v53 = vsel %vm404_vm4, %v563_v54, %v567_v58  ;;  %v571_v54 = vor.u32 %v569_v33, %v567_v58 }
 0x212   : > { %10114 = vmatmul.mubr.msk.bf16.gmra.mrb[92].mxu0 %vm636_vm3, %v2421_v4  ;;  %v2428_v4 = vsel %vm404_vm4, %v2424_v12, %v2427_v6  ;;  %v16004_v12 = vld [vmem:[#allocation20_spill] sm:$0xff]  ;;  %16006 = vst [vmem:[#allocation19_spill] sm:$0xff] %v13302_v53 }
 0x213   : > { %10117 = vmatprep.mubr.msk.bf16.mxu0 %vm12371_vm1, %v15889_v1  ;;  %9622 = vmatmul.mubr.msk.bf16.gmra.mrb[72].mxu1 %vm636_vm3, %v13283_v21  ;;  %v13299_v49 = vpack.c.bf16 %v16005_v46, %v16004_v12  ;;  %v2436_v21 = vshrl.u32 %v16003_v38, 16 }
 0x214   : > { %9625 = vmatprep.mubr.msk.bf16.mxu1 %vm12371_vm1, %v15889_v1 }
 0x215   : > { %v573_v6 = vshll.u32 %v13299_v49, 16  ;;  %v2438_v13 = vor.u32 %v2436_v21, %v2434_v7  ;;  %v16012_v21 = vmov 0.0  }
 0x217   : > { %v575_v12 = vrot.slane %v573_v6, 1  ;;  %v16013_v6 = vld [vmem:[#allocation24_spill] sm:$0xff] }
 0x219   : > { %v13328_v9 = vsel %vm404_vm4, %v571_v54, %v575_v12 }
 0x21a   : > { %10118 = vmatmul.mubr.msk.bf16.gmra.mrb[96].mxu0 %vm636_vm3, %v2428_v4  ;;  %v2435_v4 = vsel %vm404_vm4, %v2431_v36, %v2434_v7  ;;  %v2441_v36 = vrot.slane %v2439_v24, 1 }
 0x21b   : > { %10121 = vmatprep.mubr.msk.bf16.mxu0 %vm12371_vm1, %v15889_v1  ;;  %9626 = vmatmul.mubr.msk.bf16.gmra.mrb[76].mxu1 %vm636_vm3, %v13302_v53  ;;  %v16010_v53 = vld [vmem:[#allocation22_spill] sm:$0xff] }
 0x21c   : > { %9629 = vmatprep.mubr.msk.bf16.mxu1 %vm12371_vm1, %v15889_v1  ;;  %v13325_v31 = vpack.c.bf16 %v16011_v20, %v16010_v53  ;;  %v2442_v19 = vsel %vm404_vm4, %v2438_v13, %v2441_v36  ;;  %v577_v20 = vshrl.u32 %v13299_v49, 16  ;;  %v16014_v13 = vld [vmem:[#allocation25_spill] sm:$0xff] }
 0x21d   : > { %v13344_v54 = vpack.c.bf16 %v16014_v13, %v16013_v6  ;;  %v16018_v13 = vld [vmem:[#allocation4_spill] sm:$0xff] }
 0x21e   : > { %v581_v7 = vshll.u32 %v13325_v31, 16  ;;  %v579_v53 = vor.u32 %v577_v20, %v575_v12  ;;  %v16016_v20 = vld [vmem:[#allocation27_spill] sm:$0xff] }
 0x21f   : > { %v593_v6 = vshrl.u32 %v13344_v54, 16 }
 0x220   : > { %v583_v33 = vrot.slane %v581_v7, 1 }
 0x222   : > { %10122 = vmatmul.mubr.msk.bf16.gmra.mrb[100].mxu0 %vm636_vm3, %v2435_v4 }
 0x223   : > { %10125 = vmatprep.mubr.msk.bf16.mxu0 %vm12371_vm1, %v15889_v1  ;;  %v2447_v1 = vshll.u32 %v13319_v43, 16  ;;  %9630 = vmatmul.mubr.msk.bf16.gmra.mrb[80].mxu1 %vm636_vm3, %v13328_v9 }
 0x224   : > { %9633 = vmatprep.mubr.msk.bf16.mxu1 %vm12371_vm1, %v16012_v21 }
 0x225   : > { %v2188_v46 = vpop.f32.mrb[112].mxu0  ;;  %v2449_v58 = vrot.slane %v2447_v1, 1  ;;  %v2451_v1 = vshrl.u32 %v13319_v43, 16 }
 0x226   : > { %v10017_v4 = vpop.f32.mrb[113].mxu0  ;;  %v13347_v46 = vsel %vm404_vm4, %v579_v53, %v583_v33 }
 0x227   : > { %v2190_v11 = vpop.f32.mrb[114].mxu0 }
 0x228   : > { %v10018_v24 = vpop.f32.mrb[115].mxu0  ;;  %v2445_v11 = vor.u32 %v2443_v48, %v2441_v36  ;;  %v585_v48 = vshrl.u32 %v13325_v31, 16  ;;  %v589_v36 = vshll.u32 %v13344_v54, 16 }
 0x229   : > { %v16015_v24 = vld [vmem:[#allocation26_spill] sm:$0xff] }
 0x22a   : > { %10126 = vmatmul.mubr.msk.bf16.gmra.mrb[104].mxu0 %vm636_vm3, %v2442_v19  ;;  %v2450_v4 = vsel %vm404_vm4, %v2445_v11, %v2449_v58  ;;  %v587_v12 = vor.u32 %v585_v48, %v583_v33  ;;  %v591_v19 = vrot.slane %v589_v36, 1  ;;  %v13362_v7 = vpack.c.bf16 %v16016_v20, %v16015_v24  ;;  %v8731_v36 = vld [vmem:[%s15821_s1 + $0xc] sm:$0x3]  ;;  %v16020_v24 = vld [vmem:[#allocation29_spill] sm:$0xff] }
 0x22b   : > { %10129 = vmatprep.mubr.msk.bf16.mxu0 %vm12371_vm1, %v16012_v21  ;;  %9634 = vmatmul.mubr.msk.bf16.gmra.mrb[84].mxu1 %vm636_vm3, %v13347_v46  ;;  %v2453_v11 = vor.u32 %v2451_v1, %v2449_v58  ;;  %v2892_v58 = vrot.slane %v16018_v13, 1 }
 0x22c   : > { %9637 = vmatprep.mubr.msk.bf16.mxu1 %vm12371_vm1, %v16012_v21  ;;  %v13365_v53 = vsel %vm404_vm4, %v587_v12, %v591_v19  ;;  %v597_v33 = vshll.u32 %v13362_v7, 16  ;;  %v595_v1 = vor.u32 %v593_v6, %v591_v19  ;;  %v16019_v12 = vld [vmem:[#allocation28_spill] sm:$0xff]  ;;  %v601_v19 = vshrl.u32 %v13362_v7, 16 }
 0x22d   : > { %16017 = vst [vmem:[#allocation20_spill] sm:$0xff] %v13365_v53  ;;  %v13383_v20 = vpack.c.bf16 %v16020_v24, %v16019_v12  ;;  %v16024_v12 = vld [vmem:[#allocation31_spill] sm:$0xff] }
 0x22e   : > { %v599_v48 = vrot.slane %v597_v33, 1  ;;  %v16022_v33 = vld [vmem:[#allocation13_spill] sm:$0xff] }
 0x22f   : > { %v605_v6 = vshll.u32 %v13383_v20, 16  ;;  %v2895_v13 = vrot.slane %v16022_v33, 1 }
 0x232   : > { %10130 = vmatmul.mubr.msk.bf16.gmra.mrb[108].mxu0 %vm636_vm3, %v2450_v4  ;;  %v2893_v4 = vrot.slane %v12617_v5, 1  ;;  %v3373_v5 = vsel %vm724_vm0, %v8731_v36, 0  ;;  %v16023_v36 = vld [vmem:[#allocation30_spill] sm:$0xff] }
 0x233   : > { %10133 = vmatprep.mubr.msk.bf16.mxu0 %vm12371_vm1, %v16012_v21  ;;  %9638 = vmatmul.mubr.msk.bf16.gmra.mrb[88].mxu1 %vm636_vm3, %v13365_v53  ;;  %v13403_v24 = vpack.c.bf16 %v16024_v12, %v16023_v36  ;;  %v16027_v36 = vld [vmem:[#allocation17_spill] sm:$0xff] }
 0x234   : > { %9641 = vmatprep.mubr.msk.bf16.mxu1 %vm12371_vm1, %v16012_v21  ;;  %v2894_v53 = vsel %vm1345_vm2, %v2892_v58, %v2893_v4  ;;  %v603_v58 = vor.u32 %v601_v19, %v599_v48  ;;  %v2897_v19 = vrot.slane %v12633_v8, 1  ;;  %v621_v12 = vshll.u32 %v16027_v36, 16  ;;  %v16028_v8 = vld [vmem:[#allocation14_spill] sm:$0xff] }
 0x23a   : > { %10134 = vmatmul.mubr.msk.bf16.gmra.mrb[116].mxu0 %vm636_vm3, %v2453_v11  ;;  %v13386_v11 = vsel %vm404_vm4, %v595_v1, %v599_v48  ;;  %v607_v1 = vrot.slane %v605_v6, 1  ;;  %v609_v48 = vshrl.u32 %v13383_v20, 16 }
 0x23b   : > { %10139 = vmatprep.mubr.msk.bf16.mxu0 %vm12371_vm1, %v16012_v21  ;;  %16021 = vst [vmem:[#allocation21_spill] sm:$0xff] %v13386_v11  ;;  %9642 = vmatmul.mubr.msk.bf16.gmra.mrb[92].mxu1 %vm636_vm3, %v13386_v11  ;;  %v2896_v11 = vsel %vm1345_vm2, %v2893_v4, %v2895_v13 }
 0x23c   : > { %9645 = vmatprep.mubr.msk.bf16.mxu1 %vm12371_vm1, %v16012_v21  ;;  %v611_v6 = vor.u32 %v609_v48, %v607_v1 }
 0x242   : > { %10140 = vmatmul.mubr.msk.bf16.vlgmr.msra.gmra.mrb[0].mxu0 %vm636_vm3, %v2894_v53  ;;  %v13406_v53 = vsel %vm404_vm4, %v603_v58, %v607_v1  ;;  %v2898_v58 = vsel %vm1345_vm2, %v2895_v13, %v2897_v19  ;;  %v2899_v1 = vrot.slane %v16028_v8, 1  ;;  %v16029_v13 = vld [vmem:[#allocation33_spill] sm:$0xff] }
 0x243   : > { %10256 = vmatpush3.bf16.msra.mxu0 %v3373_v5  ;;  %10143 = vmatprep.mubr.msk.bf16.mxu0 %vm12371_vm1, %v16012_v21  ;;  %16025 = vst [vmem:[#allocation36_spill] sm:$0xff] %v13406_v53  ;;  %v613_v5 = vshll.u32 %v13403_v24, 16 }
 0x244   : > { %10373 = vmatprep.subr.bf16.mxu0 %v16012_v21  ;;  %9646 = vmatmul.mubr.msk.bf16.gmra.mrb[96].mxu1 %vm636_vm3, %v13406_v53 }
 0x245   : > { %9649 = vmatprep.mubr.msk.bf16.mxu1 %vm12371_vm1, %v16012_v21  ;;  %v615_v33 = vrot.slane %v613_v5, 1  ;;  %v623_v5 = vrot.slane %v621_v12, 1  ;;  %v16031_v12 = vld [vmem:[#allocation15_spill] sm:$0xff] }
 0x246   : > { %v2901_v8 = vrot.slane %v16031_v12, 1 }
 0x247   : > { %v13420_v4 = vsel %vm404_vm4, %v611_v6, %v615_v33  ;;  %v16030_v6 = vld [vmem:[#allocation35_spill] sm:$0xff] }
 0x248   : > { %16026 = vst [vmem:[#allocation37_spill] sm:$0xff] %v13420_v4  ;;  %v13435_v53 = vpack.c.bf16 %v16030_v6, %v16029_v13  ;;  %v2902_v6 = vsel %vm1345_vm2, %v2899_v1, %v2901_v8 }
 0x24a   : > { %10144 = vmatmul.mubr.msk.bf16.gmra.mrb[4].mxu0 %vm636_vm3, %v2896_v11  ;;  %v617_v11 = vshrl.u32 %v13403_v24, 16 }
 0x24b   : > { %10147 = vmatprep.mubr.msk.bf16.mxu0 %vm12371_vm1, %v16012_v21 }
 0x24c   : > { %9650 = vmatmul.mubr.msk.bf16.gmra.mrb[100].mxu1 %vm636_vm3, %v13420_v4  ;;  %v619_v48 = vor.u32 %v617_v11, %v615_v33  ;;  %v625_v33 = vshrl.u32 %v16027_v36, 16  ;;  %v629_v11 = vshll.u32 %v13435_v53, 16 }
 0x24d   : > { %9653 = vmatprep.mubr.msk.bf16.mxu1 %vm12371_vm1, %v16012_v21 }
 0x24e   : > { %v13438_v4 = vsel %vm404_vm4, %v619_v48, %v623_v5  ;;  %v627_v48 = vor.u32 %v625_v33, %v623_v5  ;;  %v631_v13 = vrot.slane %v629_v11, 1  ;;  %v16032_v5 = vld [vmem:[#allocation16_spill] sm:$0xff] }
 0x24f   : > { %v2903_v33 = vrot.slane %v16032_v5, 1 }
 0x251   : > { %v2904_v12 = vsel %vm1345_vm2, %v2901_v8, %v2903_v33 }
 0x252   : > { %10148 = vmatmul.mubr.msk.bf16.gmra.mrb[8].mxu0 %vm636_vm3, %v2898_v58  ;;  %v2900_v58 = vsel %vm1345_vm2, %v2897_v19, %v2899_v1  ;;  %v13452_v19 = vsel %vm404_vm4, %v627_v48, %v631_v13  ;;  %v400_v1 = vld [vmem:[%s15821_s1] sm:$0x3]  ;;  %v2905_v48 = vrot.slane %v12658_v14, 1  ;;  %v2907_v14 = vrot.slane %v12664_v16, 1 }
 0x253   : > { %10151 = vmatprep.mubr.msk.bf16.mxu0 %vm12371_vm1, %v16012_v21 }
 0x254   : > { %9654 = vmatmul.mubr.msk.bf16.gmra.mrb[104].mxu1 %vm636_vm3, %v13438_v4  ;;  %v2906_v8 = vsel %vm1345_vm2, %v2903_v33, %v2905_v48  ;;  %v2908_v5 = vsel %vm1345_vm2, %v2905_v48, %v2907_v14  ;;  %v2909_v33 = vrot.slane %v12670_v17, 1 }
 0x255   : > { %9657 = vmatprep.mubr.msk.bf16.mxu1 %vm12371_vm1, %v16012_v21 }
 0x25a   : > { %10152 = vmatmul.mubr.msk.bf16.gmra.mrb[12].mxu0 %vm636_vm3, %v2900_v58  ;;  %v633_v58 = vshrl.u32 %v13435_v53, 16 }
 0x25b   : > { %10155 = vmatprep.mubr.msk.bf16.mxu0 %vm12371_vm1, %v16012_v21 }
 0x25c   : > { %9658 = vmatmul.mubr.msk.bf16.gmra.mrb[108].mxu1 %vm636_vm3, %v13452_v19  ;;  %v13464_v11 = vor.u32 %v633_v58, %v631_v13  ;;  %v1050_v13 = vsel %vm724_vm0, %v400_v1, 0  ;;  %v16034_v58 = vld [vmem:[#allocation2_spill] sm:$0xff] }
 0x25d   : > { %9661 = vmatprep.mubr.msk.bf16.mxu1 %vm12371_vm1, %v16012_v21  ;;  %9666 = vmatpush3.bf16.msra.mxu1 %v1050_v13 }
 0x25e   : > { %11059 = vmatprep.subr.bf16.mxu1 %v16012_v21 }
 0x262   : > { %10156 = vmatmul.mubr.msk.bf16.gmra.mrb[16].mxu0 %vm636_vm3, %v2902_v6  ;;  %v16033_v6 = vld [vmem:[#allocation3_spill] sm:$0xff] }
 0x263   : > { %10159 = vmatprep.mubr.msk.bf16.mxu0 %vm12371_vm1, %v16012_v21 }
 0x264   : > { %9662 = vmatmul.mubr.msk.bf16.gmra.mrb[112].mxu1 %vm636_vm3, %v13464_v11 }
 0x265   : > { %9667 = vmatprep.mubr.msk.bf16.mxu1 %vm12371_vm1, %v16012_v21 }
 0x26a   : > { %10160 = vmatmul.mubr.msk.bf16.gmra.mrb[20].mxu0 %vm636_vm3, %v2904_v12  ;;  %v2910_v12 = vsel %vm1345_vm2, %v2907_v14, %v2909_v33 }
 0x26b   : > { %10163 = vmatprep.mubr.msk.bf16.mxu0 %vm12371_vm1, %v16012_v21 }
 0x26c   : > { %9668 = vmatmul.mubr.msk.bf16.vlgmr.msra.gmra.mrb[0].mxu1 %vm636_vm3, %v16033_v6 }
 0x26d   : > { %9671 = vmatprep.mubr.msk.bf16.mxu1 %vm12371_vm1, %v16012_v21  ;;  %11060 = vmatpush3.bf16.msra.mxu1 %v16034_v58 }
 0x272   : > { %10164 = vmatmul.mubr.msk.bf16.gmra.mrb[24].mxu0 %vm636_vm3, %v2906_v8 }
 0x273   : > { %10167 = vmatprep.mubr.msk.bf16.mxu0 %vm12371_vm1, %v16012_v21 }
 0x274   : > { %9672 = vmatmul.mubr.msk.bf16.gmra.mrb[4].mxu1 %vm636_vm3, %v12458_v10  ;;  %v2911_v10 = vrot.slane %v12690_v23, 1  ;;  %v2915_v23 = vrot.slane %v12718_v30, 1  ;;  %v2919_v30 = vrot.slane %v12746_v40, 1  ;;  %v2923_v40 = vrot.slane %v12774_v50, 1 }
 0x275   : > { %9675 = vmatprep.mubr.msk.bf16.mxu1 %vm12371_vm1, %v16012_v21  ;;  %v2927_v50 = vrot.slane %v12802_v60, 1  ;;  %v2931_v60 = vrot.slane %v12830_v56, 1  ;;  %v2935_v56 = vrot.slane %v12858_v2, 1  ;;  %v2939_v2 = vrot.slane %v12886_v61, 1 }
 0x276   : > { %v2912_v16 = vsel %vm1345_vm2, %v2909_v33, %v2911_v10  ;;  %v2943_v61 = vrot.slane %v16003_v38, 1 }
 0x27a   : > { %10168 = vmatmul.mubr.msk.bf16.gmra.mrb[28].mxu0 %vm636_vm3, %v2908_v5 }
 0x27b   : > { %10171 = vmatprep.mubr.msk.bf16.mxu0 %vm12371_vm1, %v16012_v21 }
 0x27c   : > { %9676 = vmatmul.mubr.msk.bf16.gmra.mrb[8].mxu1 %vm636_vm3, %v12468_v15  ;;  %v2913_v15 = vrot.slane %v12704_v26, 1  ;;  %v2917_v26 = vrot.slane %v12732_v35, 1  ;;  %v2921_v35 = vrot.slane %v12760_v45, 1  ;;  %v2925_v45 = vrot.slane %v12788_v55, 1 }
 0x27d   : > { %9679 = vmatprep.mubr.msk.bf16.mxu1 %vm12371_vm1, %v16012_v21  ;;  %v2929_v55 = vrot.slane %v12816_v63, 1  ;;  %v2933_v63 = vrot.slane %v12844_v41, 1  ;;  %v2937_v41 = vrot.slane %v12872_v51, 1  ;;  %v2941_v51 = vrot.slane %v15998_v3, 1 }
 0x27e   : > { %v2914_v17 = vsel %vm1345_vm2, %v2911_v10, %v2913_v15  ;;  %v2916_v1 = vsel %vm1345_vm2, %v2913_v15, %v2915_v23  ;;  %v2918_v48 = vsel %vm1345_vm2, %v2915_v23, %v2917_v26  ;;  %v2920_v13 = vsel %vm1345_vm2, %v2917_v26, %v2919_v30 }
 0x27f   : > { %v2922_v8 = vsel %vm1345_vm2, %v2919_v30, %v2921_v35  ;;  %v2924_v6 = vsel %vm1345_vm2, %v2921_v35, %v2923_v40  ;;  %v2926_v58 = vsel %vm1345_vm2, %v2923_v40, %v2925_v45  ;;  %v2928_v14 = vsel %vm1345_vm2, %v2925_v45, %v2927_v50  ;;  %v16035_v30 = vld [vmem:[#allocation32_spill] sm:$0xff] }
 0x280   : > { %v2930_v5 = vsel %vm1345_vm2, %v2927_v50, %v2929_v55  ;;  %v2932_v33 = vsel %vm1345_vm2, %v2929_v55, %v2931_v60  ;;  %v2936_v10 = vsel %vm1345_vm2, %v2933_v63, %v2935_v56  ;;  %v2940_v15 = vsel %vm1345_vm2, %v2937_v41, %v2939_v2 }
 0x281   : > { %v2944_v23 = vsel %vm1345_vm2, %v2941_v51, %v2943_v61  ;;  %v2945_v3 = vrot.slane %v16007_v28, 1  ;;  %v2947_v35 = vrot.slane %v13319_v43, 1  ;;  %v8761_v43 = vld [vmem:[%s15821_s1 + $0xe] sm:$0x3]  ;;  %v1375_v55 = vrot.slane %v13185_v25, 1 }
 0x282   : > { %10172 = vmatmul.mubr.msk.bf16.gmra.mrb[32].mxu0 %vm636_vm3, %v2910_v12  ;;  %v2934_v12 = vsel %vm1345_vm2, %v2931_v60, %v2933_v63  ;;  %v1379_v60 = vrot.slane %v13223_v34, 1  ;;  %v1383_v63 = vrot.slane %v13261_v44, 1 }
 0x283   : > { %10175 = vmatprep.mubr.msk.bf16.mxu0 %vm12371_vm1, %v16012_v21  ;;  %v2946_v38 = vsel %vm1345_vm2, %v2943_v61, %v2945_v3  ;;  %v2948_v28 = vsel %vm1345_vm2, %v2945_v3, %v2947_v35  ;;  %v13935_v3 = vrot.slane %v13435_v53, 1 }
 0x284   : > { %9680 = vmatmul.mubr.msk.bf16.gmra.mrb[12].mxu1 %vm636_vm3, %v12486_v22 }
 0x285   : > { %9683 = vmatprep.mubr.msk.bf16.mxu1 %vm12371_vm1, %v16012_v21 }
 0x28a   : > { %10176 = vmatmul.mubr.msk.bf16.gmra.mrb[36].mxu0 %vm636_vm3, %v2912_v16  ;;  %v2938_v16 = vsel %vm1345_vm2, %v2935_v56, %v2937_v41  ;;  %v1387_v56 = vrot.slane %v13299_v49, 1  ;;  %v1391_v41 = vrot.slane %v13344_v54, 1 }
 0x28b   : > { %10179 = vmatprep.mubr.msk.bf16.mxu0 %vm12371_vm1, %v16012_v21 }
 0x28c   : > { %9684 = vmatmul.mubr.msk.bf16.gmra.mrb[16].mxu1 %vm636_vm3, %v12501_v27 }
 0x28d   : > { %9687 = vmatprep.mubr.msk.bf16.mxu1 %vm12371_vm1, %v16012_v21 }
 0x292   : > { %10180 = vmatmul.mubr.msk.bf16.gmra.mrb[40].mxu0 %vm636_vm3, %v2914_v17  ;;  %v2942_v17 = vsel %vm1345_vm2, %v2939_v2, %v2941_v51  ;;  %v1395_v2 = vrot.slane %v13383_v20, 1  ;;  %v1397_v51 = vrot.slane %v13403_v24, 1 }
 0x293   : > { %10183 = vmatprep.mubr.msk.bf16.mxu0 %vm12371_vm1, %v16012_v21 }
 0x294   : > { %9688 = vmatmul.mubr.msk.bf16.gmra.mrb[20].mxu1 %vm636_vm3, %v12518_v32 }
 0x295   : > { %9691 = vmatprep.mubr.msk.bf16.mxu1 %vm12371_vm1, %v16012_v21 }
 0x29a   : > { %10184 = vmatmul.mubr.msk.bf16.gmra.mrb[44].mxu0 %vm636_vm3, %v2916_v1 }
 0x29b   : > { %10187 = vmatprep.mubr.msk.bf16.mxu0 %vm12371_vm1, %v16012_v21 }
 0x29c   : > { %9692 = vmatmul.mubr.msk.bf16.gmra.mrb[24].mxu1 %vm636_vm3, %v12530_v37 }
 0x29d   : > { %9695 = vmatprep.mubr.msk.bf16.mxu1 %vm12371_vm1, %v16012_v21 }
 0x2a2   : > { %10188 = vmatmul.mubr.msk.bf16.gmra.mrb[48].mxu0 %vm636_vm3, %v2918_v48 }
 0x2a3   : > { %10191 = vmatprep.mubr.msk.bf16.mxu0 %vm12371_vm1, %v16012_v21 }
 0x2a4   : > { %9696 = vmatmul.mubr.msk.bf16.gmra.mrb[28].mxu1 %vm636_vm3, %v12542_v42 }
 0x2a5   : > { %9699 = vmatprep.mubr.msk.bf16.mxu1 %vm12371_vm1, %v16012_v21 }
 0x2aa   : > { %10192 = vmatmul.mubr.msk.bf16.gmra.mrb[52].mxu0 %vm636_vm3, %v2920_v13 }
 0x2ab   : > { %10195 = vmatprep.mubr.msk.bf16.mxu0 %vm12371_vm1, %v16012_v21 }
 0x2ac   : > { %9700 = vmatmul.mubr.msk.bf16.gmra.mrb[32].mxu1 %vm636_vm3, %v12554_v47 }
 0x2ad   : > { %9703 = vmatprep.mubr.msk.bf16.mxu1 %vm12371_vm1, %v16012_v21 }
 0x2b2   : > { %10196 = vmatmul.mubr.msk.bf16.gmra.mrb[56].mxu0 %vm636_vm3, %v2922_v8  ;;  %v3730_v8 = vsel %vm724_vm0, %v8761_v43, 0 }
 0x2b3   : > { %10199 = vmatprep.mubr.msk.bf16.mxu0 %vm12371_vm1, %v16012_v21 }
 0x2b4   : > { %9704 = vmatmul.mubr.msk.bf16.gmra.mrb[36].mxu1 %vm636_vm3, %v12566_v52 }
 0x2b5   : > { %9707 = vmatprep.mubr.msk.bf16.mxu1 %vm12371_vm1, %v16012_v21 }
 0x2ba   : > { %10200 = vmatmul.mubr.msk.bf16.gmra.mrb[60].mxu0 %vm636_vm3, %v2924_v6 }
 0x2bb   : > { %10203 = vmatprep.mubr.msk.bf16.mxu0 %vm12371_vm1, %v16012_v21 }
 0x2bc   : > { %9708 = vmatmul.mubr.msk.bf16.gmra.mrb[40].mxu1 %vm636_vm3, %v12578_v57 }
 0x2bd   : > { %9711 = vmatprep.mubr.msk.bf16.mxu1 %vm12371_vm1, %v16012_v21 }
 0x2c2   : > { %10204 = vmatmul.mubr.msk.bf16.gmra.mrb[64].mxu0 %vm636_vm3, %v2926_v58 }
 0x2c3   : > { %10207 = vmatprep.mubr.msk.bf16.mxu0 %vm12371_vm1, %v16012_v21 }
 0x2c4   : > { %9712 = vmatmul.mubr.msk.bf16.gmra.mrb[44].mxu1 %vm636_vm3, %v12590_v62 }
 0x2c5   : > { %9715 = vmatprep.mubr.msk.bf16.mxu1 %vm12371_vm1, %v16012_v21 }
 0x2ca   : > { %10208 = vmatmul.mubr.msk.bf16.gmra.mrb[68].mxu0 %vm636_vm3, %v2928_v14  ;;  %v1373_v14 = vrot.slane %v13166_v18, 1 }
 0x2cb   : > { %10211 = vmatprep.mubr.msk.bf16.mxu0 %vm12371_vm1, %v16012_v21 }
 0x2cc   : > { %9716 = vmatmul.mubr.msk.bf16.gmra.mrb[48].mxu1 %vm636_vm3, %v13128_v59 }
 0x2cd   : > { %9719 = vmatprep.mubr.msk.bf16.mxu1 %vm12371_vm1, %v16012_v21 }
 0x2d2   : > { %10212 = vmatmul.mubr.msk.bf16.gmra.mrb[72].mxu0 %vm636_vm3, %v2930_v5 }
 0x2d3   : > { %10215 = vmatprep.mubr.msk.bf16.mxu0 %vm12371_vm1, %v16012_v21 }
 0x2d4   : > { %9720 = vmatmul.mubr.msk.bf16.gmra.mrb[52].mxu1 %vm636_vm3, %v13147_v0 }
 0x2d5   : > { %9723 = vmatprep.mubr.msk.bf16.mxu1 %vm12371_vm1, %v16012_v21 }
 0x2da   : > { %10216 = vmatmul.mubr.msk.bf16.gmra.mrb[76].mxu0 %vm636_vm3, %v2932_v33  ;;  %v1381_v33 = vrot.slane %v13242_v39, 1 }
 0x2db   : > { %10219 = vmatprep.mubr.msk.bf16.mxu0 %vm12371_vm1, %v16012_v21 }
 0x2dc   : > { %9724 = vmatmul.mubr.msk.bf16.gmra.mrb[56].mxu1 %vm636_vm3, %v13166_v18 }
 0x2dd   : > { %9727 = vmatprep.mubr.msk.bf16.mxu1 %vm12371_vm1, %v16012_v21 }
 0x2e2   : > { %10220 = vmatmul.mubr.msk.bf16.gmra.mrb[80].mxu0 %vm636_vm3, %v2934_v12 }
 0x2e3   : > { %10223 = vmatprep.mubr.msk.bf16.mxu0 %vm12371_vm1, %v16012_v21 }
 0x2e4   : > { %9728 = vmatmul.mubr.msk.bf16.gmra.mrb[60].mxu1 %vm636_vm3, %v13185_v25 }
 0x2e5   : > { %9731 = vmatprep.mubr.msk.bf16.mxu1 %vm12371_vm1, %v16012_v21 }
 0x2ea   : > { %10224 = vmatmul.mubr.msk.bf16.gmra.mrb[84].mxu0 %vm636_vm3, %v2936_v10  ;;  %v1389_v10 = vrot.slane %v13325_v31, 1 }
 0x2eb   : > { %10227 = vmatprep.mubr.msk.bf16.mxu0 %vm12371_vm1, %v16012_v21 }
 0x2ec   : > { %9732 = vmatmul.mubr.msk.bf16.gmra.mrb[64].mxu1 %vm636_vm3, %v13204_v29 }
 0x2ed   : > { %9735 = vmatprep.mubr.msk.bf16.mxu1 %vm12371_vm1, %v16012_v21 }
 0x2f2   : > { %10228 = vmatmul.mubr.msk.bf16.gmra.mrb[88].mxu0 %vm636_vm3, %v2938_v16  ;;  %v1393_v16 = vrot.slane %v13362_v7, 1 }
 0x2f3   : > { %10231 = vmatprep.mubr.msk.bf16.mxu0 %vm12371_vm1, %v16012_v21 }
 0x2f4   : > { %9736 = vmatmul.mubr.msk.bf16.gmra.mrb[68].mxu1 %vm636_vm3, %v13223_v34 }
 0x2f5   : > { %9739 = vmatprep.mubr.msk.bf16.mxu1 %vm12371_vm1, %v16012_v21 }
 0x2fa   : > { %10232 = vmatmul.mubr.msk.bf16.gmra.mrb[92].mxu0 %vm636_vm3, %v2940_v15  ;;  %v13898_v15 = vsel %vm1345_vm2, %v1393_v16, %v1395_v2 }
 0x2fb   : > { %10235 = vmatprep.mubr.msk.bf16.mxu0 %vm12371_vm1, %v16012_v21 }
 0x2fc   : > { %9740 = vmatmul.mubr.msk.bf16.gmra.mrb[72].mxu1 %vm636_vm3, %v13242_v39 }
 0x2fd   : > { %9743 = vmatprep.mubr.msk.bf16.mxu1 %vm12371_vm1, %v16012_v21 }
 0x302   : > { %10236 = vmatmul.mubr.msk.bf16.gmra.mrb[96].mxu0 %vm636_vm3, %v2942_v17  ;;  %v1399_v17 = vrot.slane %v16027_v36, 1 }
 0x303   : > { %10239 = vmatprep.mubr.msk.bf16.mxu0 %vm12371_vm1, %v16012_v21 }
 0x304   : > { %9744 = vmatmul.mubr.msk.bf16.gmra.mrb[76].mxu1 %vm636_vm3, %v13261_v44  ;;  %v13924_v61 = vsel %vm1345_vm2, %v1397_v51, %v1399_v17 }
 0x305   : > { %9747 = vmatprep.mubr.msk.bf16.mxu1 %vm12371_vm1, %v16012_v21 }
 0x30a   : > { %10240 = vmatmul.mubr.msk.bf16.gmra.mrb[100].mxu0 %vm636_vm3, %v2944_v23 }
 0x30b   : > { %10243 = vmatprep.mubr.msk.bf16.mxu0 %vm12371_vm1, %v16012_v21 }
 0x30c   : > { %9748 = vmatmul.mubr.msk.bf16.gmra.mrb[80].mxu1 %vm636_vm3, %v16035_v30 }
 0x30d   : > { %v2801_v1 = vpop.f32.mrb[116].mxu0  ;;  %9751 = vmatprep.mubr.msk.bf16.mxu1 %vm12371_vm1, %v16012_v21 }
 0x30e   : > { %v10135_v26 = vpop.f32.mrb[117].mxu0 }
 0x30f   : > { %v2803_v48 = vpop.f32.mrb[118].mxu0  ;;  %v13941_v26 = vsel %vm1345_vm2, %v1399_v17, %v13935_v3 }
 0x310   : > { %v10136_v13 = vpop.f32.mrb[119].mxu0 }
 0x312   : > { %10244 = vmatmul.mubr.msk.bf16.gmra.mrb[104].mxu0 %vm636_vm3, %v2946_v38 }
 0x313   : > { %10247 = vmatprep.mubr.msk.bf16.mxu0 %vm12371_vm1, %v16012_v21 }
 0x314   : > { %9752 = vmatmul.mubr.msk.bf16.gmra.mrb[84].mxu1 %vm636_vm3, %v13299_v49 }
 0x315   : > { %9755 = vmatprep.mubr.msk.bf16.mxu1 %vm12371_vm1, %v16012_v21 }
 0x31a   : > { %10248 = vmatmul.mubr.msk.bf16.gmra.mrb[108].mxu0 %vm636_vm3, %v2948_v28 }
 0x31b   : > { %10251 = vmatprep.mubr.msk.bf16.mxu0 %vm12371_vm1, %v16012_v21 }
 0x31c   : > { %9756 = vmatmul.mubr.msk.bf16.gmra.mrb[88].mxu1 %vm636_vm3, %v13325_v31 }
 0x31d   : > { %9759 = vmatprep.mubr.msk.bf16.mxu1 %vm12371_vm1, %v16012_v21 }
 0x322   : > { %10252 = vmatmul.mubr.msk.bf16.gmra.mrb[120].mxu0 %vm636_vm3, %v2947_v35 }
 0x323   : > { %10257 = vmatprep.mubr.msk.bf16.mxu0 %vm12371_vm1, %v16012_v21 }
 0x324   : > { %9760 = vmatmul.mubr.msk.bf16.gmra.mrb[92].mxu1 %vm636_vm3, %v13344_v54 }
 0x325   : > { %9763 = vmatprep.mubr.msk.bf16.mxu1 %vm12371_vm1, %v16012_v21 }
 0x32a   : > { %10258 = vmatmul.mubr.msk.bf16.vlgmr.msra.gmra.mrb[0].mxu0 %vm636_vm3, %v12486_v22 }
 0x32b   : > { %10374 = vmatpush3.bf16.msra.mxu0 %v3730_v8  ;;  %10261 = vmatprep.mubr.msk.bf16.mxu0 %vm12371_vm1, %v16012_v21 }
 0x32c   : > { %10491 = vmatprep.subr.bf16.mxu0 %v16012_v21  ;;  %9764 = vmatmul.mubr.msk.bf16.gmra.mrb[96].mxu1 %vm636_vm3, %v13362_v7 }
 0x32d   : > { %9767 = vmatprep.mubr.msk.bf16.mxu1 %vm12371_vm1, %v16012_v21 }
 0x332   : > { %10262 = vmatmul.mubr.msk.bf16.gmra.mrb[4].mxu0 %vm636_vm3, %v12501_v27 }
 0x333   : > { %10265 = vmatprep.mubr.msk.bf16.mxu0 %vm12371_vm1, %v16012_v21 }
 0x334   : > { %9768 = vmatmul.mubr.msk.bf16.gmra.mrb[100].mxu1 %vm636_vm3, %v13383_v20 }
 0x335   : > { %9771 = vmatprep.mubr.msk.bf16.mxu1 %vm12371_vm1, %v16012_v21 }
 0x337   : > { %v985_v22 = vpop.f32.mrb[112].mxu1 }
 0x338   : > { %v9663_v40 = vpop.f32.mrb[113].mxu1 }
 0x339   : > { %v987_v6 = vpop.f32.mrb[114].mxu1 }
 0x33a   : > { %10266 = vmatmul.mubr.msk.bf16.gmra.mrb[8].mxu0 %vm636_vm3, %v12518_v32  ;;  %v9664_v27 = vpop.f32.mrb[115].mxu1  ;;  %v12307_v32 = vld [vmem:[%s12446_s12 + $0x1c0] sm:$0xff] }
 0x33b   : > { %10269 = vmatprep.mubr.msk.bf16.mxu0 %vm12371_vm1, %v16012_v21  ;;  %v399_v45 = vpack.c.bf16 %v12307_v32, %v12307_v32 }
 0x33c   : > { %9772 = vmatmul.mubr.msk.bf16.gmra.mrb[104].mxu1 %vm636_vm3, %v13403_v24 }
 0x33d   : > { %9775 = vmatprep.mubr.msk.bf16.mxu1 %vm12371_vm1, %v16012_v21 }
 0x342   : > { %10270 = vmatmul.mubr.msk.bf16.gmra.mrb[12].mxu0 %vm636_vm3, %v12530_v37  ;;  %v1369_v37 = vrot.slane %v13128_v59, 1 }
 0x343   : > { %10273 = vmatprep.mubr.msk.bf16.mxu0 %vm12371_vm1, %v16012_v21 }
 0x344   : > { %9776 = vmatmul.mubr.msk.bf16.gmra.mrb[108].mxu1 %vm636_vm3, %v16027_v36 }
 0x345   : > { %9779 = vmatprep.mubr.msk.bf16.mxu1 %vm12371_vm1, %v16012_v21 }
 0x34a   : > { %10274 = vmatmul.mubr.msk.bf16.gmra.mrb[16].mxu0 %vm636_vm3, %v12542_v42  ;;  %v16036_v42 = vrot.slane %v12590_v62, 1 }
 0x34b   : > { %10277 = vmatprep.mubr.msk.bf16.mxu0 %vm12371_vm1, %v16012_v21 }
 0x34c   : > { %9780 = vmatmul.mubr.msk.bf16.gmra.mrb[116].mxu1 %vm636_vm3, %v399_v45  ;;  %v13742_v58 = vsel %vm1345_vm2, %v16036_v42, %v1369_v37 }
 0x34d   : > { %9829 = vmatprep.mubr.msk.bf16.mxu1 %vm12371_vm1, %v16012_v21 }
 0x352   : > { %10278 = vmatmul.mubr.msk.bf16.gmra.mrb[20].mxu0 %vm636_vm3, %v12554_v47  ;;  %v1371_v47 = vrot.slane %v13147_v0, 1 }
 0x353   : > { %10281 = vmatprep.mubr.msk.bf16.mxu0 %vm12371_vm1, %v16012_v21 }
 0x354   : > { %9830 = vmatmul.mubr.msk.bf16.vlgmr.msra.gmra.mrb[44].mxu1 %vm636_vm3, %v13742_v58  ;;  %v13754_v50 = vsel %vm1345_vm2, %v1369_v37, %v1371_v47 }
 0x355   : > { %9833 = vmatprep.mubr.msk.bf16.mxu1 %vm12371_vm1, %v16012_v21 }
 0x35a   : > { %10282 = vmatmul.mubr.msk.bf16.gmra.mrb[24].mxu0 %vm636_vm3, %v12566_v52  ;;  %v13766_v52 = vsel %vm1345_vm2, %v1371_v47, %v1373_v14  ;;  %v12308_v47 = vld [vmem:[%s12446_s12 + $0x1d0] sm:$0xff] }
 0x35b   : > { %10285 = vmatprep.mubr.msk.bf16.mxu0 %vm12371_vm1, %v16012_v21 }
 0x35c   : > { %9834 = vmatmul.mubr.msk.bf16.gmra.mrb[48].mxu1 %vm636_vm3, %v13754_v50 }
 0x35d   : > { %9837 = vmatprep.mubr.msk.bf16.mxu1 %vm12371_vm1, %v16012_v21 }
 0x362   : > { %10286 = vmatmul.mubr.msk.bf16.gmra.mrb[28].mxu0 %vm636_vm3, %v12578_v57  ;;  %v13778_v57 = vsel %vm1345_vm2, %v1373_v14, %v1375_v55  ;;  %v12309_v14 = vld [vmem:[%s12446_s12 + $0x1d8] sm:$0xff] }
 0x363   : > { %10289 = vmatprep.mubr.msk.bf16.mxu0 %vm12371_vm1, %v16012_v21 }
 0x364   : > { %9838 = vmatmul.mubr.msk.bf16.gmra.mrb[52].mxu1 %vm636_vm3, %v13766_v52 }
 0x365   : > { %9841 = vmatprep.mubr.msk.bf16.mxu1 %vm12371_vm1, %v16012_v21 }
 0x36a   : > { %10290 = vmatmul.mubr.msk.bf16.gmra.mrb[32].mxu0 %vm636_vm3, %v12590_v62  ;;  %v1377_v62 = vrot.slane %v13204_v29, 1 }
 0x36b   : > { %10293 = vmatprep.mubr.msk.bf16.mxu0 %vm12371_vm1, %v16012_v21 }
 0x36c   : > { %9842 = vmatmul.mubr.msk.bf16.gmra.mrb[56].mxu1 %vm636_vm3, %v13778_v57  ;;  %v13790_v5 = vsel %vm1345_vm2, %v1375_v55, %v1377_v62  ;;  %v13985_v55 = vpack.c.bf16 %v12309_v14, %v12308_v47  ;;  %v16039_v47 = vld [vmem:[#allocation39_spill] sm:$0xff] }
 0x36d   : > { %9845 = vmatprep.mubr.msk.bf16.mxu1 %vm12371_vm1, %v16012_v21 }
 0x372   : > { %10294 = vmatmul.mubr.msk.bf16.gmra.mrb[36].mxu0 %vm636_vm3, %v13128_v59  ;;  %v13802_v59 = vsel %vm1345_vm2, %v1377_v62, %v1379_v60 }
 0x373   : > { %10297 = vmatprep.mubr.msk.bf16.mxu0 %vm12371_vm1, %v16012_v21 }
 0x374   : > { %9846 = vmatmul.mubr.msk.bf16.gmra.mrb[60].mxu1 %vm636_vm3, %v13790_v5 }
 0x375   : > { %9849 = vmatprep.mubr.msk.bf16.mxu1 %vm12371_vm1, %v16012_v21 }
 0x37a   : > { %10298 = vmatmul.mubr.msk.bf16.gmra.mrb[40].mxu0 %vm636_vm3, %v13147_v0  ;;  %v13814_v0 = vsel %vm1345_vm2, %v1379_v60, %v1381_v33 }
 0x37b   : > { %10301 = vmatprep.mubr.msk.bf16.mxu0 %vm12371_vm1, %v16012_v21 }
 0x37c   : > { %9850 = vmatmul.mubr.msk.bf16.gmra.mrb[64].mxu1 %vm636_vm3, %v13802_v59 }
 0x37d   : > { %9853 = vmatprep.mubr.msk.bf16.mxu1 %vm12371_vm1, %v16012_v21 }
 0x382   : > { %10302 = vmatmul.mubr.msk.bf16.gmra.mrb[44].mxu0 %vm636_vm3, %v13166_v18  ;;  %v13826_v18 = vsel %vm1345_vm2, %v1381_v33, %v1383_v63  ;;  %v368_v33 = vld [vmem:[%s12446_s12 + $0x1e8] sm:$0xff] }
 0x383   : > { %10305 = vmatprep.mubr.msk.bf16.mxu0 %vm12371_vm1, %v16012_v21 }
 0x384   : > { %9854 = vmatmul.mubr.msk.bf16.gmra.mrb[68].mxu1 %vm636_vm3, %v13814_v0 }
 0x385   : > { %9857 = vmatprep.mubr.msk.bf16.mxu1 %vm12371_vm1, %v16012_v21 }
 0x38a   : > { %10306 = vmatmul.mubr.msk.bf16.gmra.mrb[48].mxu0 %vm636_vm3, %v13185_v25  ;;  %v1385_v25 = vrot.slane %v16035_v30, 1 }
 0x38b   : > { %10309 = vmatprep.mubr.msk.bf16.mxu0 %vm12371_vm1, %v16012_v21 }
 0x38c   : > { %9858 = vmatmul.mubr.msk.bf16.gmra.mrb[72].mxu1 %vm636_vm3, %v13826_v18  ;;  %v13838_v12 = vsel %vm1345_vm2, %v1383_v63, %v1385_v25 }
 0x38d   : > { %9861 = vmatprep.mubr.msk.bf16.mxu1 %vm12371_vm1, %v16012_v21 }
 0x392   : > { %10310 = vmatmul.mubr.msk.bf16.gmra.mrb[52].mxu0 %vm636_vm3, %v13204_v29  ;;  %v13850_v29 = vsel %vm1345_vm2, %v1385_v25, %v1387_v56 }
 0x393   : > { %10313 = vmatprep.mubr.msk.bf16.mxu0 %vm12371_vm1, %v16012_v21 }
 0x394   : > { %9862 = vmatmul.mubr.msk.bf16.gmra.mrb[76].mxu1 %vm636_vm3, %v13838_v12 }
 0x395   : > { %9865 = vmatprep.mubr.msk.bf16.mxu1 %vm12371_vm1, %v16012_v21 }
 0x39a   : > { %10314 = vmatmul.mubr.msk.bf16.gmra.mrb[56].mxu0 %vm636_vm3, %v13223_v34  ;;  %v13862_v34 = vsel %vm1345_vm2, %v1387_v56, %v1389_v10 }
 0x39b   : > { %10317 = vmatprep.mubr.msk.bf16.mxu0 %vm12371_vm1, %v16012_v21 }
 0x39c   : > { %9866 = vmatmul.mubr.msk.bf16.gmra.mrb[80].mxu1 %vm636_vm3, %v13850_v29 }
 0x39d   : > { %9869 = vmatprep.mubr.msk.bf16.mxu1 %vm12371_vm1, %v16012_v21 }
 0x3a2   : > { %10318 = vmatmul.mubr.msk.bf16.gmra.mrb[60].mxu0 %vm636_vm3, %v13242_v39  ;;  %v13874_v39 = vsel %vm1345_vm2, %v1389_v10, %v1391_v41  ;;  %v16037_v10 = vld [vmem:[#allocation34_spill] sm:$0xff] }
 0x3a3   : > { %10321 = vmatprep.mubr.msk.bf16.mxu0 %vm12371_vm1, %v16012_v21 }
 0x3a4   : > { %9870 = vmatmul.mubr.msk.bf16.gmra.mrb[84].mxu1 %vm636_vm3, %v13862_v34 }
 0x3a5   : > { %9873 = vmatprep.mubr.msk.bf16.mxu1 %vm12371_vm1, %v16012_v21 }
 0x3aa   : > { %10322 = vmatmul.mubr.msk.bf16.gmra.mrb[64].mxu0 %vm636_vm3, %v13261_v44  ;;  %v13886_v44 = vsel %vm1345_vm2, %v1391_v41, %v1393_v16  ;;  %v13997_v41 = vpack.c.bf16 %v368_v33, %v16037_v10 }
 0x3ab   : > { %10325 = vmatprep.mubr.msk.bf16.mxu0 %vm12371_vm1, %v16012_v21 }
 0x3ac   : > { %9874 = vmatmul.mubr.msk.bf16.gmra.mrb[88].mxu1 %vm636_vm3, %v13874_v39 }
 0x3ad   : > { %9877 = vmatprep.mubr.msk.bf16.mxu1 %vm12371_vm1, %v16012_v21 }
 0x3b2   : > { %10326 = vmatmul.mubr.msk.bf16.gmra.mrb[68].mxu0 %vm636_vm3, %v16035_v30 }
 0x3b3   : > { %10329 = vmatprep.mubr.msk.bf16.mxu0 %vm12371_vm1, %v16012_v21 }
 0x3b4   : > { %9878 = vmatmul.mubr.msk.bf16.gmra.mrb[92].mxu1 %vm636_vm3, %v13886_v44 }
 0x3b5   : > { %9881 = vmatprep.mubr.msk.bf16.mxu1 %vm12371_vm1, %v16012_v21 }
 0x3ba   : > { %10330 = vmatmul.mubr.msk.bf16.gmra.mrb[72].mxu0 %vm636_vm3, %v13299_v49  ;;  %v13910_v49 = vsel %vm1345_vm2, %v1395_v2, %v1397_v51  ;;  %v14006_v2 = vld [vmem:[%s12446_s12 + $0x1f0] sm:$0xff] }
 0x3bb   : > { %10333 = vmatprep.mubr.msk.bf16.mxu0 %vm12371_vm1, %v16012_v21 }
 0x3bc   : > { %9882 = vmatmul.mubr.msk.bf16.gmra.mrb[96].mxu1 %vm636_vm3, %v13898_v15 }
 0x3bd   : > { %9885 = vmatprep.mubr.msk.bf16.mxu1 %vm12371_vm1, %v16012_v21 }
 0x3c2   : > { %10334 = vmatmul.mubr.msk.bf16.gmra.mrb[76].mxu0 %vm636_vm3, %v13325_v31  ;;  %v13921_v31 = vpop.f32.mrb[0].mxu1 }
 0x3c3   : > { %10337 = vmatprep.mubr.msk.bf16.mxu0 %vm12371_vm1, %v16012_v21  ;;  %v9669_v23 = vpop.f32.mrb[1].mxu1 }
 0x3c4   : > { %9886 = vmatmul.mubr.msk.bf16.gmra.mrb[100].mxu1 %vm636_vm3, %v13910_v49 }
 0x3c5   : > { %9889 = vmatprep.mubr.msk.bf16.mxu1 %vm12371_vm1, %v16012_v21 }
 0x3ca   : > { %10338 = vmatmul.mubr.msk.bf16.gmra.mrb[80].mxu0 %vm636_vm3, %v13344_v54  ;;  %v13932_v54 = vpop.f32.mrb[2].mxu1 }
 0x3cb   : > { %10341 = vmatprep.mubr.msk.bf16.mxu0 %vm12371_vm1, %v16012_v21  ;;  %v9670_v1 = vpop.f32.mrb[3].mxu1 }
 0x3cc   : > { %9890 = vmatmul.mubr.msk.bf16.gmra.mrb[104].mxu1 %vm636_vm3, %v13924_v61  ;;  %v13943_v48 = vpop.f32.mrb[4].mxu1  ;;  %v3358_v1 = vpack.c.bf16 %v14006_v2, %v14006_v2 }
 0x3cd   : > { %9893 = vmatprep.mubr.msk.bf16.mxu1 %vm12371_vm1, %v16012_v21  ;;  %v9673_v38 = vpop.f32.mrb[5].mxu1 }
 0x3d2   : > { %10342 = vmatmul.mubr.msk.bf16.gmra.mrb[84].mxu0 %vm636_vm3, %v13362_v7  ;;  %v13951_v7 = vpop.f32.mrb[6].mxu1 }
 0x3d3   : > { %10345 = vmatprep.mubr.msk.bf16.mxu0 %vm12371_vm1, %v16012_v21  ;;  %v9674_v30 = vpop.f32.mrb[7].mxu1 }
 0x3d4   : > { %9894 = vmatmul.mubr.msk.bf16.gmra.mrb[108].mxu1 %vm636_vm3, %v13941_v26  ;;  %v13955_v13 = vpop.f32.mrb[8].mxu1 }
 0x3d5   : > { %9897 = vmatprep.mubr.msk.bf16.mxu1 %vm12371_vm1, %v16012_v21  ;;  %v9677_v35 = vpop.f32.mrb[9].mxu1 }
 0x3d6   : > { %v13961_v28 = vpop.f32.mrb[10].mxu1 }
 0x3da   : > { %10346 = vmatmul.mubr.msk.bf16.gmra.mrb[88].mxu0 %vm636_vm3, %v13383_v20  ;;  %v9678_v20 = vpop.f32.mrb[11].mxu1 }
 0x3db   : > { %10349 = vmatprep.mubr.msk.bf16.mxu0 %vm12371_vm1, %v16012_v21  ;;  %v13965_v43 = vpop.f32.mrb[12].mxu1  ;;  %v8791_v20 = vld [vmem:[%s15821_s1 + $0x10] sm:$0x3] }
 0x3dc   : > { %9898 = vmatmul.mubr.msk.bf16.gmra.mrb[120].mxu1 %vm636_vm3, %v13935_v3  ;;  %v9681_v8 = vpop.f32.mrb[13].mxu1 }
 0x3dd   : > { %v13969_v22 = vpop.f32.mrb[14].mxu1 }
 0x3e2   : > { %10350 = vmatmul.mubr.msk.bf16.gmra.mrb[92].mxu0 %vm636_vm3, %v13403_v24  ;;  %v9682_v24 = vpop.f32.mrb[15].mxu1 }
 0x3e3   : > { %10353 = vmatprep.mubr.msk.bf16.mxu0 %vm12371_vm1, %v16012_v21  ;;  %v13973_v40 = vpop.f32.mrb[16].mxu1  ;;  %v4073_v24 = vsel %vm724_vm0, %v8791_v20, 0  ;;  %v16041_v20 = vld [vmem:[#allocation41_spill] sm:$0xff] }
 0x3e4   : > { %v9685_v6 = vpop.f32.mrb[17].mxu1 }
 0x3e5   : > { %v13977_v27 = vpop.f32.mrb[18].mxu1  ;;  %v16038_v6 = vld [vmem:[#allocation38_spill] sm:$0xff] }
 0x3e6   : > { %v9686_v32 = vpop.f32.mrb[19].mxu1 }
 0x3ea   : > { %10354 = vmatmul.mubr.msk.bf16.gmra.mrb[96].mxu0 %vm636_vm3, %v16027_v36  ;;  %v13981_v36 = vpop.f32.mrb[20].mxu1 }
 0x3eb   : > { %10357 = vmatprep.mubr.msk.bf16.mxu0 %vm12371_vm1, %v16012_v21  ;;  %v9689_v37 = vpop.f32.mrb[21].mxu1 }
 0x3f2   : > { %10358 = vmatmul.mubr.msk.bf16.gmra.mrb[100].mxu0 %vm636_vm3, %v13435_v53  ;;  %v13989_v53 = vpop.f32.mrb[22].mxu1 }
 0x3f3   : > { %10361 = vmatprep.mubr.msk.bf16.mxu0 %vm12371_vm1, %v16012_v21  ;;  %v9690_v63 = vpop.f32.mrb[23].mxu1 }
 0x3f4   : > { %v13994_v25 = vpop.f32.mrb[24].mxu1  ;;  %v16040_v63 = vld [vmem:[#allocation40_spill] sm:$0xff] }
 0x3f5   : > { %v3296_v45 = vpop.f32.mrb[120].mxu0  ;;  %v9693_v56 = vpop.f32.mrb[25].mxu1 }
 0x3f6   : > { %v10253_v42 = vpop.f32.mrb[121].mxu0  ;;  %v14001_v16 = vpop.f32.mrb[26].mxu1 }
 0x3f7   : > { %v3298_v62 = vpop.f32.mrb[122].mxu0  ;;  %v9694_v51 = vpop.f32.mrb[27].mxu1 }
 0x3f8   : > { %v10254_v60 = vpop.f32.mrb[123].mxu0  ;;  %v14008_v17 = vpop.f32.mrb[28].mxu1 }
 0x3f9   : > { %v9697_v23 = vpop.f32.mrb[29].mxu1 }
 0x3fa   : > { %10362 = vmatmul.mubr.msk.bf16.gmra.mrb[104].mxu0 %vm636_vm3, %v13985_v55  ;;  %v14013_v38 = vpop.f32.mrb[30].mxu1 }
 0x3fb   : > { %10365 = vmatprep.mubr.msk.bf16.mxu0 %vm12371_vm1, %v16012_v21  ;;  %v9698_v30 = vpop.f32.mrb[31].mxu1 }
 0x3fc   : > { %v14017_v35 = vpop.f32.mrb[32].mxu1 }
 0x3fd   : > { %v9701_v8 = vpop.f32.mrb[33].mxu1 }
 0x3fe   : > { %v14025_v32 = vpop.f32.mrb[34].mxu1 }
 0x3ff   : > { %v9702_v45 = vpop.f32.mrb[35].mxu1 }
 0x400   : > { %v14029_v37 = vpop.f32.mrb[36].mxu1 }
 0x401   : > { %v9705_v42 = vpop.f32.mrb[37].mxu1 }
 0x402   : > { %10366 = vmatmul.mubr.msk.bf16.gmra.mrb[108].mxu0 %vm636_vm3, %v13997_v41  ;;  %v14033_v14 = vpop.f32.mrb[38].mxu1  ;;  %v16042_v42 = vld [vmem:[#allocation42_spill] sm:$0xff] }
 0x403   : > { %10369 = vmatprep.mubr.msk.bf16.mxu0 %vm12371_vm1, %v16012_v21  ;;  %v9706_v62 = vpop.f32.mrb[39].mxu1 }
 0x404   : > { %v14037_v60 = vpop.f32.mrb[40].mxu1 }
 0x405   : > { %v9709_v33 = vpop.f32.mrb[41].mxu1 }
 0x406   : > { %v14041_v56 = vpop.f32.mrb[42].mxu1 }
 0x407   : > { %v9710_v10 = vpop.f32.mrb[43].mxu1 }
 0x408   : > { %v16043_v10 = vld [vmem:[#allocation43_spill] sm:$0xff] }
 0x40a   : > { %10370 = vmatmul.mubr.msk.bf16.gmra.mrb[124].mxu0 %vm636_vm3, %v3358_v1 }
 0x40b   : > { %10375 = vmatprep.mubr.msk.bf16.mxu0 %vm12371_vm1, %v16012_v21 }
 0x412   : > { %10376 = vmatmul.mubr.msk.bf16.vlgmr.msra.gmra.mrb[0].mxu0 %vm636_vm3, %v16038_v6 }
 0x413   : > { %10492 = vmatpush3.bf16.msra.mxu0 %v4073_v24  ;;  %10379 = vmatprep.mubr.msk.bf16.mxu0 %vm12371_vm1, %v16012_v21 }
 0x41a   : > { %10380 = vmatmul.mubr.msk.bf16.gmra.mrb[4].mxu0 %vm636_vm3, %v16039_v47 }
 0x41b   : > { %10383 = vmatprep.mubr.msk.bf16.mxu0 %vm12371_vm1, %v16012_v21 }
 0x41f   : > { %v1309_v51 = vpop.f32.mrb[116].mxu1 }
 0x420   : > { %v9781_v23 = vpop.f32.mrb[117].mxu1 }
 0x421   : > { %v1311_v1 = vpop.f32.mrb[118].mxu1 }
 0x422   : > { %10384 = vmatmul.mubr.msk.bf16.gmra.mrb[8].mxu0 %vm636_vm3, %v16040_v63  ;;  %v9782_v30 = vpop.f32.mrb[119].mxu1 }
 0x423   : > { %10387 = vmatprep.mubr.msk.bf16.mxu0 %vm12371_vm1, %v16012_v21 }
 0x427   : > { %v14047_v8 = vpop.f32.mrb[44].mxu1 }
 0x428   : > { %v9831_v24 = vpop.f32.mrb[45].mxu1 }
 0x429   : > { %v14051_v6 = vpop.f32.mrb[46].mxu1 }
 0x42a   : > { %10388 = vmatmul.mubr.msk.bf16.gmra.mrb[12].mxu0 %vm636_vm3, %v16041_v20  ;;  %v9832_v45 = vpop.f32.mrb[47].mxu1  ;;  %v16045_v20 = vld [vmem:[#allocation44_spill] sm:$0xff] }
 0x42b   : > { %10391 = vmatprep.mubr.msk.bf16.mxu0 %vm12371_vm1, %v16012_v21 }
 0x42f   : > { %v14055_v47 = vpop.f32.mrb[48].mxu1 }
 0x430   : > { %v9835_v62 = vpop.f32.mrb[49].mxu1 }
 0x431   : > { %v14059_v33 = vpop.f32.mrb[50].mxu1 }
 0x432   : > { %10392 = vmatmul.mubr.msk.bf16.gmra.mrb[16].mxu0 %vm636_vm3, %v16042_v42  ;;  %v9836_v63 = vpop.f32.mrb[51].mxu1 }
 0x433   : > { %10395 = vmatprep.mubr.msk.bf16.mxu0 %vm12371_vm1, %v16012_v21  ;;  %v16048_v63 = vld [vmem:[#allocation45_spill] sm:$0xff] }
 0x437   : > { %v14063_v51 = vpop.f32.mrb[52].mxu1 }
 0x438   : > { %v9839_v23 = vpop.f32.mrb[53].mxu1 }
 0x439   : > { %v14067_v1 = vpop.f32.mrb[54].mxu1 }
 0x43a   : > { %10396 = vmatmul.mubr.msk.bf16.gmra.mrb[20].mxu0 %vm636_vm3, %v16043_v10  ;;  %16044 = vst [vmem:[#allocation22_spill] sm:$0xff] %v14067_v1  ;;  %v9840_v30 = vpop.f32.mrb[55].mxu1 }
 0x43b   : > { %10399 = vmatprep.mubr.msk.bf16.mxu0 %vm12371_vm1, %v16012_v21 }
 0x43f   : > { %v14071_v24 = vpop.f32.mrb[56].mxu1 }
 0x440   : > { %16046 = vst [vmem:[#allocation23_spill] sm:$0xff] %v14071_v24  ;;  %v9843_v45 = vpop.f32.mrb[57].mxu1  ;;  %v16051_v24 = vld [vmem:[#allocation46_spill] sm:$0xff] }
 0x441   : > { %v14075_v42 = vpop.f32.mrb[58].mxu1 }
 0x442   : > { %10400 = vmatmul.mubr.msk.bf16.gmra.mrb[24].mxu0 %vm636_vm3, %v16045_v20  ;;  %16047 = vst [vmem:[#allocation24_spill] sm:$0xff] %v14075_v42  ;;  %v9844_v62 = vpop.f32.mrb[59].mxu1 }
 0x443   : > { %10403 = vmatprep.mubr.msk.bf16.mxu0 %vm12371_vm1, %v16012_v21 }
 0x447   : > { %v14079_v10 = vpop.f32.mrb[60].mxu1 }
 0x448   : > { %16049 = vst [vmem:[#allocation25_spill] sm:$0xff] %v14079_v10  ;;  %v9847_v23 = vpop.f32.mrb[61].mxu1  ;;  %v16054_v10 = vld [vmem:[#allocation47_spill] sm:$0xff] }
 0x449   : > { %v14083_v30 = vpop.f32.mrb[62].mxu1 }
 0x44a   : > { %10404 = vmatmul.mubr.msk.bf16.gmra.mrb[28].mxu0 %vm636_vm3, %v16048_v63  ;;  %16050 = vst [vmem:[#allocation26_spill] sm:$0xff] %v14083_v30  ;;  %v9848_v20 = vpop.f32.mrb[63].mxu1 }
 0x44b   : > { %10407 = vmatprep.mubr.msk.bf16.mxu0 %vm12371_vm1, %v16012_v21 }
 0x44f   : > { %v14087_v1 = vpop.f32.mrb[64].mxu1 }
 0x450   : > { %16052 = vst [vmem:[#allocation27_spill] sm:$0xff] %v14087_v1  ;;  %v9851_v45 = vpop.f32.mrb[65].mxu1  ;;  %v16057_v1 = vld [vmem:[#allocation48_spill] sm:$0xff] }
 0x451   : > { %v14091_v62 = vpop.f32.mrb[66].mxu1 }
 0x452   : > { %10408 = vmatmul.mubr.msk.bf16.gmra.mrb[32].mxu0 %vm636_vm3, %v16051_v24  ;;  %16053 = vst [vmem:[#allocation4_spill] sm:$0xff] %v14091_v62  ;;  %v9852_v63 = vpop.f32.mrb[67].mxu1 }
 0x453   : > { %10411 = vmatprep.mubr.msk.bf16.mxu0 %vm12371_vm1, %v16012_v21 }
 0x457   : > { %v14095_v42 = vpop.f32.mrb[68].mxu1 }
 0x458   : > { %16055 = vst [vmem:[#allocation28_spill] sm:$0xff] %v14095_v42  ;;  %v9855_v23 = vpop.f32.mrb[69].mxu1  ;;  %v16060_v42 = vld [vmem:[#allocation49_spill] sm:$0xff] }
 0x459   : > { %v14099_v20 = vpop.f32.mrb[70].mxu1 }
 0x45a   : > { %10412 = vmatmul.mubr.msk.bf16.gmra.mrb[36].mxu0 %vm636_vm3, %v16054_v10  ;;  %16056 = vst [vmem:[#allocation29_spill] sm:$0xff] %v14099_v20  ;;  %v9856_v24 = vpop.f32.mrb[71].mxu1 }
 0x45b   : > { %10415 = vmatprep.mubr.msk.bf16.mxu0 %vm12371_vm1, %v16012_v21 }
 0x45f   : > { %v14103_v30 = vpop.f32.mrb[72].mxu1 }
 0x460   : > { %16058 = vst [vmem:[#allocation13_spill] sm:$0xff] %v14103_v30  ;;  %v9859_v45 = vpop.f32.mrb[73].mxu1  ;;  %v16063_v30 = vld [vmem:[#allocation50_spill] sm:$0xff] }
 0x461   : > { %v14107_v63 = vpop.f32.mrb[74].mxu1 }
 0x462   : > { %10416 = vmatmul.mubr.msk.bf16.gmra.mrb[40].mxu0 %vm636_vm3, %v16057_v1  ;;  %16059 = vst [vmem:[#allocation30_spill] sm:$0xff] %v14107_v63  ;;  %v9860_v10 = vpop.f32.mrb[75].mxu1 }
 0x463   : > { %10419 = vmatprep.mubr.msk.bf16.mxu0 %vm12371_vm1, %v16012_v21 }
 0x467   : > { %v14111_v62 = vpop.f32.mrb[76].mxu1 }
 0x468   : > { %16061 = vst [vmem:[#allocation31_spill] sm:$0xff] %v14111_v62  ;;  %v9863_v23 = vpop.f32.mrb[77].mxu1  ;;  %v16066_v62 = vld [vmem:[#allocation51_spill] sm:$0xff] }
 0x469   : > { %v14115_v24 = vpop.f32.mrb[78].mxu1 }
 0x46a   : > { %10420 = vmatmul.mubr.msk.bf16.gmra.mrb[44].mxu0 %vm636_vm3, %v16060_v42  ;;  %16062 = vst [vmem:[#allocation17_spill] sm:$0xff] %v14115_v24  ;;  %v9864_v1 = vpop.f32.mrb[79].mxu1 }
 0x46b   : > { %10423 = vmatprep.mubr.msk.bf16.mxu0 %vm12371_vm1, %v16012_v21 }
 0x46f   : > { %v14119_v20 = vpop.f32.mrb[80].mxu1 }
 0x470   : > { %16064 = vst [vmem:[#allocation14_spill] sm:$0xff] %v14119_v20  ;;  %v9867_v45 = vpop.f32.mrb[81].mxu1  ;;  %v16069_v20 = vld [vmem:[#allocation52_spill] sm:$0xff] }
 0x471   : > { %v14123_v10 = vpop.f32.mrb[82].mxu1 }
 0x472   : > { %10424 = vmatmul.mubr.msk.bf16.gmra.mrb[48].mxu0 %vm636_vm3, %v16063_v30  ;;  %16065 = vst [vmem:[#allocation33_spill] sm:$0xff] %v14123_v10  ;;  %v9868_v42 = vpop.f32.mrb[83].mxu1 }
 0x473   : > { %10427 = vmatprep.mubr.msk.bf16.mxu0 %vm12371_vm1, %v16012_v21 }
 0x477   : > { %v14127_v63 = vpop.f32.mrb[84].mxu1 }
 0x478   : > { %16067 = vst [vmem:[#allocation35_spill] sm:$0xff] %v14127_v63  ;;  %v9871_v23 = vpop.f32.mrb[85].mxu1  ;;  %v16071_v63 = vld [vmem:[#allocation18_spill] sm:$0xff] }
 0x479   : > { %v14131_v1 = vpop.f32.mrb[86].mxu1 }
 0x47a   : > { %10428 = vmatmul.mubr.msk.bf16.gmra.mrb[52].mxu0 %vm636_vm3, %v16066_v62  ;;  %16068 = vst [vmem:[#allocation15_spill] sm:$0xff] %v14131_v1  ;;  %v9872_v30 = vpop.f32.mrb[87].mxu1 }
 0x47b   : > { %10431 = vmatprep.mubr.msk.bf16.mxu0 %vm12371_vm1, %v16012_v21 }
 0x47f   : > { %v14135_v24 = vpop.f32.mrb[88].mxu1 }
 0x480   : > { %16070 = vst [vmem:[#allocation16_spill] sm:$0xff] %v14135_v24  ;;  %v9875_v45 = vpop.f32.mrb[89].mxu1  ;;  %v16074_v24 = vld [vmem:[#allocation19_spill] sm:$0xff] }
 0x481   : > { %v14139_v42 = vpop.f32.mrb[90].mxu1 }
 0x482   : > { %10432 = vmatmul.mubr.msk.bf16.gmra.mrb[56].mxu0 %vm636_vm3, %v16069_v20  ;;  %v9876_v62 = vpop.f32.mrb[91].mxu1 }
 0x483   : > { %10435 = vmatprep.mubr.msk.bf16.mxu0 %vm12371_vm1, %v16012_v21 }
 0x487   : > { %v14143_v10 = vpop.f32.mrb[92].mxu1 }
 0x488   : > { %16072 = vst [vmem:[#allocation3_spill] sm:$0xff] %v14143_v10  ;;  %v9879_v23 = vpop.f32.mrb[93].mxu1 }
 0x489   : > { %v14147_v30 = vpop.f32.mrb[94].mxu1 }
 0x48a   : > { %10436 = vmatmul.mubr.msk.bf16.gmra.mrb[60].mxu0 %vm636_vm3, %v16071_v63  ;;  %16073 = vst [vmem:[#allocation2_spill] sm:$0xff] %v14147_v30  ;;  %v9880_v20 = vpop.f32.mrb[95].mxu1  ;;  %v16084_v30 = vld [vmem:[#allocation36_spill] sm:$0xff] }
 0x48b   : > { %10439 = vmatprep.mubr.msk.bf16.mxu0 %vm12371_vm1, %v16012_v21 }
 0x48f   : > { %v14151_v1 = vpop.f32.mrb[96].mxu1 }
 0x490   : > { %16075 = vst [vmem:[#allocation32_spill] sm:$0xff] %v14151_v1  ;;  %v9883_v45 = vpop.f32.mrb[97].mxu1 }
 0x491   : > { %v14155_v62 = vpop.f32.mrb[98].mxu1 }
 0x492   : > { %10440 = vmatmul.mubr.msk.bf16.gmra.mrb[64].mxu0 %vm636_vm3, %v16074_v24  ;;  %16076 = vst [vmem:[#allocation34_spill] sm:$0xff] %v14155_v62  ;;  %v9884_v63 = vpop.f32.mrb[99].mxu1 }
 0x493   : > { %10443 = vmatprep.mubr.msk.bf16.mxu0 %vm12371_vm1, %v16012_v21 }
 0x497   : > { %v14159_v10 = vpop.f32.mrb[100].mxu1 }
 0x498   : > { %16077 = vst [vmem:[#allocation38_spill] sm:$0xff] %v14159_v10  ;;  %v9887_v23 = vpop.f32.mrb[101].mxu1  ;;  %v16081_v10 = vld [vmem:[#allocation20_spill] sm:$0xff] }
 0x499   : > { %v14163_v20 = vpop.f32.mrb[102].mxu1 }
 0x49a   : > { %10444 = vmatmul.mubr.msk.bf16.gmra.mrb[68].mxu0 %vm636_vm3, %v13328_v9  ;;  %16078 = vst [vmem:[#allocation39_spill] sm:$0xff] %v14163_v20  ;;  %v9888_v24 = vpop.f32.mrb[103].mxu1  ;;  %v16083_v20 = vld [vmem:[#allocation21_spill] sm:$0xff] }
 0x49b   : > { %10447 = vmatprep.mubr.msk.bf16.mxu0 %vm12371_vm1, %v16012_v21 }
 0x49f   : > { %v14167_v1 = vpop.f32.mrb[104].mxu1 }
 0x4a0   : > { %16079 = vst [vmem:[#allocation40_spill] sm:$0xff] %v14167_v1  ;;  %v9891_v45 = vpop.f32.mrb[105].mxu1 }
 0x4a1   : > { %v14171_v63 = vpop.f32.mrb[106].mxu1 }
 0x4a2   : > { %10448 = vmatmul.mubr.msk.bf16.gmra.mrb[72].mxu0 %vm636_vm3, %v13347_v46  ;;  %16080 = vst [vmem:[#allocation41_spill] sm:$0xff] %v14171_v63  ;;  %v9892_v9 = vpop.f32.mrb[107].mxu1 }
 0x4a3   : > { %10451 = vmatprep.mubr.msk.bf16.mxu0 %vm12371_vm1, %v16012_v21 }
 0x4a7   : > { %v14175_v62 = vpop.f32.mrb[108].mxu1 }
 0x4a8   : > { %16082 = vst [vmem:[#allocation42_spill] sm:$0xff] %v14175_v62  ;;  %v9895_v23 = vpop.f32.mrb[109].mxu1 }
 0x4a9   : > { %v1746_v24 = vpop.f32.mrb[110].mxu1  ;;  %v4574_v23 = vld [vmem:[%s15827_s7 + $0x18] sm:$0xff] }
 0x4aa   : > { %10452 = vmatmul.mubr.msk.bf16.gmra.mrb[76].mxu0 %vm636_vm3, %v16081_v10  ;;  %v9896_v46 = vpop.f32.mrb[111].mxu1  ;;  %v16085_v10 = vld [vmem:[#allocation37_spill] sm:$0xff]  ;;  %v3695_v24 = vshll.u32 %v13985_v55, 16 }
 0x4ab   : > { %10455 = vmatprep.mubr.msk.bf16.mxu0 %vm12371_vm1, %v16012_v21  ;;  %v4576_v46 = vld [vmem:[%s15827_s7 + $0x28] sm:$0xff] }
 0x4af   : > { %v1750_v1 = vpop.f32.mrb[120].mxu1 }
 0x4b0   : > { %v9899_v45 = vpop.f32.mrb[121].mxu1  ;;  %v4571_v1 = vld [vmem:[%s15827_s7] sm:$0xff] }
 0x4b1   : > { %v1752_v9 = vpop.f32.mrb[122].mxu1  ;;  %v4577_v45 = vld [vmem:[%s15827_s7 + $0x30] sm:$0xff] }
 0x4b2   : > { %10456 = vmatmul.mubr.msk.bf16.gmra.mrb[80].mxu0 %vm636_vm3, %v16083_v20  ;;  %v9900_v63 = vpop.f32.mrb[123].mxu1  ;;  %v12372_v20 = vmov 0   ;;  %v3697_v9 = vrot.slane %v3695_v24, 1 }
 0x4b3   : > { %10459 = vmatprep.mubr.msk.bf16.mxu0 %vm12371_vm1, %v16012_v21  ;;  %12305 = vset.pattern.permute.xlu0 %v12372_v20  ;;  %v4572_v63 = vld [vmem:[%s15827_s7 + $0x8] sm:$0xff] }
 0x4b4   : > { %4628 = vperm.xlu0 %12305, %v4571_v1   ;;  %12306 = vset.pattern.permute.xlu1 %v12372_v20  ;;  %v3698_v20 = vsel %vm404_vm4, %v13464_v11, %v3697_v9  ;;  %v3699_v1 = vshrl.u32 %v13985_v55, 16 }
 0x4b6   : > { %v3701_v11 = vor.u32 %v3699_v1, %v3697_v9 }
 0x4b8   : > { %4633 = vperm.xlu0 %12305, %v4572_v63   ;;  %v370_v63 = vld [vmem:[%s12446_s12 + $0x1f8] sm:$0xff] }
 0x4b9   : > { %v14240_v24 = vpack.c.bf16 %v370_v63, %v14006_v2  ;;  %v3706_v63 = vshrl.u32 %v13997_v41, 16 }
 0x4ba   : > { %10460 = vmatmul.mubr.msk.bf16.gmra.mrb[84].mxu0 %vm636_vm3, %v16084_v30  ;;  %v4573_v30 = vld [vmem:[%s15827_s7 + $0x10] sm:$0xff] }
 0x4bb   : > { %10463 = vmatprep.mubr.msk.bf16.mxu0 %vm12371_vm1, %v16012_v21  ;;  %4638 = vperm.xlu1 %12306, %v4573_v30   ;;  %v3702_v30 = vshll.u32 %v13997_v41, 16  ;;  %v3710_v9 = vshll.u32 %v14240_v24, 16 }
 0x4bf   : > { %4643 = vperm.xlu1 %12306, %v4574_v23   ;;  %v4580_v23 = vld [vmem:[%s15827_s7 + $0x48] sm:$0xff] }
 0x4c2   : > { %10464 = vmatmul.mubr.msk.bf16.gmra.mrb[88].mxu0 %vm636_vm3, %v16085_v10  ;;  %v4578_v10 = vld [vmem:[%s15827_s7 + $0x38] sm:$0xff] }
 0x4c3   : > { %10467 = vmatprep.mubr.msk.bf16.mxu0 %vm12371_vm1, %v16012_v21  ;;  %4653 = vperm.xlu1 %12306, %v4576_v46   ;;  %v3704_v46 = vrot.slane %v3702_v30, 1  ;;  %v4584_v30 = vld [vmem:[%s15827_s7 + $0x68] sm:$0xff] }
 0x4c5   : > { %v3705_v2 = vsel %vm404_vm4, %v3701_v11, %v3704_v46  ;;  %v4586_v11 = vld [vmem:[%s15827_s7 + $0x78] sm:$0xff] }
 0x4c7   : > { %4663 = vperm.xlu1 %12306, %v4578_v10  }
 0x4ca   : > { %10468 = vmatmul.mubr.msk.bf16.gmra.mrb[92].mxu0 %vm636_vm3, %v13438_v4  ;;  %v4575_v4 = vld [vmem:[%s15827_s7 + $0x20] sm:$0xff] }
 0x4cb   : > { %10471 = vmatprep.mubr.msk.bf16.mxu0 %vm12371_vm1, %v16012_v21  ;;  %4648 = vperm.xlu0 %12305, %v4575_v4   ;;  %v4581_v4 = vld [vmem:[%s15827_s7 + $0x50] sm:$0xff] }
 0x4cc   : > { %4673 = vperm.xlu1 %12306, %v4580_v23   ;;  %v4585_v23 = vld [vmem:[%s15827_s7 + $0x70] sm:$0xff] }
 0x4cf   : > { %4658 = vperm.xlu0 %12305, %v4577_v45   ;;  %v4582_v45 = vld [vmem:[%s15827_s7 + $0x58] sm:$0xff] }
 0x4d0   : > { %4683 = vperm.xlu1 %12306, %v4582_v45   ;;  %v4587_v45 = vld [vmem:[%s15827_s7 + $0x80] sm:$0xff] }
 0x4d2   : > { %10472 = vmatmul.mubr.msk.bf16.gmra.mrb[96].mxu0 %vm636_vm3, %v13452_v19  ;;  %v4579_v19 = vld [vmem:[%s15827_s7 + $0x40] sm:$0xff] }
 0x4d3   : > { %10475 = vmatprep.mubr.msk.bf16.mxu0 %vm12371_vm1, %v16012_v21  ;;  %4668 = vperm.xlu0 %12305, %v4579_v19   ;;  %v4583_v19 = vld [vmem:[%s15827_s7 + $0x60] sm:$0xff] }
 0x4d4   : > { %4693 = vperm.xlu1 %12306, %v4584_v30   ;;  %v4593_v30 = vld [vmem:[%s15827_s7 + $0xb0] sm:$0xff] }
 0x4d7   : > { %4678 = vperm.xlu0 %12305, %v4581_v4   ;;  %v3712_v4 = vrot.slane %v3710_v9, 1 }
 0x4d8   : > { %4703 = vperm.xlu1 %12306, %v4586_v11   ;;  %v4596_v11 = vld [vmem:[%s15827_s7 + $0xc8] sm:$0xff] }
 0x4da   : > { %10476 = vmatmul.mubr.msk.bf16.gmra.mrb[100].mxu0 %vm636_vm3, %v3698_v20 }
 0x4db   : > { %10479 = vmatprep.mubr.msk.bf16.mxu0 %vm12371_vm1, %v16012_v21  ;;  %4688 = vperm.xlu0 %12305, %v4583_v19   ;;  %v3714_v19 = vshrl.u32 %v14240_v24, 16 }
 0x4dd   : > { %v3632_v10 = vpop.f32.mrb[124].mxu0  ;;  %v3716_v9 = vor.u32 %v3714_v19, %v3712_v4  ;;  %v4599_v19 = vld [vmem:[%s15827_s7 + $0xe0] sm:$0xff] }
 0x4de   : > { %v10371_v20 = vpop.f32.mrb[125].mxu0 }
 0x4df   : > { %v3634_v62 = vpop.f32.mrb[126].mxu0  ;;  %4698 = vperm.xlu0 %12305, %v4585_v23   ;;  %v4589_v20 = vld [vmem:[%s15827_s7 + $0x90] sm:$0xff]  ;;  %v4594_v23 = vld [vmem:[%s15827_s7 + $0xb8] sm:$0xff] }
 0x4e0   : > { %v10372_v1 = vpop.f32.mrb[127].mxu0  ;;  %v3708_v62 = vor.u32 %v3706_v63, %v3704_v46  ;;  %v4588_v46 = vld [vmem:[%s15827_s7 + $0x88] sm:$0xff]  ;;  %v4591_v63 = vld [vmem:[%s15827_s7 + $0xa0] sm:$0xff] }
 0x4e1   : > { %4713 = vperm.xlu1 %12306, %v4588_v46   ;;  %v4592_v1 = vld [vmem:[%s15827_s7 + $0xa8] sm:$0xff]  ;;  %v16087_v46 = vld [vmem:[#allocation6_spill] sm:$0xff] }
 0x4e2   : > { %10480 = vmatmul.mubr.msk.bf16.gmra.mrb[104].mxu0 %vm636_vm3, %v3705_v2  ;;  %v3713_v10 = vsel %vm404_vm4, %v3708_v62, %v3712_v4  ;;  %v4590_v2 = vld [vmem:[%s15827_s7 + $0x98] sm:$0xff]  ;;  %v4595_v62 = vld [vmem:[%s15827_s7 + $0xc0] sm:$0xff] }
 0x4e3   : > { %10483 = vmatprep.mubr.msk.bf16.mxu0 %vm12371_vm1, %v16012_v21  ;;  %4708 = vperm.xlu0 %12305, %v4587_v45   ;;  %v16086_v4 = vld [vmem:[#allocation5_spill] sm:$0xff]  ;;  %v4597_v45 = vld [vmem:[%s15827_s7 + $0xd0] sm:$0xff] }
 0x4e5   : > { %4723 = vperm.xlu1 %12306, %v4590_v2   ;;  %v4601_v2 = vld [vmem:[%s15827_s7 + $0xf0] sm:$0xff] }
 0x4e7   : > { %4718 = vperm.xlu0 %12305, %v4589_v20   ;;  %v4600_v20 = vld [vmem:[%s15827_s7 + $0xe8] sm:$0xff] }
 0x4e9   : > { %4733 = vperm.xlu1 %12306, %v4592_v1   ;;  %v16088_v1 = vld [vmem:[#allocation7_spill] sm:$0xff] }
 0x4ea   : > { %10484 = vmatmul.mubr.msk.bf16.gmra.mrb[108].mxu0 %vm636_vm3, %v3713_v10  ;;  %v4598_v10 = vld [vmem:[%s15827_s7 + $0xd8] sm:$0xff] }
 0x4eb   : > { %10487 = vmatprep.mubr.msk.bf16.mxu0 %vm12371_vm1, %v16012_v21  ;;  %4728 = vperm.xlu0 %12305, %v4591_v63   ;;  %v4602_v63 = vld [vmem:[%s15827_s7 + $0xf8] sm:$0xff] }
 0x4ed   : > { %4743 = vperm.xlu1 %12306, %v4594_v23   ;;  %v4605_v23 = vld [vmem:[%s15827_s7 + $0x110] sm:$0xff] }
 0x4ef   : > { %4738 = vperm.xlu0 %12305, %v4593_v30   ;;  %v4604_v30 = vld [vmem:[%s15827_s7 + $0x108] sm:$0xff] }
 0x4f1   : > { %4753 = vperm.xlu1 %12306, %v4596_v11   ;;  %v16089_v11 = vld [vmem:[#allocation8_spill] sm:$0xff] }
 0x4f2   : > { %10488 = vmatmul.mubr.msk.bf16.gmra.mrb[128].mxu0 %vm636_vm3, %v3716_v9  ;;  %v4603_v9 = vld [vmem:[%s15827_s7 + $0x100] sm:$0xff] }
 0x4f3   : > { %10493 = vmatprep.mubr.msk.bf16.mxu0 %vm12371_vm1, %v16012_v21  ;;  %4748 = vperm.xlu0 %12305, %v4595_v62   ;;  %v4606_v62 = vld [vmem:[%s15827_s7 + $0x118] sm:$0xff] }
 0x4f5   : > { %4763 = vperm.xlu1 %12306, %v4598_v10   ;;  %v4609_v10 = vld [vmem:[%s15827_s7 + $0x130] sm:$0xff] }
 0x4f7   : > { %4758 = vperm.xlu0 %12305, %v4597_v45   ;;  %v4608_v45 = vld [vmem:[%s15827_s7 + $0x128] sm:$0xff] }
 0x4f9   : > { %4773 = vperm.xlu1 %12306, %v4600_v20   ;;  %v16090_v20 = vld [vmem:[#allocation9_spill] sm:$0xff] }
 0x4fa   : > { %10494 = vmatmul.mubr.msk.bf16.vlgmr.msra.gmra.mrb[0].mxu0 %vm636_vm3, %v16086_v4  ;;  %v4607_v4 = vld [vmem:[%s15827_s7 + $0x120] sm:$0xff] }
 0x4fb   : > { %10497 = vmatprep.mubr.msk.bf16.mxu0 %vm12371_vm1, %v16012_v21  ;;  %4768 = vperm.xlu0 %12305, %v4599_v19   ;;  %v4610_v19 = vld [vmem:[%s15827_s7 + $0x138] sm:$0xff] }
 0x4fd   : > { %4783 = vperm.xlu1 %12306, %v4602_v63   ;;  %v4613_v63 = vld [vmem:[%s15827_s7 + $0x150] sm:$0xff] }
 0x4ff   : > { %4778 = vperm.xlu0 %12305, %v4601_v2   ;;  %v4612_v2 = vld [vmem:[%s15827_s7 + $0x148] sm:$0xff] }
 0x501   : > { %4793 = vperm.xlu1 %12306, %v4604_v30   ;;  %v16091_v30 = vld [vmem:[#allocation10_spill] sm:$0xff] }
 0x502   : > { %10498 = vmatmul.mubr.msk.bf16.gmra.mrb[4].mxu0 %vm636_vm3, %v16087_v46  ;;  %v4611_v46 = vld [vmem:[%s15827_s7 + $0x140] sm:$0xff] }
 0x503   : > { %10501 = vmatprep.mubr.msk.bf16.mxu0 %vm12371_vm1, %v16012_v21  ;;  %4788 = vperm.xlu0 %12305, %v4603_v9   ;;  %v4614_v9 = vld [vmem:[%s15827_s7 + $0x158] sm:$0xff] }
 0x505   : > { %4803 = vperm.xlu1 %12306, %v4606_v62   ;;  %v4617_v62 = vld [vmem:[%s15827_s7 + $0x170] sm:$0xff] }
 0x507   : > { %4798 = vperm.xlu0 %12305, %v4605_v23   ;;  %v4616_v23 = vld [vmem:[%s15827_s7 + $0x168] sm:$0xff] }
 0x509   : > { %4813 = vperm.xlu1 %12306, %v4608_v45   ;;  %v16092_v45 = vld [vmem:[#allocation11_spill] sm:$0xff] }
 0x50a   : > { %10502 = vmatmul.mubr.msk.bf16.gmra.mrb[8].mxu0 %vm636_vm3, %v16088_v1  ;;  %v4615_v1 = vld [vmem:[%s15827_s7 + $0x160] sm:$0xff] }
 0x50b   : > { %10505 = vmatprep.mubr.msk.bf16.mxu0 %vm12371_vm1, %v16012_v21  ;;  %4808 = vperm.xlu0 %12305, %v4607_v4   ;;  %v4618_v4 = vld [vmem:[%s15827_s7 + $0x178] sm:$0xff] }
 0x50d   : > { %4823 = vperm.xlu1 %12306, %v4610_v19   ;;  %v4621_v19 = vld [vmem:[%s15827_s7 + $0x190] sm:$0xff] }
 0x50f   : > { %4818 = vperm.xlu0 %12305, %v4609_v10   ;;  %v4620_v10 = vld [vmem:[%s15827_s7 + $0x188] sm:$0xff] }
 0x511   : > { %4833 = vperm.xlu1 %12306, %v4612_v2   ;;  %v16093_v2 = vld [vmem:[#allocation12_spill] sm:$0xff] }
 0x512   : > { %10506 = vmatmul.mubr.msk.bf16.gmra.mrb[12].mxu0 %vm636_vm3, %v16089_v11  ;;  %v4619_v11 = vld [vmem:[%s15827_s7 + $0x180] sm:$0xff] }
 0x513   : > { %10509 = vmatprep.mubr.msk.bf16.mxu0 %vm12371_vm1, %v16012_v21  ;;  %4828 = vperm.xlu0 %12305, %v4611_v46   ;;  %v4622_v46 = vld [vmem:[%s15827_s7 + $0x198] sm:$0xff] }
 0x515   : > { %4843 = vperm.xlu1 %12306, %v4614_v9   ;;  %v4625_v9 = vld [vmem:[%s15827_s7 + $0x1b0] sm:$0xff] }
 0x517   : > { %4838 = vperm.xlu0 %12305, %v4613_v63   ;;  %v4624_v63 = vld [vmem:[%s15827_s7 + $0x1a8] sm:$0xff] }
 0x519   : > { %4853 = vperm.xlu1 %12306, %v4616_v23  }
 0x51a   : > { %10510 = vmatmul.mubr.msk.bf16.gmra.mrb[16].mxu0 %vm636_vm3, %v16090_v20  ;;  %v4623_v20 = vld [vmem:[%s15827_s7 + $0x1a0] sm:$0xff] }
 0x51b   : > { %10513 = vmatprep.mubr.msk.bf16.mxu0 %vm12371_vm1, %v16012_v21  ;;  %4848 = vperm.xlu0 %12305, %v4615_v1   ;;  %v8823_v1 = vld [vmem:[%s15822_s2 + $0x2] sm:$0x3] }
 0x51c   : > { %12284 = vmatprep.subr.msk.bf16.mxu1 %vm724_vm0, %v8823_v1 }
 0x51d   : > { %4863 = vperm.xlu1 %12306, %v4618_v4  }
 0x51f   : > { %4858 = vperm.xlu0 %12305, %v4617_v62  }
 0x521   : > { %4873 = vperm.xlu1 %12306, %v4620_v10  }
 0x522   : > { %10514 = vmatmul.mubr.msk.bf16.gmra.mrb[20].mxu0 %vm636_vm3, %v16091_v30  ;;  %v5253_v30 = vsel %vm724_vm0, %v8823_v1, 0 }
 0x523   : > { %10517 = vmatprep.mubr.msk.bf16.mxu0 %vm12371_vm1, %v16012_v21  ;;  %4868 = vperm.xlu0 %12305, %v4619_v11  }
 0x524   : > { %10610 = vmatpush3.bf16.msra.mxu1 %v5253_v30 }
 0x525   : > { %4883 = vperm.xlu1 %12306, %v4622_v46  }
 0x527   : > { %4878 = vperm.xlu0 %12305, %v4621_v19  }
 0x529   : > { %4893 = vperm.xlu1 %12306, %v4624_v63  }
 0x52a   : > { %10518 = vmatmul.mubr.msk.bf16.gmra.mrb[24].mxu0 %vm636_vm3, %v16092_v45 }
 0x52b   : > { %10521 = vmatprep.mubr.msk.bf16.mxu0 %vm12371_vm1, %v16012_v21  ;;  %4888 = vperm.xlu0 %12305, %v4623_v20  }
 0x52f   : > { %4898 = vperm.xlu0 %12305, %v4625_v9  }
 0x532   : > { %10522 = vmatmul.mubr.msk.bf16.gmra.mrb[28].mxu0 %vm636_vm3, %v16093_v2 }
 0x533   : > { %10525 = vmatprep.mubr.msk.bf16.mxu0 %vm12371_vm1, %v16012_v21 }
 0x53a   : > { %10526 = vmatmul.mubr.msk.bf16.gmra.mrb[32].mxu0 %vm636_vm3, %v13742_v58  ;;  %v4054_v58 = vrot.slane %v13985_v55, 1  ;;  %v4639_v30 = vpop.permute.xlu1 %4638 }
 0x53b   : > { %10529 = vmatprep.mubr.msk.bf16.mxu0 %vm12371_vm1, %v16012_v21 }
 0x542   : > { %10530 = vmatmul.mubr.msk.bf16.gmra.mrb[36].mxu0 %vm636_vm3, %v13754_v50  ;;  %v4055_v50 = vsel %vm1345_vm2, %v13935_v3, %v4054_v58 }
 0x543   : > { %10533 = vmatprep.mubr.msk.bf16.mxu0 %vm12371_vm1, %v16012_v21 }
 0x54a   : > { %10534 = vmatmul.mubr.msk.bf16.gmra.mrb[40].mxu0 %vm636_vm3, %v13766_v52  ;;  %v4056_v52 = vrot.slane %v13997_v41, 1  ;;  %v4629_v41 = vpop.permute.xlu0 %4628 }
 0x54b   : > { %10537 = vmatprep.mubr.msk.bf16.mxu0 %vm12371_vm1, %v16012_v21 }
 0x552   : > { %10538 = vmatmul.mubr.msk.bf16.gmra.mrb[44].mxu0 %vm636_vm3, %v13778_v57 }
 0x553   : > { %10541 = vmatprep.mubr.msk.bf16.mxu0 %vm12371_vm1, %v16012_v21 }
 0x55a   : > { %10542 = vmatmul.mubr.msk.bf16.gmra.mrb[48].mxu0 %vm636_vm3, %v13790_v5 }
 0x55b   : > { %10545 = vmatprep.mubr.msk.bf16.mxu0 %vm12371_vm1, %v16012_v21 }
 0x562   : > { %10546 = vmatmul.mubr.msk.bf16.gmra.mrb[52].mxu0 %vm636_vm3, %v13802_v59 }
 0x563   : > { %10549 = vmatprep.mubr.msk.bf16.mxu0 %vm12371_vm1, %v16012_v21 }
 0x56a   : > { %10550 = vmatmul.mubr.msk.bf16.gmra.mrb[56].mxu0 %vm636_vm3, %v13814_v0  ;;  %v4057_v0 = vsel %vm1345_vm2, %v4054_v58, %v4056_v52 }
 0x56b   : > { %10553 = vmatprep.mubr.msk.bf16.mxu0 %vm12371_vm1, %v16012_v21 }
 0x572   : > { %10554 = vmatmul.mubr.msk.bf16.gmra.mrb[60].mxu0 %vm636_vm3, %v13826_v18 }
 0x573   : > { %10557 = vmatprep.mubr.msk.bf16.mxu0 %vm12371_vm1, %v16012_v21 }
 0x57a   : > { %10558 = vmatmul.mubr.msk.bf16.gmra.mrb[64].mxu0 %vm636_vm3, %v13838_v12  ;;  %v4058_v12 = vrot.slane %v14240_v24, 1 }
 0x57b   : > { %10561 = vmatprep.mubr.msk.bf16.mxu0 %vm12371_vm1, %v16012_v21 }
 0x57c   : > { %v4059_v3 = vsel %vm1345_vm2, %v4056_v52, %v4058_v12 }
 0x582   : > { %10562 = vmatmul.mubr.msk.bf16.gmra.mrb[68].mxu0 %vm636_vm3, %v13850_v29 }
 0x583   : > { %10565 = vmatprep.mubr.msk.bf16.mxu0 %vm12371_vm1, %v16012_v21 }
 0x58a   : > { %10566 = vmatmul.mubr.msk.bf16.gmra.mrb[72].mxu0 %vm636_vm3, %v13862_v34  ;;  %v14510_v34 = vld [vmem:[%s15823_s3] ss:$0 sm:$0xff] }
 0x58b   : > { %10569 = vmatprep.mubr.msk.bf16.mxu0 %vm12371_vm1, %v16012_v21 }
 0x592   : > { %10570 = vmatmul.mubr.msk.bf16.gmra.mrb[76].mxu0 %vm636_vm3, %v13874_v39 }
 0x593   : > { %10573 = vmatprep.mubr.msk.bf16.mxu0 %vm12371_vm1, %v16012_v21 }
 0x59a   : > { %10574 = vmatmul.mubr.msk.bf16.gmra.mrb[80].mxu0 %vm636_vm3, %v13886_v44 }
 0x59b   : > { %10577 = vmatprep.mubr.msk.bf16.mxu0 %vm12371_vm1, %v16012_v21 }
 0x5a2   : > { %10578 = vmatmul.mubr.msk.bf16.gmra.mrb[84].mxu0 %vm636_vm3, %v13898_v15  ;;  %v14516_v15 = vld [vmem:[%s15822_s2] sm:$0x3] }
 0x5a3   : > { %10581 = vmatprep.mubr.msk.bf16.mxu0 %vm12371_vm1, %v16012_v21  ;;  %12285 = vmatprep.subr.msk.bf16.mxu1 %vm724_vm0, %v14516_v15 }
 0x5aa   : > { %10582 = vmatmul.mubr.msk.bf16.gmra.mrb[88].mxu0 %vm636_vm3, %v13910_v49  ;;  %v14521_v49 = vld [vmem:[%s15824_s4] ss:$0 sm:$0xff] }
 0x5ab   : > { %10585 = vmatprep.mubr.msk.bf16.mxu0 %vm12371_vm1, %v16012_v21 }
 0x5b2   : > { %10586 = vmatmul.mubr.msk.bf16.gmra.mrb[92].mxu0 %vm636_vm3, %v13924_v61 }
 0x5b3   : > { %10589 = vmatprep.mubr.msk.bf16.mxu0 %vm12371_vm1, %v16012_v21 }
 0x5ba   : > { %10590 = vmatmul.mubr.msk.bf16.gmra.mrb[96].mxu0 %vm636_vm3, %v13941_v26 }
 0x5bb   : > { %10593 = vmatprep.mubr.msk.bf16.mxu0 %vm12371_vm1, %v16012_v21 }
 0x5c2   : > { %10594 = vmatmul.mubr.msk.bf16.gmra.mrb[100].mxu0 %vm636_vm3, %v4055_v50 }
 0x5c3   : > { %10597 = vmatprep.mubr.msk.bf16.mxu0 %vm12371_vm1, %v16012_v21 }
 0x5c5   : > { %v3989_v57 = vpop.f32.mrb[128].mxu0 }
 0x5c6   : > { %v10489_v5 = vpop.f32.mrb[129].mxu0 }
 0x5c7   : > { %v3991_v59 = vpop.f32.mrb[130].mxu0 }
 0x5c8   : > { %v10490_v18 = vpop.f32.mrb[131].mxu0 }
 0x5c9   : > { %v4644_v18 = vpop.permute.xlu1 %4643 }
 0x5ca   : > { %10598 = vmatmul.mubr.msk.bf16.gmra.mrb[104].mxu0 %vm636_vm3, %v4057_v0 }
 0x5cb   : > { %10601 = vmatprep.mubr.msk.bf16.mxu0 %vm12371_vm1, %v16012_v21 }
 0x5cd   : > { %v4109_v29 = vpop.f32.mrb[0].mxu0 }
 0x5ce   : > { %v11061_v39 = vadd.f32 %v4109_v29, %v13921_v31  ;;  %v10495_v44 = vpop.f32.mrb[1].mxu0 }
 0x5cf   : > { %v4112_v61 = vpop.f32.mrb[2].mxu0 }
 0x5d0   : > { %v4399_v26 = vmul.f32 %v11061_v39, %v14510_v34  ;;  %v11062_v31 = vadd.f32 %v4112_v61, %v13932_v54  ;;  %v10496_v55 = vpop.f32.mrb[3].mxu0  ;;  %v4634_v54 = vpop.permute.xlu0 %4633 }
 0x5d2   : > { %v4461_v24 = vadd.f32 %v14521_v49, %v4399_v26  ;;  %v4400_v23 = vmul.f32 %v11062_v31, %v14510_v34  ;;  %10602 = vmatmul.mubr.msk.bf16.gmra.mrb[108].mxu0 %vm636_vm3, %v4059_v3 }
 0x5d3   : > { %10605 = vmatprep.mubr.msk.bf16.mxu0 %vm12371_vm1, %v16012_v21 }
 0x5d4   : > { %v4516_v62 = vmax.f32 %v4461_v24, 0.0  ;;  %v4462_v4 = vadd.f32 %v14521_v49, %v4400_v23 }
 0x5d5   : > { %v4117_v11 = vpop.f32.mrb[4].mxu0 }
 0x5d6   : > { %v4517_v45 = vmax.f32 %v4462_v4, 0.0  ;;  %v11063_v10 = vadd.f32 %v4117_v11, %v13943_v48  ;;  %v10499_v19 = vpop.f32.mrb[5].mxu0  ;;  %v4901_v20 = vmul.f32 %v4629_v41, %v4516_v62  ;;  %v4649_v4 = vpop.permute.xlu0 %4648 }
 0x5d7   : > { %v4120_v46 = vpop.f32.mrb[6].mxu0 }
 0x5d8   : > { %v4902_v2 = vmul.f32 %v4634_v54, %v4517_v45  ;;  %v4401_v63 = vmul.f32 %v11063_v10, %v14510_v34  ;;  %v11064_v9 = vadd.f32 %v4120_v46, %v13951_v7  ;;  %v10500_v1 = vpop.f32.mrb[7].mxu0 }
 0x5da   : > { %v14537_v58 = vpack.c.bf16 %v4902_v2, %v4901_v20  ;;  %v4463_v21 = vadd.f32 %v14521_v49, %v4401_v63  ;;  %v4402_v50 = vmul.f32 %v11064_v9, %v14510_v34  ;;  %10606 = vmatmul.mubr.msk.bf16.gmra.mrb[132].mxu0 %vm636_vm3, %v4058_v12  ;;  %v4654_v20 = vpop.permute.xlu1 %4653 }
 0x5dc   : > { %v4518_v48 = vmax.f32 %v4463_v21, 0.0  ;;  %v4464_v52 = vadd.f32 %v14521_v49, %v4402_v50  ;;  %v4987_v5 = vshll.u32 %v14537_v58, 16  ;;  %v4985_v24 = vshrl.u32 %v14537_v58, 16 }
 0x5dd   : > { %v4125_v57 = vpop.f32.mrb[8].mxu0 }
 0x5de   : > { %v4519_v59 = vmax.f32 %v4464_v52, 0.0  ;;  %v11065_v0 = vadd.f32 %v4125_v57, %v13955_v13  ;;  %v10503_v7 = vpop.f32.mrb[9].mxu0  ;;  %v4903_v39 = vmul.f32 %v4639_v30, %v4518_v48  ;;  %v4989_v12 = vrot.slane %v4987_v5, 1 }
 0x5df   : > { %v4128_v29 = vpop.f32.mrb[10].mxu0 }
 0x5e0   : > { %v4904_v44 = vmul.f32 %v4644_v18, %v4519_v59  ;;  %v4403_v61 = vmul.f32 %v11065_v0, %v14510_v34  ;;  %v11066_v3 = vadd.f32 %v4128_v29, %v13961_v28  ;;  %v10504_v26 = vpop.f32.mrb[11].mxu0  ;;  %v4990_v45 = vor.u32 %v4989_v12, %v4985_v24  ;;  %v4659_v0 = vpop.permute.xlu0 %4658 }
 0x5e2   : > { %v14547_v31 = vpack.c.bf16 %v4904_v44, %v4903_v39  ;;  %v4465_v55 = vadd.f32 %v14521_v49, %v4403_v61  ;;  %v4404_v41 = vmul.f32 %v11066_v3, %v14510_v34  ;;  %v4664_v3 = vpop.permute.xlu1 %4663 }
 0x5e4   : > { %v4520_v13 = vmax.f32 %v4465_v55, 0.0  ;;  %v4466_v23 = vadd.f32 %v14521_v49, %v4404_v41  ;;  %v4992_v62 = vshll.u32 %v14547_v31, 16  ;;  %v5513_v55 = vsel %vm724_vm0, %v14516_v15, 0 }
 0x5e5   : > { %v4133_v11 = vpop.f32.mrb[12].mxu0 }
 0x5e6   : > { %v4905_v10 = vmul.f32 %v4649_v4, %v4520_v13  ;;  %v4521_v28 = vmax.f32 %v4466_v23, 0.0  ;;  %v11067_v19 = vadd.f32 %v4133_v11, %v13965_v43  ;;  %v10507_v54 = vpop.f32.mrb[13].mxu0  ;;  %v4994_v46 = vrot.slane %v4992_v62, 1 }
 0x5e7   : > { %v4136_v2 = vpop.f32.mrb[14].mxu0 }
 0x5e8   : > { %v4906_v63 = vmul.f32 %v4654_v20, %v4521_v28  ;;  %v4405_v9 = vmul.f32 %v11067_v19, %v14510_v34  ;;  %v11068_v1 = vadd.f32 %v4136_v2, %v13969_v22  ;;  %v10508_v30 = vpop.f32.mrb[15].mxu0  ;;  %v4995_v21 = vsel %vm404_vm4, %v4990_v45, %v4994_v46 }
 0x5e9   : > { %10611 = vmatprep.mubr.msk.bf16.mxu1 %vm636_vm3, %v4995_v21  ;;  %v14559_v50 = vpack.c.bf16 %v4905_v10, %v4904_v44  ;;  %v4996_v22 = vshrl.u32 %v14547_v31, 16  ;;  %v4674_v30 = vpop.permute.xlu1 %4673 }
 0x5ea   : > { %v14561_v48 = vpack.c.bf16 %v4906_v63, %v4905_v10  ;;  %v4467_v43 = vadd.f32 %v14521_v49, %v4405_v9  ;;  %v4406_v52 = vmul.f32 %v11068_v1, %v14510_v34 }
 0x5eb   : > { %v4998_v26 = vor.u32 %v4996_v22, %v4994_v46 }
 0x5ec   : > { %v4522_v57 = vmax.f32 %v4467_v43, 0.0  ;;  %v4468_v5 = vadd.f32 %v14521_v49, %v4406_v52  ;;  %v5000_v59 = vshll.u32 %v14561_v48, 16  ;;  %v5004_v15 = vshrl.u32 %v14561_v48, 16 }
 0x5ed   : > { %v4141_v7 = vpop.f32.mrb[16].mxu0 }
 0x5ee   : > { %v4907_v18 = vmul.f32 %v4659_v0, %v4522_v57  ;;  %v4523_v29 = vmax.f32 %v4468_v5, 0.0  ;;  %v11069_v39 = vadd.f32 %v4141_v7, %v13973_v40  ;;  %v10511_v44 = vpop.f32.mrb[17].mxu0  ;;  %v5002_v61 = vrot.slane %v5000_v59, 1 }
 0x5ef   : > { %v4144_v12 = vpop.f32.mrb[18].mxu0 }
 0x5f0   : > { %v14571_v41 = vpack.c.bf16 %v4907_v18, %v4906_v63  ;;  %v4908_v24 = vmul.f32 %v4664_v3, %v4523_v29  ;;  %v4407_v13 = vmul.f32 %v11069_v39, %v14510_v34  ;;  %v11070_v23 = vadd.f32 %v4144_v12, %v13977_v27  ;;  %v10512_v62 = vpop.f32.mrb[19].mxu0  ;;  %v4669_v27 = vpop.permute.xlu0 %4668 }
 0x5f1   : > { %v5003_v4 = vsel %vm404_vm4, %v4998_v26, %v5002_v61  ;;  %v5006_v46 = vor.u32 %v5004_v15, %v5002_v61 }
 0x5f2   : > { %v14576_v11 = vpack.c.bf16 %v4908_v24, %v4907_v18  ;;  %v4469_v40 = vadd.f32 %v14521_v49, %v4407_v13  ;;  %v4408_v45 = vmul.f32 %v11070_v23, %v14510_v34  ;;  %10612 = vmatmul.mubr.msk.bf16.vlgmr.msra.gmra.mrb[124].mxu1 %vm636_vm3, %v5003_v4  ;;  %v4684_v23 = vpop.permute.xlu1 %4683 }
 0x5f3   : > { %10660 = vmatpush3.bf16.msra.mxu1 %v5513_v55 }
 0x5f4   : > { %v4524_v10 = vmax.f32 %v4469_v40, 0.0  ;;  %v4470_v28 = vadd.f32 %v14521_v49, %v4408_v45  ;;  %v5008_v19 = vshll.u32 %v14576_v11, 16  ;;  %v5012_v18 = vshrl.u32 %v14576_v11, 16  ;;  %v4679_v44 = vpop.permute.xlu0 %4678 }
 0x5f5   : > { %v4149_v54 = vpop.f32.mrb[20].mxu0 }
 0x5f6   : > { %v4909_v20 = vmul.f32 %v4669_v27, %v4524_v10  ;;  %v4525_v2 = vmax.f32 %v4470_v28, 0.0  ;;  %v11071_v63 = vadd.f32 %v4149_v54, %v13981_v36  ;;  %v10515_v9 = vpop.f32.mrb[21].mxu0  ;;  %v5010_v1 = vrot.slane %v5008_v19, 1 }
 0x5f7   : > { %v4152_v21 = vpop.f32.mrb[22].mxu0 }
 0x5f8   : > { %v4910_v43 = vmul.f32 %v4674_v30, %v4525_v2  ;;  %v4409_v52 = vmul.f32 %v11071_v63, %v14510_v34  ;;  %v11072_v57 = vadd.f32 %v4152_v21, %v13989_v53  ;;  %v10516_v5 = vpop.f32.mrb[23].mxu0  ;;  %v5011_v59 = vsel %vm404_vm4, %v5006_v46, %v5010_v1  ;;  %v4689_v2 = vpop.permute.xlu0 %4688 }
 0x5f9   : > { %10615 = vmatprep.mubr.msk.bf16.mxu1 %vm636_vm3, %v5011_v59  ;;  %v14589_v0 = vpack.c.bf16 %v4909_v20, %v4908_v24  ;;  %v5014_v3 = vor.u32 %v5012_v18, %v5010_v1 }
 0x5fa   : > { %v14591_v22 = vpack.c.bf16 %v4910_v43, %v4909_v20  ;;  %v4471_v36 = vadd.f32 %v14521_v49, %v4409_v52  ;;  %v4410_v7 = vmul.f32 %v11072_v57, %v14510_v34  ;;  %v4694_v57 = vpop.permute.xlu1 %4693 }
 0x5fc   : > { %v4526_v29 = vmax.f32 %v4471_v36, 0.0  ;;  %v4472_v39 = vadd.f32 %v14521_v49, %v4410_v7  ;;  %v5016_v53 = vshll.u32 %v14591_v22, 16  ;;  %v5020_v54 = vshrl.u32 %v14591_v22, 16 }
 0x5fd   : > { %v4157_v61 = vpop.f32.mrb[24].mxu0 }
 0x5fe   : > { %v4911_v26 = vmul.f32 %v4679_v44, %v4526_v29  ;;  %v4527_v12 = vmax.f32 %v4472_v39, 0.0  ;;  %v11073_v55 = vadd.f32 %v4157_v61, %v13994_v25  ;;  %v10519_v24 = vpop.f32.mrb[25].mxu0  ;;  %v5018_v13 = vrot.slane %v5016_v53, 1 }
 0x5ff   : > { %v4160_v62 = vpop.f32.mrb[26].mxu0 }
 0x600   : > { %v4912_v4 = vmul.f32 %v4684_v23, %v4527_v12  ;;  %v4411_v40 = vmul.f32 %v11073_v55, %v14510_v34  ;;  %v11074_v45 = vadd.f32 %v4160_v62, %v14001_v16  ;;  %v10520_v15 = vpop.f32.mrb[27].mxu0  ;;  %v14602_v10 = vsel %vm404_vm4, %v5014_v3, %v5018_v13  ;;  %v4699_v12 = vpop.permute.xlu0 %4698 }
 0x601   : > { %16094 = vst [vmem:[#allocation43_spill] sm:$0xff] %v14602_v10  ;;  %10616 = vmatmul.mubr.msk.bf16.gmra.mrb[128].mxu1 %vm636_vm3, %v14602_v10  ;;  %v14606_v28 = vpack.c.bf16 %v4911_v26, %v4910_v43  ;;  %v5022_v9 = vor.u32 %v5020_v54, %v5018_v13  ;;  %v16129_v10 = vld [vmem:[#allocation15_spill] sm:$0xff] }
 0x602   : > { %v14608_v19 = vpack.c.bf16 %v4912_v4, %v4911_v26  ;;  %v4473_v25 = vadd.f32 %v14521_v49, %v4411_v40  ;;  %v4412_v27 = vmul.f32 %v11074_v45, %v14510_v34  ;;  %v4704_v45 = vpop.permute.xlu1 %4703 }
 0x604   : > { %v4528_v46 = vmax.f32 %v4473_v25, 0.0  ;;  %v4474_v16 = vadd.f32 %v14521_v49, %v4412_v27  ;;  %v5024_v20 = vshll.u32 %v14608_v19, 16  ;;  %v5028_v61 = vshrl.u32 %v14608_v19, 16 }
 0x605   : > { %v4165_v63 = vpop.f32.mrb[28].mxu0 }
 0x606   : > { %v4913_v1 = vmul.f32 %v4689_v2, %v4528_v46  ;;  %v4529_v30 = vmax.f32 %v4474_v16, 0.0  ;;  %v11075_v21 = vadd.f32 %v4165_v63, %v14008_v17  ;;  %v10523_v43 = vpop.f32.mrb[29].mxu0  ;;  %v5026_v52 = vrot.slane %v5024_v20, 1 }
 0x607   : > { %v4168_v5 = vpop.f32.mrb[30].mxu0 }
 0x608   : > { %v4914_v59 = vmul.f32 %v4694_v57, %v4529_v30  ;;  %v4413_v36 = vmul.f32 %v11075_v21, %v14510_v34  ;;  %v11076_v7 = vadd.f32 %v4168_v5, %v14013_v38  ;;  %v10524_v18 = vpop.f32.mrb[31].mxu0  ;;  %v14619_v29 = vsel %vm404_vm4, %v5022_v9, %v5026_v52  ;;  %v4709_v21 = vpop.permute.xlu0 %4708 }
 0x609   : > { %16095 = vst [vmem:[#allocation44_spill] sm:$0xff] %v14619_v29  ;;  %10619 = vmatprep.mubr.msk.bf16.mxu1 %vm636_vm3, %v14619_v29  ;;  %v14623_v39 = vpack.c.bf16 %v4913_v1, %v4912_v4  ;;  %v5030_v24 = vor.u32 %v5028_v61, %v5026_v52  ;;  %v4714_v18 = vpop.permute.xlu1 %4713 }
 0x60a   : > { %v14625_v53 = vpack.c.bf16 %v4914_v59, %v4913_v1  ;;  %v4475_v17 = vadd.f32 %v14521_v49, %v4413_v36  ;;  %v4414_v44 = vmul.f32 %v11076_v7, %v14510_v34 }
 0x60c   : > { %v4530_v3 = vmax.f32 %v4475_v17, 0.0  ;;  %v4476_v38 = vadd.f32 %v14521_v49, %v4414_v44  ;;  %v5032_v26 = vshll.u32 %v14625_v53, 16  ;;  %v5036_v9 = vshrl.u32 %v14625_v53, 16 }
 0x60d   : > { %v4173_v55 = vpop.f32.mrb[32].mxu0 }
 0x60e   : > { %v4915_v13 = vmul.f32 %v4699_v12, %v4530_v3  ;;  %v4531_v23 = vmax.f32 %v4476_v38, 0.0  ;;  %v11077_v62 = vadd.f32 %v4173_v55, %v14017_v35  ;;  %v10527_v4 = vpop.f32.mrb[33].mxu0  ;;  %v5034_v40 = vrot.slane %v5032_v26, 1 }
 0x60f   : > { %v4176_v15 = vpop.f32.mrb[34].mxu0  ;;  %v4719_v4 = vpop.permute.xlu0 %4718 }
 0x610   : > { %v4916_v25 = vmul.f32 %v4704_v45, %v4531_v23  ;;  %v4415_v27 = vmul.f32 %v11077_v62, %v14510_v34  ;;  %v11078_v54 = vadd.f32 %v4176_v15, %v14025_v32  ;;  %v10528_v46 = vpop.f32.mrb[35].mxu0  ;;  %v14636_v16 = vsel %vm404_vm4, %v5030_v24, %v5034_v40 }
 0x611   : > { %16096 = vst [vmem:[#allocation45_spill] sm:$0xff] %v14636_v16  ;;  %10620 = vmatmul.mubr.msk.bf16.gmra.mrb[132].mxu1 %vm636_vm3, %v14636_v16  ;;  %v14640_v20 = vpack.c.bf16 %v4915_v13, %v4914_v59  ;;  %v5038_v52 = vor.u32 %v5036_v9, %v5034_v40  ;;  %v16125_v16 = vld [vmem:[#allocation33_spill] sm:$0xff] }
 0x612   : > { %v14642_v2 = vpack.c.bf16 %v4916_v25, %v4915_v13  ;;  %v4477_v35 = vadd.f32 %v14521_v49, %v4415_v27  ;;  %v4416_v63 = vmul.f32 %v11078_v54, %v14510_v34 }
 0x614   : > { %v4532_v1 = vmax.f32 %v4477_v35, 0.0  ;;  %v4478_v32 = vadd.f32 %v14521_v49, %v4416_v63  ;;  %v5040_v30 = vshll.u32 %v14642_v2, 16  ;;  %v5044_v13 = vshrl.u32 %v14642_v2, 16  ;;  %v4724_v35 = vpop.permute.xlu1 %4723 }
 0x615   : > { %v4181_v43 = vpop.f32.mrb[36].mxu0 }
 0x616   : > { %v4917_v57 = vmul.f32 %v4709_v21, %v4532_v1  ;;  %v4533_v5 = vmax.f32 %v4478_v32, 0.0  ;;  %v11079_v59 = vadd.f32 %v4181_v43, %v14029_v37  ;;  %v10531_v36 = vpop.f32.mrb[37].mxu0  ;;  %v5042_v7 = vrot.slane %v5040_v30, 1 }
 0x617   : > { %v4184_v17 = vpop.f32.mrb[38].mxu0 }
 0x618   : > { %v4918_v44 = vmul.f32 %v4714_v18, %v4533_v5  ;;  %v4417_v61 = vmul.f32 %v11079_v59, %v14510_v34  ;;  %v11080_v3 = vadd.f32 %v4184_v17, %v14033_v14  ;;  %v10532_v38 = vpop.f32.mrb[39].mxu0  ;;  %v14653_v26 = vsel %vm404_vm4, %v5038_v52, %v5042_v7 }
 0x619   : > { %16097 = vst [vmem:[#allocation46_spill] sm:$0xff] %v14653_v26  ;;  %10623 = vmatprep.mubr.msk.bf16.mxu1 %vm636_vm3, %v14653_v26  ;;  %v14657_v12 = vpack.c.bf16 %v4917_v57, %v4916_v25  ;;  %v5046_v45 = vor.u32 %v5044_v13, %v5042_v7  ;;  %v4729_v7 = vpop.permute.xlu0 %4728 }
 0x61a   : > { %v14659_v55 = vpack.c.bf16 %v4918_v44, %v4917_v57  ;;  %v4479_v37 = vadd.f32 %v14521_v49, %v4417_v61  ;;  %v4418_v24 = vmul.f32 %v11080_v3, %v14510_v34 }
 0x61c   : > { %v4534_v23 = vmax.f32 %v4479_v37, 0.0  ;;  %v4480_v14 = vadd.f32 %v14521_v49, %v4418_v24  ;;  %v5048_v62 = vshll.u32 %v14659_v55, 16  ;;  %v5052_v5 = vshrl.u32 %v14659_v55, 16  ;;  %v4734_v24 = vpop.permute.xlu1 %4733 }
 0x61d   : > { %v4189_v40 = vpop.f32.mrb[40].mxu0 }
 0x61e   : > { %v4919_v15 = vmul.f32 %v4719_v4, %v4534_v23  ;;  %v4535_v27 = vmax.f32 %v4480_v14, 0.0  ;;  %v11081_v25 = vadd.f32 %v4189_v40, %v14037_v60  ;;  %v10535_v54 = vpop.f32.mrb[41].mxu0  ;;  %v5050_v46 = vrot.slane %v5048_v62, 1 }
 0x61f   : > { %v4192_v63 = vpop.f32.mrb[42].mxu0 }
 0x620   : > { %v4920_v9 = vmul.f32 %v4724_v35, %v4535_v27  ;;  %v4419_v1 = vmul.f32 %v11081_v25, %v14510_v34  ;;  %v11082_v32 = vadd.f32 %v4192_v63, %v14041_v56  ;;  %v10536_v30 = vpop.f32.mrb[43].mxu0  ;;  %v14670_v21 = vsel %vm404_vm4, %v5046_v45, %v5050_v46  ;;  %v4739_v35 = vpop.permute.xlu0 %4738 }
 0x621   : > { %16098 = vst [vmem:[#allocation47_spill] sm:$0xff] %v14670_v21  ;;  %10624 = vmatmul.mubr.msk.bf16.gmra.mrb[136].mxu1 %vm636_vm3, %v14670_v21  ;;  %v14674_v43 = vpack.c.bf16 %v4919_v15, %v4918_v44  ;;  %v5054_v17 = vor.u32 %v5052_v5, %v5050_v46  ;;  %v4744_v5 = vpop.permute.xlu1 %4743  ;;  %v16121_v21 = vld [vmem:[#allocation17_spill] sm:$0xff] }
 0x622   : > { %v14676_v52 = vpack.c.bf16 %v4920_v9, %v4919_v15  ;;  %v4481_v60 = vadd.f32 %v14521_v49, %v4419_v1  ;;  %v4420_v57 = vmul.f32 %v11082_v32, %v14510_v34 }
 0x624   : > { %v4536_v59 = vmax.f32 %v4481_v60, 0.0  ;;  %v4482_v56 = vadd.f32 %v14521_v49, %v4420_v57  ;;  %v5056_v36 = vshll.u32 %v14676_v52, 16  ;;  %v5060_v25 = vshrl.u32 %v14676_v52, 16 }
 0x625   : > { %v4197_v18 = vpop.f32.mrb[44].mxu0 }
 0x626   : > { %v4921_v61 = vmul.f32 %v4729_v7, %v4536_v59  ;;  %v4537_v3 = vmax.f32 %v4482_v56, 0.0  ;;  %v11083_v44 = vadd.f32 %v4197_v18, %v14047_v8  ;;  %v10539_v38 = vpop.f32.mrb[45].mxu0  ;;  %v5058_v37 = vrot.slane %v5056_v36, 1 }
 0x627   : > { %v4200_v13 = vpop.f32.mrb[46].mxu0 }
 0x628   : > { %v4922_v23 = vmul.f32 %v4734_v24, %v4537_v3  ;;  %v4421_v14 = vmul.f32 %v11083_v44, %v14510_v34  ;;  %v11084_v62 = vadd.f32 %v4200_v13, %v14051_v6  ;;  %v10540_v4 = vpop.f32.mrb[47].mxu0  ;;  %v14687_v40 = vsel %vm404_vm4, %v5054_v17, %v5058_v37 }
 0x629   : > { %16099 = vst [vmem:[#allocation48_spill] sm:$0xff] %v14687_v40  ;;  %10627 = vmatprep.mubr.msk.bf16.mxu1 %vm636_vm3, %v14687_v40  ;;  %v14691_v45 = vpack.c.bf16 %v4921_v61, %v4920_v9  ;;  %v5062_v1 = vor.u32 %v5060_v25, %v5058_v37 }
 0x62a   : > { %v14693_v15 = vpack.c.bf16 %v4922_v23, %v4921_v61  ;;  %v4483_v8 = vadd.f32 %v14521_v49, %v4421_v14  ;;  %v4422_v27 = vmul.f32 %v11084_v62, %v14510_v34  ;;  %v14709_v61 = vld [vmem:[%s15822_s2 + $0x4] sm:$0x3]  ;;  %v4749_v14 = vpop.permute.xlu0 %4748 }
 0x62b   : > { %12286 = vmatprep.subr.msk.bf16.mxu1 %vm724_vm0, %v14709_v61 }
 0x62c   : > { %v4538_v54 = vmax.f32 %v4483_v8, 0.0  ;;  %v4484_v6 = vadd.f32 %v14521_v49, %v4422_v27  ;;  %v5064_v46 = vshll.u32 %v14693_v15, 16  ;;  %v5068_v38 = vshrl.u32 %v14693_v15, 16 }
 0x62d   : > { %v4205_v63 = vpop.f32.mrb[48].mxu0 }
 0x62e   : > { %v4923_v32 = vmul.f32 %v4739_v35, %v4538_v54  ;;  %v4539_v30 = vmax.f32 %v4484_v6, 0.0  ;;  %v11085_v9 = vadd.f32 %v4205_v63, %v14055_v47  ;;  %v10543_v60 = vpop.f32.mrb[49].mxu0  ;;  %v5066_v57 = vrot.slane %v5064_v46, 1  ;;  %v4754_v6 = vpop.permute.xlu1 %4753 }
 0x62f   : > { %v4208_v59 = vpop.f32.mrb[50].mxu0 }
 0x630   : > { %v4924_v56 = vmul.f32 %v4744_v5, %v4539_v30  ;;  %v4423_v36 = vmul.f32 %v11085_v9, %v14510_v34  ;;  %v11086_v7 = vadd.f32 %v4208_v59, %v14059_v33  ;;  %v10544_v18 = vpop.f32.mrb[51].mxu0  ;;  %v14704_v17 = vsel %vm404_vm4, %v5062_v1, %v5066_v57  ;;  %v16101_v1 = vld [vmem:[#allocation22_spill] sm:$0xff] }
 0x631   : > { %16100 = vst [vmem:[#allocation49_spill] sm:$0xff] %v14704_v17  ;;  %10628 = vmatmul.mubr.msk.bf16.gmra.mrb[140].mxu1 %vm636_vm3, %v14704_v17  ;;  %v14715_v47 = vpack.c.bf16 %v4923_v32, %v4922_v23  ;;  %v5070_v4 = vor.u32 %v5068_v38, %v5066_v57  ;;  %v16117_v17 = vld [vmem:[#allocation30_spill] sm:$0xff] }
 0x632   : > { %v14717_v3 = vpack.c.bf16 %v4924_v56, %v4923_v32  ;;  %v4485_v33 = vadd.f32 %v14521_v49, %v4423_v36  ;;  %v4424_v44 = vmul.f32 %v11086_v7, %v14510_v34 }
 0x634   : > { %v4540_v37 = vmax.f32 %v4485_v33, 0.0  ;;  %v4486_v24 = vadd.f32 %v14521_v49, %v4424_v44  ;;  %v5072_v13 = vshll.u32 %v14717_v3, 16  ;;  %v5076_v59 = vshrl.u32 %v14717_v3, 16  ;;  %v4759_v33 = vpop.permute.xlu0 %4758 }
 0x635   : > { %v4213_v62 = vpop.f32.mrb[52].mxu0 }
 0x636   : > { %v4925_v8 = vmul.f32 %v4749_v14, %v4540_v37  ;;  %v4541_v27 = vmax.f32 %v4486_v24, 0.0  ;;  %v11087_v23 = vadd.f32 %v4213_v62, %v14063_v51  ;;  %v10547_v25 = vpop.f32.mrb[53].mxu0  ;;  %v5074_v54 = vrot.slane %v5072_v13, 1 }
 0x637   : > { %v4216_v46 = vpop.f32.mrb[54].mxu0  ;;  %v16104_v25 = vld [vmem:[#allocation24_spill] sm:$0xff] }
 0x638   : > { %v4926_v35 = vmul.f32 %v4754_v6, %v4541_v27  ;;  %v4425_v63 = vmul.f32 %v11087_v23, %v14510_v34  ;;  %v11088_v32 = vadd.f32 %v4216_v46, %v16101_v1  ;;  %v10548_v30 = vpop.f32.mrb[55].mxu0  ;;  %v14728_v9 = vsel %vm404_vm4, %v5070_v4, %v5074_v54  ;;  %v4764_v4 = vpop.permute.xlu1 %4763 }
 0x639   : > { %16102 = vst [vmem:[#allocation50_spill] sm:$0xff] %v14728_v9  ;;  %10631 = vmatprep.mubr.msk.bf16.mxu1 %vm636_vm3, %v14728_v9  ;;  %v14732_v60 = vpack.c.bf16 %v4925_v8, %v4924_v56  ;;  %v5078_v38 = vor.u32 %v5076_v59, %v5074_v54  ;;  %v16103_v56 = vld [vmem:[#allocation23_spill] sm:$0xff] }
 0x63a   : > { %v14734_v57 = vpack.c.bf16 %v4926_v35, %v4925_v8  ;;  %v4487_v51 = vadd.f32 %v14521_v49, %v4425_v63  ;;  %v4426_v5 = vmul.f32 %v11088_v32, %v14510_v34 }
 0x63c   : > { %v4542_v36 = vmax.f32 %v4487_v51, 0.0  ;;  %v4488_v7 = vadd.f32 %v14521_v49, %v4426_v5  ;;  %v5080_v18 = vshll.u32 %v14734_v57, 16  ;;  %v5084_v51 = vshrl.u32 %v14734_v57, 16 }
 0x63d   : > { %v4221_v44 = vpop.f32.mrb[56].mxu0 }
 0x63e   : > { %v4927_v37 = vmul.f32 %v4759_v33, %v4542_v36  ;;  %v4543_v24 = vmax.f32 %v4488_v7, 0.0  ;;  %v11089_v13 = vadd.f32 %v4221_v44, %v16103_v56  ;;  %v10551_v14 = vpop.f32.mrb[57].mxu0  ;;  %v5082_v62 = vrot.slane %v5080_v18, 1  ;;  %v4769_v7 = vpop.permute.xlu0 %4768 }
 0x63f   : > { %v4224_v8 = vpop.f32.mrb[58].mxu0 }
 0x640   : > { %v4928_v27 = vmul.f32 %v4764_v4, %v4543_v24  ;;  %v4427_v23 = vmul.f32 %v11089_v13, %v14510_v34  ;;  %v11090_v6 = vadd.f32 %v4224_v8, %v16104_v25  ;;  %v10552_v46 = vpop.f32.mrb[59].mxu0  ;;  %v14745_v63 = vsel %vm404_vm4, %v5078_v38, %v5082_v62  ;;  %v4774_v13 = vpop.permute.xlu1 %4773 }
 0x641   : > { %16105 = vst [vmem:[#allocation51_spill] sm:$0xff] %v14745_v63  ;;  %10632 = vmatmul.mubr.msk.bf16.gmra.mrb[144].mxu1 %vm636_vm3, %v14745_v63  ;;  %v14749_v54 = vpack.c.bf16 %v4927_v37, %v4926_v35  ;;  %v5086_v33 = vor.u32 %v5084_v51, %v5082_v62  ;;  %v16106_v35 = vld [vmem:[#allocation25_spill] sm:$0xff] }
 0x642   : > { %v14751_v1 = vpack.c.bf16 %v4928_v27, %v4927_v37  ;;  %v4489_v32 = vadd.f32 %v14521_v49, %v4427_v23  ;;  %v4428_v30 = vmul.f32 %v11090_v6, %v14510_v34  ;;  %v16107_v23 = vld [vmem:[#allocation26_spill] sm:$0xff]  ;;  %v16113_v63 = vld [vmem:[#allocation29_spill] sm:$0xff] }
 0x644   : > { %v4544_v5 = vmax.f32 %v4489_v32, 0.0  ;;  %v4490_v59 = vadd.f32 %v14521_v49, %v4428_v30  ;;  %v5088_v36 = vshll.u32 %v14751_v1, 16 }
 0x645   : > { %v4229_v18 = vpop.f32.mrb[60].mxu0 }
 0x646   : > { %v4929_v44 = vmul.f32 %v4769_v7, %v4544_v5  ;;  %v4545_v38 = vmax.f32 %v4490_v59, 0.0  ;;  %v11091_v24 = vadd.f32 %v4229_v18, %v16106_v35  ;;  %v10555_v37 = vpop.f32.mrb[61].mxu0  ;;  %v5090_v56 = vrot.slane %v5088_v36, 1  ;;  %v4779_v18 = vpop.permute.xlu0 %4778 }
 0x647   : > { %v4232_v14 = vpop.f32.mrb[62].mxu0  ;;  %v5092_v5 = vshrl.u32 %v14751_v1, 16 }
 0x648   : > { %v4930_v4 = vmul.f32 %v4774_v13, %v4545_v38  ;;  %v4429_v8 = vmul.f32 %v11091_v24, %v14510_v34  ;;  %v11092_v25 = vadd.f32 %v4232_v14, %v16107_v23  ;;  %v10556_v6 = vpop.f32.mrb[63].mxu0  ;;  %v14762_v46 = vsel %vm404_vm4, %v5086_v33, %v5090_v56  ;;  %v4784_v14 = vpop.permute.xlu1 %4783 }
 0x649   : > { %16108 = vst [vmem:[#allocation52_spill] sm:$0xff] %v14762_v46  ;;  %10635 = vmatprep.mubr.msk.bf16.mxu1 %vm636_vm3, %v14762_v46  ;;  %v14766_v62 = vpack.c.bf16 %v4929_v44, %v4928_v27  ;;  %v5094_v38 = vor.u32 %v5092_v5, %v5090_v56  ;;  %v16109_v27 = vld [vmem:[#allocation27_spill] sm:$0xff]  ;;  %v16110_v6 = vld [vmem:[#allocation4_spill] sm:$0xff] }
 0x64a   : > { %v14768_v32 = vpack.c.bf16 %v4930_v4, %v4929_v44  ;;  %v4491_v30 = vadd.f32 %v14521_v49, %v4429_v8  ;;  %v4430_v51 = vmul.f32 %v11092_v25, %v14510_v34 }
 0x64c   : > { %v4546_v59 = vmax.f32 %v4491_v30, 0.0  ;;  %v4492_v36 = vadd.f32 %v14521_v49, %v4430_v51  ;;  %v5096_v7 = vshll.u32 %v14768_v32, 16 }
 0x64d   : > { %v4237_v33 = vpop.f32.mrb[64].mxu0 }
 0x64e   : > { %v4931_v35 = vmul.f32 %v4779_v18, %v4546_v59  ;;  %v4547_v24 = vmax.f32 %v4492_v36, 0.0  ;;  %v11093_v37 = vadd.f32 %v4237_v33, %v16109_v27  ;;  %v10559_v44 = vpop.f32.mrb[65].mxu0  ;;  %v5098_v13 = vrot.slane %v5096_v7, 1 }
 0x64f   : > { %v4240_v8 = vpop.f32.mrb[66].mxu0  ;;  %v5100_v7 = vshrl.u32 %v14768_v32, 16 }
 0x650   : > { %v4932_v23 = vmul.f32 %v4784_v14, %v4547_v24  ;;  %v4431_v25 = vmul.f32 %v11093_v37, %v14510_v34  ;;  %v11094_v30 = vadd.f32 %v4240_v8, %v16110_v6  ;;  %v10560_v46 = vpop.f32.mrb[67].mxu0  ;;  %v14779_v51 = vsel %vm404_vm4, %v5094_v38, %v5098_v13  ;;  %v4789_v38 = vpop.permute.xlu0 %4788 }
 0x651   : > { %16111 = vst [vmem:[#allocation18_spill] sm:$0xff] %v14779_v51  ;;  %10636 = vmatmul.mubr.msk.bf16.gmra.mrb[148].mxu1 %vm636_vm3, %v14779_v51  ;;  %v14783_v56 = vpack.c.bf16 %v4931_v35, %v4930_v4  ;;  %v5102_v27 = vor.u32 %v5100_v7, %v5098_v13  ;;  %v16112_v4 = vld [vmem:[#allocation28_spill] sm:$0xff]  ;;  %v4794_v6 = vpop.permute.xlu1 %4793 }
 0x652   : > { %v14785_v5 = vpack.c.bf16 %v4932_v23, %v4931_v35  ;;  %v4493_v59 = vadd.f32 %v14521_v49, %v4431_v25  ;;  %v4432_v36 = vmul.f32 %v11094_v30, %v14510_v34 }
 0x654   : > { %v4548_v18 = vmax.f32 %v4493_v59, 0.0  ;;  %v4494_v33 = vadd.f32 %v14521_v49, %v4432_v36  ;;  %v5104_v46 = vshll.u32 %v14785_v5, 16 }
 0x655   : > { %v4245_v24 = vpop.f32.mrb[68].mxu0 }
 0x656   : > { %v4933_v37 = vmul.f32 %v4789_v38, %v4548_v18  ;;  %v4549_v44 = vmax.f32 %v4494_v33, 0.0  ;;  %v11095_v14 = vadd.f32 %v4245_v24, %v16112_v4  ;;  %v10563_v35 = vpop.f32.mrb[69].mxu0  ;;  %v5106_v8 = vrot.slane %v5104_v46, 1  ;;  %v4799_v24 = vpop.permute.xlu0 %4798 }
 0x657   : > { %v4248_v25 = vpop.f32.mrb[70].mxu0  ;;  %v5108_v46 = vshrl.u32 %v14785_v5, 16 }
 0x658   : > { %v4934_v51 = vmul.f32 %v4794_v6, %v4549_v44  ;;  %v4433_v30 = vmul.f32 %v11095_v14, %v14510_v34  ;;  %v11096_v59 = vadd.f32 %v4248_v25, %v16113_v63  ;;  %v10564_v9 = vpop.f32.mrb[71].mxu0  ;;  %v14796_v36 = vsel %vm404_vm4, %v5102_v27, %v5106_v8  ;;  %v4804_v25 = vpop.permute.xlu1 %4803 }
 0x659   : > { %16114 = vst [vmem:[#allocation19_spill] sm:$0xff] %v14796_v36  ;;  %10639 = vmatprep.mubr.msk.bf16.mxu1 %vm636_vm3, %v14796_v36  ;;  %v14800_v13 = vpack.c.bf16 %v4933_v37, %v4932_v23  ;;  %v5110_v44 = vor.u32 %v5108_v46, %v5106_v8  ;;  %v16116_v23 = vld [vmem:[#allocation13_spill] sm:$0xff] }
 0x65a   : > { %v14802_v7 = vpack.c.bf16 %v4934_v51, %v4933_v37  ;;  %v4495_v18 = vadd.f32 %v14521_v49, %v4433_v30  ;;  %v4434_v33 = vmul.f32 %v11096_v59, %v14510_v34 }
 0x65b   : > { %16115 = vst [vmem:[#allocation20_spill] sm:$0xff] %v14800_v13 }
 0x65c   : > { %v4550_v38 = vmax.f32 %v4495_v18, 0.0  ;;  %v4496_v63 = vadd.f32 %v14521_v49, %v4434_v33  ;;  %v5112_v9 = vshll.u32 %v14802_v7, 16 }
 0x65d   : > { %v4253_v27 = vpop.f32.mrb[72].mxu0 }
 0x65e   : > { %v4935_v4 = vmul.f32 %v4799_v24, %v4550_v38  ;;  %v4551_v14 = vmax.f32 %v4496_v63, 0.0  ;;  %v11097_v35 = vadd.f32 %v4253_v27, %v16116_v23  ;;  %v10567_v37 = vpop.f32.mrb[73].mxu0  ;;  %v5114_v6 = vrot.slane %v5112_v9, 1  ;;  %v4809_v27 = vpop.permute.xlu0 %4808 }
 0x65f   : > { %v4256_v30 = vpop.f32.mrb[74].mxu0  ;;  %v5116_v9 = vshrl.u32 %v14802_v7, 16 }
 0x660   : > { %v4936_v36 = vmul.f32 %v4804_v25, %v4551_v14  ;;  %v4435_v59 = vmul.f32 %v11097_v35, %v14510_v34  ;;  %v11098_v18 = vadd.f32 %v4256_v30, %v16117_v17  ;;  %v10568_v40 = vpop.f32.mrb[75].mxu0  ;;  %v14813_v33 = vsel %vm404_vm4, %v5110_v44, %v5114_v6  ;;  %v4814_v30 = vpop.permute.xlu1 %4813 }
 0x661   : > { %16118 = vst [vmem:[#allocation21_spill] sm:$0xff] %v14813_v33  ;;  %10640 = vmatmul.mubr.msk.bf16.gmra.mrb[152].mxu1 %vm636_vm3, %v14813_v33  ;;  %v14817_v8 = vpack.c.bf16 %v4935_v4, %v4934_v51  ;;  %v5118_v14 = vor.u32 %v5116_v9, %v5114_v6  ;;  %v16120_v51 = vld [vmem:[#allocation31_spill] sm:$0xff] }
 0x662   : > { %v14819_v46 = vpack.c.bf16 %v4936_v36, %v4935_v4  ;;  %v4497_v38 = vadd.f32 %v14521_v49, %v4435_v59  ;;  %v4436_v63 = vmul.f32 %v11098_v18, %v14510_v34 }
 0x663   : > { %16119 = vst [vmem:[#allocation36_spill] sm:$0xff] %v14817_v8 }
 0x664   : > { %v4552_v24 = vmax.f32 %v4497_v38, 0.0  ;;  %v4498_v17 = vadd.f32 %v14521_v49, %v4436_v63  ;;  %v5120_v40 = vshll.u32 %v14819_v46, 16 }
 0x665   : > { %v4261_v44 = vpop.f32.mrb[76].mxu0 }
 0x666   : > { %v4937_v23 = vmul.f32 %v4809_v27, %v4552_v24  ;;  %v4553_v35 = vmax.f32 %v4498_v17, 0.0  ;;  %v11099_v37 = vadd.f32 %v4261_v44, %v16120_v51  ;;  %v10571_v4 = vpop.f32.mrb[77].mxu0  ;;  %v5122_v25 = vrot.slane %v5120_v40, 1  ;;  %v4819_v44 = vpop.permute.xlu0 %4818 }
 0x667   : > { %v4264_v59 = vpop.f32.mrb[78].mxu0  ;;  %v5124_v40 = vshrl.u32 %v14819_v46, 16 }
 0x668   : > { %v4938_v33 = vmul.f32 %v4814_v30, %v4553_v35  ;;  %v4437_v18 = vmul.f32 %v11099_v37, %v14510_v34  ;;  %v11100_v38 = vadd.f32 %v4264_v59, %v16121_v21  ;;  %v10572_v26 = vpop.f32.mrb[79].mxu0  ;;  %v14830_v63 = vsel %vm404_vm4, %v5118_v14, %v5122_v25  ;;  %v4824_v59 = vpop.permute.xlu1 %4823 }
 0x669   : > { %16122 = vst [vmem:[#allocation37_spill] sm:$0xff] %v14830_v63  ;;  %10643 = vmatprep.mubr.msk.bf16.mxu1 %vm636_vm3, %v14830_v63  ;;  %v14834_v6 = vpack.c.bf16 %v4937_v23, %v4936_v36  ;;  %v5126_v35 = vor.u32 %v5124_v40, %v5122_v25  ;;  %v16124_v36 = vld [vmem:[#allocation14_spill] sm:$0xff] }
 0x66a   : > { %v14836_v9 = vpack.c.bf16 %v4938_v33, %v4937_v23  ;;  %v4499_v24 = vadd.f32 %v14521_v49, %v4437_v18  ;;  %v4438_v17 = vmul.f32 %v11100_v38, %v14510_v34 }
 0x66b   : > { %16123 = vst [vmem:[#allocation5_spill] sm:$0xff] %v14834_v6 }
 0x66c   : > { %v4554_v27 = vmax.f32 %v4499_v24, 0.0  ;;  %v4500_v21 = vadd.f32 %v14521_v49, %v4438_v17  ;;  %v5128_v26 = vshll.u32 %v14836_v9, 16 }
 0x66d   : > { %v4269_v14 = vpop.f32.mrb[80].mxu0 }
 0x66e   : > { %v4939_v51 = vmul.f32 %v4819_v44, %v4554_v27  ;;  %v4555_v37 = vmax.f32 %v4500_v21, 0.0  ;;  %v11101_v4 = vadd.f32 %v4269_v14, %v16124_v36  ;;  %v10575_v23 = vpop.f32.mrb[81].mxu0  ;;  %v5130_v30 = vrot.slane %v5128_v26, 1  ;;  %v4829_v14 = vpop.permute.xlu0 %4828 }
 0x66f   : > { %v4272_v18 = vpop.f32.mrb[82].mxu0  ;;  %v5132_v26 = vshrl.u32 %v14836_v9, 16 }
 0x670   : > { %v4940_v63 = vmul.f32 %v4824_v59, %v4555_v37  ;;  %v4439_v38 = vmul.f32 %v11101_v4, %v14510_v34  ;;  %v11102_v24 = vadd.f32 %v4272_v18, %v16125_v16  ;;  %v10576_v29 = vpop.f32.mrb[83].mxu0  ;;  %v14847_v17 = vsel %vm404_vm4, %v5126_v35, %v5130_v30  ;;  %v4834_v18 = vpop.permute.xlu1 %4833 }
 0x671   : > { %16126 = vst [vmem:[#allocation6_spill] sm:$0xff] %v14847_v17  ;;  %10644 = vmatmul.mubr.msk.bf16.gmra.mrb[156].mxu1 %vm636_vm3, %v14847_v17  ;;  %v14851_v25 = vpack.c.bf16 %v4939_v51, %v4938_v33  ;;  %v5134_v37 = vor.u32 %v5132_v26, %v5130_v30  ;;  %v16128_v33 = vld [vmem:[#allocation35_spill] sm:$0xff] }
 0x672   : > { %v14853_v40 = vpack.c.bf16 %v4940_v63, %v4939_v51  ;;  %v4501_v27 = vadd.f32 %v14521_v49, %v4439_v38  ;;  %v4440_v21 = vmul.f32 %v11102_v24, %v14510_v34 }
 0x673   : > { %16127 = vst [vmem:[#allocation7_spill] sm:$0xff] %v14851_v25 }
 0x674   : > { %v4556_v44 = vmax.f32 %v4501_v27, 0.0  ;;  %v4502_v16 = vadd.f32 %v14521_v49, %v4440_v21  ;;  %v5136_v29 = vshll.u32 %v14853_v40, 16 }
 0x675   : > { %v4277_v35 = vpop.f32.mrb[84].mxu0 }
 0x676   : > { %v4941_v36 = vmul.f32 %v4829_v14, %v4556_v44  ;;  %v4557_v4 = vmax.f32 %v4502_v16, 0.0  ;;  %v11103_v23 = vadd.f32 %v4277_v35, %v16128_v33  ;;  %v10579_v51 = vpop.f32.mrb[85].mxu0  ;;  %v5138_v59 = vrot.slane %v5136_v29, 1  ;;  %v4839_v35 = vpop.permute.xlu0 %4838 }
 0x677   : > { %v4280_v38 = vpop.f32.mrb[86].mxu0  ;;  %v5140_v29 = vshrl.u32 %v14853_v40, 16 }
 0x678   : > { %v4942_v17 = vmul.f32 %v4834_v18, %v4557_v4  ;;  %v4441_v24 = vmul.f32 %v11103_v23, %v14510_v34  ;;  %v11104_v27 = vadd.f32 %v4280_v38, %v16129_v10  ;;  %v10580_v25 = vpop.f32.mrb[87].mxu0  ;;  %v14864_v21 = vsel %vm404_vm4, %v5134_v37, %v5138_v59  ;;  %v4844_v38 = vpop.permute.xlu1 %4843 }
 0x679   : > { %16130 = vst [vmem:[#allocation8_spill] sm:$0xff] %v14864_v21  ;;  %10647 = vmatprep.mubr.msk.bf16.mxu1 %vm636_vm3, %v14864_v21  ;;  %v14868_v30 = vpack.c.bf16 %v4941_v36, %v4940_v63  ;;  %v5142_v4 = vor.u32 %v5140_v29, %v5138_v59  ;;  %v16132_v63 = vld [vmem:[#allocation16_spill] sm:$0xff] }
 0x67a   : > { %v14870_v26 = vpack.c.bf16 %v4942_v17, %v4941_v36  ;;  %v4503_v44 = vadd.f32 %v14521_v49, %v4441_v24  ;;  %v4442_v16 = vmul.f32 %v11104_v27, %v14510_v34  ;;  %v14881_v34 = vld [vmem:[%s15823_s3] ss:$0 sm:$0xff] }
 0x67b   : > { %16131 = vst [vmem:[#allocation9_spill] sm:$0xff] %v14868_v30  ;;  %v16136_v30 = vld [vmem:[#allocation2_spill] sm:$0xff] }
 0x67c   : > { %v4558_v14 = vmax.f32 %v4503_v44, 0.0  ;;  %v4504_v10 = vadd.f32 %v14521_v49, %v4442_v16  ;;  %v5144_v25 = vshll.u32 %v14870_v26, 16 }
 0x67d   : > { %v4285_v37 = vpop.f32.mrb[88].mxu0 }
 0x67e   : > { %v4943_v33 = vmul.f32 %v4839_v35, %v4558_v14  ;;  %v4559_v23 = vmax.f32 %v4504_v10, 0.0  ;;  %v11105_v51 = vadd.f32 %v4285_v37, %v16132_v63  ;;  %v10583_v36 = vpop.f32.mrb[89].mxu0  ;;  %v5146_v18 = vrot.slane %v5144_v25, 1  ;;  %v14897_v14 = vld [vmem:[%s15824_s4] ss:$0 sm:$0xff] }
 0x67f   : > { %v4288_v24 = vpop.f32.mrb[90].mxu0  ;;  %v5148_v25 = vshrl.u32 %v14870_v26, 16  ;;  %v16135_v36 = vld [vmem:[#allocation3_spill] sm:$0xff] }
 0x680   : > { %v4944_v21 = vmul.f32 %v4844_v38, %v4559_v23  ;;  %v4443_v49 = vmul.f32 %v14881_v34, %v11105_v51  ;;  %v11106_v27 = vadd.f32 %v4288_v24, %v14139_v42  ;;  %v10584_v44 = vpop.f32.mrb[91].mxu0  ;;  %v14886_v59 = vsel %vm404_vm4, %v5142_v4, %v5146_v18 }
 0x681   : > { %16133 = vst [vmem:[#allocation10_spill] sm:$0xff] %v14886_v59  ;;  %10648 = vmatmul.mubr.msk.bf16.gmra.mrb[160].mxu1 %vm636_vm3, %v14886_v59  ;;  %v14890_v16 = vpack.c.bf16 %v4943_v33, %v4942_v17  ;;  %v4849_v17 = vpop.permute.xlu0 %4848  ;;  %v4854_v59 = vpop.permute.xlu1 %4853 }
 0x682   : > { %v14892_v29 = vpack.c.bf16 %v4944_v21, %v4943_v33  ;;  %v4505_v10 = vadd.f32 %v14897_v14, %v4443_v49  ;;  %v4444_v42 = vmul.f32 %v14881_v34, %v11106_v27  ;;  %v5150_v33 = vor.u32 %v5148_v25, %v5146_v18 }
 0x683   : > { %16134 = vst [vmem:[#allocation11_spill] sm:$0xff] %v14890_v16 }
 0x684   : > { %v4560_v35 = vmax.f32 %v4505_v10, 0.0  ;;  %v4506_v37 = vadd.f32 %v14897_v14, %v4444_v42  ;;  %v5152_v4 = vshll.u32 %v14892_v29, 16 }
 0x685   : > { %v4293_v23 = vpop.f32.mrb[92].mxu0 }
 0x686   : > { %v4945_v63 = vmul.f32 %v4849_v17, %v4560_v35  ;;  %v4561_v51 = vmax.f32 %v4506_v37, 0.0  ;;  %v11107_v38 = vadd.f32 %v4293_v23, %v16135_v36  ;;  %v10587_v24 = vpop.f32.mrb[93].mxu0  ;;  %v5154_v44 = vrot.slane %v5152_v4, 1  ;;  %v4859_v17 = vpop.permute.xlu0 %4858 }
 0x687   : > { %v4296_v49 = vpop.f32.mrb[94].mxu0 }
 0x688   : > { %v4946_v16 = vmul.f32 %v4854_v59, %v4561_v51  ;;  %v4445_v27 = vmul.f32 %v14881_v34, %v11107_v38  ;;  %v11108_v10 = vadd.f32 %v4296_v49, %v16136_v30  ;;  %v10588_v6 = vpop.f32.mrb[95].mxu0  ;;  %v14908_v42 = vsel %vm404_vm4, %v5150_v33, %v5154_v44  ;;  %v4864_v49 = vpop.permute.xlu1 %4863 }
 0x689   : > { %16137 = vst [vmem:[#allocation12_spill] sm:$0xff] %v14908_v42  ;;  %10651 = vmatprep.mubr.msk.bf16.mxu1 %vm636_vm3, %v14908_v42  ;;  %v14912_v18 = vpack.c.bf16 %v4945_v63, %v4944_v21  ;;  %v5156_v59 = vshrl.u32 %v14892_v29, 16  ;;  %v16139_v21 = vld [vmem:[#allocation32_spill] sm:$0xff] }
 0x68a   : > { %v14914_v25 = vpack.c.bf16 %v4946_v16, %v4945_v63  ;;  %v4507_v35 = vadd.f32 %v14897_v14, %v4445_v27  ;;  %v4446_v37 = vmul.f32 %v14881_v34, %v11108_v10 }
 0x68b   : > { %16138 = vst [vmem:[#allocation22_spill] sm:$0xff] %v14912_v18  ;;  %v5158_v33 = vor.u32 %v5156_v59, %v5154_v44  ;;  %v16140_v18 = vld [vmem:[#allocation34_spill] sm:$0xff] }
 0x68c   : > { %v4562_v4 = vmax.f32 %v4507_v35, 0.0  ;;  %v4508_v30 = vadd.f32 %v14897_v14, %v4446_v37  ;;  %v5160_v6 = vshll.u32 %v14914_v25, 16 }
 0x68d   : > { %v4301_v23 = vpop.f32.mrb[96].mxu0 }
 0x68e   : > { %v4947_v51 = vmul.f32 %v4859_v17, %v4562_v4  ;;  %v4563_v36 = vmax.f32 %v4508_v30, 0.0  ;;  %v11109_v38 = vadd.f32 %v4301_v23, %v16139_v21  ;;  %v10591_v63 = vpop.f32.mrb[97].mxu0  ;;  %v5162_v24 = vrot.slane %v5160_v6, 1  ;;  %v4869_v23 = vpop.permute.xlu0 %4868 }
 0x68f   : > { %v4304_v27 = vpop.f32.mrb[98].mxu0  ;;  %v5164_v6 = vshrl.u32 %v14914_v25, 16 }
 0x690   : > { %v4948_v42 = vmul.f32 %v4864_v49, %v4563_v36  ;;  %v4447_v10 = vmul.f32 %v14881_v34, %v11109_v38  ;;  %v11110_v35 = vadd.f32 %v4304_v27, %v16140_v18  ;;  %v10592_v8 = vpop.f32.mrb[99].mxu0  ;;  %v14925_v37 = vsel %vm404_vm4, %v5158_v33, %v5162_v24  ;;  %v4874_v27 = vpop.permute.xlu1 %4873 }
 0x691   : > { %16141 = vst [vmem:[#allocation23_spill] sm:$0xff] %v14925_v37  ;;  %10652 = vmatmul.mubr.msk.bf16.gmra.mrb[164].mxu1 %vm636_vm3, %v14925_v37  ;;  %v14929_v44 = vpack.c.bf16 %v4947_v51, %v4946_v16  ;;  %v5166_v36 = vor.u32 %v5164_v6, %v5162_v24  ;;  %v16143_v16 = vld [vmem:[#allocation38_spill] sm:$0xff] }
 0x692   : > { %v14931_v59 = vpack.c.bf16 %v4948_v42, %v4947_v51  ;;  %v4509_v4 = vadd.f32 %v14897_v14, %v4447_v10  ;;  %v4448_v30 = vmul.f32 %v14881_v34, %v11110_v35 }
 0x693   : > { %16142 = vst [vmem:[#allocation24_spill] sm:$0xff] %v14929_v44  ;;  %v16144_v44 = vld [vmem:[#allocation39_spill] sm:$0xff] }
 0x694   : > { %v4564_v17 = vmax.f32 %v4509_v4, 0.0  ;;  %v4510_v18 = vadd.f32 %v14897_v14, %v4448_v30  ;;  %v5168_v8 = vshll.u32 %v14931_v59, 16 }
 0x695   : > { %v4309_v33 = vpop.f32.mrb[100].mxu0 }
 0x696   : > { %v4949_v21 = vmul.f32 %v4869_v23, %v4564_v17  ;;  %v4565_v38 = vmax.f32 %v4510_v18, 0.0  ;;  %v11111_v63 = vadd.f32 %v4309_v33, %v16143_v16  ;;  %v10595_v51 = vpop.f32.mrb[101].mxu0  ;;  %v5170_v49 = vrot.slane %v5168_v8, 1 }
 0x697   : > { %v4312_v10 = vpop.f32.mrb[102].mxu0  ;;  %v5172_v23 = vshrl.u32 %v14931_v59, 16 }
 0x698   : > { %v4950_v37 = vmul.f32 %v4874_v27, %v4565_v38  ;;  %v4449_v35 = vmul.f32 %v14881_v34, %v11111_v63  ;;  %v11112_v4 = vadd.f32 %v4312_v10, %v16144_v44  ;;  %v10596_v13 = vpop.f32.mrb[103].mxu0  ;;  %v14942_v30 = vsel %vm404_vm4, %v5166_v36, %v5170_v49  ;;  %v4879_v36 = vpop.permute.xlu0 %4878  ;;  %v16149_v27 = vld [vmem:[#allocation40_spill] sm:$0xff] }
 0x699   : > { %16145 = vst [vmem:[#allocation25_spill] sm:$0xff] %v14942_v30  ;;  %10655 = vmatprep.mubr.msk.bf16.mxu1 %vm636_vm3, %v14942_v30  ;;  %v14946_v24 = vpack.c.bf16 %v4949_v21, %v4949_v21  ;;  %v14948_v6 = vpack.c.bf16 %v4949_v21, %v4948_v42  ;;  %v14957_v16 = vor.u32 %v5172_v23, %v5170_v49 }
 0x69a   : > { %v4511_v17 = vadd.f32 %v14897_v14, %v4449_v35  ;;  %v4450_v18 = vmul.f32 %v14881_v34, %v11112_v4  ;;  %v14952_v8 = vpack.c.bf16 %v4950_v37, %v4949_v21  ;;  %v4884_v4 = vpop.permute.xlu1 %4883 }
 0x69b   : > { %16146 = vst [vmem:[#allocation26_spill] sm:$0xff] %v14948_v6  ;;  %v5176_v13 = vshll.u32 %v14946_v24, 16  ;;  %16148 = vst [vmem:[#allocation4_spill] sm:$0xff] %v14957_v16 }
 0x69c   : > { %16147 = vst [vmem:[#allocation27_spill] sm:$0xff] %v14952_v8  ;;  %v4566_v44 = vmax.f32 %v4511_v17, 0.0  ;;  %v4512_v33 = vadd.f32 %v14897_v14, %v4450_v18  ;;  %v16150_v18 = vld [vmem:[#allocation41_spill] sm:$0xff] }
 0x69d   : > { %v4317_v38 = vpop.f32.mrb[104].mxu0  ;;  %v5178_v63 = vrot.slane %v5176_v13, 1 }
 0x69e   : > { %v4951_v42 = vmul.f32 %v4879_v36, %v4566_v44  ;;  %v4567_v51 = vmax.f32 %v4512_v33, 0.0  ;;  %v11113_v10 = vadd.f32 %v4317_v38, %v16149_v27  ;;  %v10599_v35 = vpop.f32.mrb[105].mxu0 }
 0x69f   : > { %v4320_v21 = vpop.f32.mrb[106].mxu0  ;;  %v5179_v30 = vsel %vm404_vm4, %v14957_v16, %v5178_v63  ;;  %v5873_v35 = vsel %vm724_vm0, %v14709_v61, 0 }
 0x6a0   : > { %v14962_v8 = vmul.f32 %v4884_v4, %v4567_v51  ;;  %v4451_v17 = vmul.f32 %v14881_v34, %v11113_v10  ;;  %v11114_v6 = vadd.f32 %v4320_v21, %v16150_v18  ;;  %10656 = vmatmul.mubr.msk.bf16.gmra.mrb[168].mxu1 %vm636_vm3, %v5179_v30  ;;  %v10600_v49 = vpop.f32.mrb[107].mxu0  ;;  %v14967_v23 = vpack.c.bf16 %v4951_v42, %v4950_v37  ;;  %v4889_v51 = vpop.permute.xlu0 %4888  ;;  %v16151_v30 = vld [vmem:[#allocation42_spill] sm:$0xff] }
 0x6a1   : > { %10661 = vmatprep.mubr.msk.bf16.mxu1 %vm636_vm3, %v14537_v58  ;;  %v4894_v4 = vpop.permute.xlu1 %4893 }
 0x6a2   : > { %v4513_v13 = vadd.f32 %v14897_v14, %v4451_v17  ;;  %v4452_v44 = vmul.f32 %v14881_v34, %v11114_v6  ;;  %v14974_v33 = vpack.c.bf16 %v14962_v8, %v4951_v42  ;;  %v8897_v34 = vld [vmem:[%s15822_s2 + $0x6] sm:$0x3] }
 0x6a4   : > { %v4568_v36 = vmax.f32 %v4513_v13, 0.0  ;;  %v4514_v38 = vadd.f32 %v14897_v14, %v4452_v44  ;;  %v5752_v44 = vrot.slane %v14547_v31, 1 }
 0x6a5   : > { %v4325_v63 = vpop.f32.mrb[108].mxu0 }
 0x6a6   : > { %v4569_v27 = vmax.f32 %v4514_v38, 0.0  ;;  %v14978_v10 = vadd.f32 %v4325_v63, %v16151_v30  ;;  %v10603_v37 = vpop.f32.mrb[109].mxu0  ;;  %v4953_v6 = vmul.f32 %v4889_v51, %v4568_v36  ;;  %v5751_v36 = vrot.slane %v14537_v58, 1 }
 0x6a7   : > { %v4328_v21 = vpop.f32.mrb[110].mxu0  ;;  %v5754_v63 = vrot.slane %v14561_v48, 1  ;;  %v5756_v51 = vrot.slane %v14576_v11, 1  ;;  %v5760_v37 = vrot.slane %v14608_v19, 1 }
 0x6a8   : > { %16152 = vst [vmem:[#allocation28_spill] sm:$0xff] %v14978_v10  ;;  %v4954_v42 = vmul.f32 %v4894_v4, %v4569_v27  ;;  %10662 = vmatmul.mubr.msk.bf16.vlgmr.msra.gmra.mrb[124].mxu1 %vm636_vm3, %v14547_v31  ;;  %v10604_v14 = vpop.f32.mrb[111].mxu0  ;;  %v5753_v38 = vsel %vm1345_vm2, %v5751_v36, %v5752_v44  ;;  %v6215_v27 = vsel %vm724_vm0, %v8897_v34, 0  ;;  %v15045_v31 = vld [vmem:[%s15822_s2 + $0x8] sm:$0x3]  ;;  %v5762_v21 = vrot.slane %v14625_v53, 1 }
 0x6a9   : > { %10710 = vmatpush3.bf16.msra.mxu1 %v5873_v35  ;;  %10665 = vmatprep.mubr.msk.bf16.mxu1 %vm636_vm3, %v14561_v48  ;;  %v5755_v30 = vsel %vm1345_vm2, %v5752_v44, %v5754_v63  ;;  %v5757_v58 = vsel %vm1345_vm2, %v5754_v63, %v5756_v51  ;;  %v5758_v48 = vrot.slane %v14591_v22, 1  ;;  %v5766_v14 = vrot.slane %v14659_v55, 1 }
 0x6aa   : > { %12287 = vmatprep.subr.msk.bf16.mxu1 %vm724_vm0, %v8897_v34  ;;  %v14990_v17 = vpack.c.bf16 %v4954_v42, %v4953_v6  ;;  %v5764_v34 = vrot.slane %v14642_v2, 1  ;;  %v15067_v6 = vsel %vm1345_vm2, %v5760_v37, %v5762_v21  ;;  %v5772_v44 = vrot.slane %v14717_v3, 1 }
 0x6ab   : > { %v15055_v35 = vsel %vm1345_vm2, %v5756_v51, %v5758_v48  ;;  %v15060_v4 = vsel %vm1345_vm2, %v5758_v48, %v5760_v37  ;;  %16155 = vst [vmem:[#allocation30_spill] sm:$0xff] %v15067_v6  ;;  %v5774_v63 = vrot.slane %v14734_v57, 1  ;;  %v5776_v51 = vrot.slane %v14751_v1, 1 }
 0x6ac   : > { %16153 = vst [vmem:[#allocation29_spill] sm:$0xff] %v15055_v35  ;;  %16154 = vst [vmem:[#allocation13_spill] sm:$0xff] %v15060_v4  ;;  %v15072_v42 = vsel %vm1345_vm2, %v5762_v21, %v5764_v34  ;;  %v5780_v48 = vrot.slane %v14785_v5, 1  ;;  %v6506_v10 = vshrl.u32 %v14657_v12, 16 }
 0x6ad   : > { %v4332_v61 = vpop.f32.mrb[132].mxu0  ;;  %16156 = vst [vmem:[#allocation31_spill] sm:$0xff] %v15072_v42 }
 0x6ae   : > { %v10607_v18 = vpop.f32.mrb[133].mxu0  ;;  %v5768_v61 = vrot.slane %v14676_v52, 1 }
 0x6af   : > { %v4334_v49 = vpop.f32.mrb[134].mxu0  ;;  %v15079_v18 = vsel %vm1345_vm2, %v5764_v34, %v5766_v14  ;;  %v5782_v34 = vrot.slane %v14802_v7, 1 }
 0x6b0   : > { %10666 = vmatmul.mubr.msk.bf16.gmra.mrb[128].mxu1 %vm636_vm3, %v14576_v11  ;;  %v10608_v13 = vpop.f32.mrb[135].mxu0  ;;  %16157 = vst [vmem:[#allocation17_spill] sm:$0xff] %v15079_v18  ;;  %v15084_v49 = vsel %vm1345_vm2, %v5766_v14, %v5768_v61  ;;  %v5784_v14 = vrot.slane %v14819_v46, 1 }
 0x6b1   : > { %10669 = vmatprep.mubr.msk.bf16.mxu1 %vm636_vm3, %v14591_v22  ;;  %16158 = vst [vmem:[#allocation14_spill] sm:$0xff] %v15084_v49  ;;  %v5770_v13 = vrot.slane %v14693_v15, 1 }
 0x6b3   : > { %v15091_v36 = vsel %vm1345_vm2, %v5768_v61, %v5770_v13  ;;  %v15127_v61 = vsel %vm1345_vm2, %v5780_v48, %v5782_v34 }
 0x6b4   : > { %16159 = vst [vmem:[#allocation33_spill] sm:$0xff] %v15091_v36  ;;  %16165 = vst [vmem:[#allocation32_spill] sm:$0xff] %v15127_v61 }
 0x6b8   : > { %10670 = vmatmul.mubr.msk.bf16.gmra.mrb[132].mxu1 %vm636_vm3, %v14608_v19 }
 0x6b9   : > { %10673 = vmatprep.mubr.msk.bf16.mxu1 %vm636_vm3, %v14625_v53 }
 0x6c0   : > { %10674 = vmatmul.mubr.msk.bf16.gmra.mrb[136].mxu1 %vm636_vm3, %v14642_v2 }
 0x6c1   : > { %10677 = vmatprep.mubr.msk.bf16.mxu1 %vm636_vm3, %v14659_v55 }
 0x6c8   : > { %10678 = vmatmul.mubr.msk.bf16.gmra.mrb[140].mxu1 %vm636_vm3, %v14676_v52 }
 0x6c9   : > { %10681 = vmatprep.mubr.msk.bf16.mxu1 %vm636_vm3, %v14693_v15 }
 0x6d0   : > { %10682 = vmatmul.mubr.msk.bf16.gmra.mrb[144].mxu1 %vm636_vm3, %v14717_v3 }
 0x6d1   : > { %10685 = vmatprep.mubr.msk.bf16.mxu1 %vm636_vm3, %v14734_v57 }
 0x6d8   : > { %10686 = vmatmul.mubr.msk.bf16.gmra.mrb[148].mxu1 %vm636_vm3, %v14751_v1 }
 0x6d9   : > { %10689 = vmatprep.mubr.msk.bf16.mxu1 %vm636_vm3, %v14768_v32 }
 0x6e0   : > { %10690 = vmatmul.mubr.msk.bf16.gmra.mrb[152].mxu1 %vm636_vm3, %v14785_v5 }
 0x6e1   : > { %10693 = vmatprep.mubr.msk.bf16.mxu1 %vm636_vm3, %v14802_v7 }
 0x6e8   : > { %10694 = vmatmul.mubr.msk.bf16.gmra.mrb[156].mxu1 %vm636_vm3, %v14819_v46 }
 0x6e9   : > { %10697 = vmatprep.mubr.msk.bf16.mxu1 %vm636_vm3, %v14836_v9 }
 0x6f0   : > { %10698 = vmatmul.mubr.msk.bf16.gmra.mrb[160].mxu1 %vm636_vm3, %v14853_v40 }
 0x6f1   : > { %10701 = vmatprep.mubr.msk.bf16.mxu1 %vm636_vm3, %v14870_v26 }
 0x6f8   : > { %10702 = vmatmul.mubr.msk.bf16.gmra.mrb[164].mxu1 %vm636_vm3, %v14892_v29 }
 0x6f9   : > { %10705 = vmatprep.mubr.msk.bf16.mxu1 %vm636_vm3, %v14914_v25 }
 0x700   : > { %10706 = vmatmul.mubr.msk.bf16.gmra.mrb[168].mxu1 %vm636_vm3, %v14931_v59 }
 0x701   : > { %10711 = vmatprep.mubr.msk.bf16.mxu1 %vm636_vm3, %v5753_v38  ;;  %v15096_v38 = vsel %vm1345_vm2, %v5770_v13, %v5772_v44  ;;  %v15132_v13 = vsel %vm1345_vm2, %v5782_v34, %v5784_v14  ;;  %v5792_v34 = vrot.slane %v14892_v29, 1 }
 0x702   : > { %16160 = vst [vmem:[#allocation35_spill] sm:$0xff] %v15096_v38  ;;  %16166 = vst [vmem:[#allocation34_spill] sm:$0xff] %v15132_v13 }
 0x708   : > { %10712 = vmatmul.mubr.msk.bf16.vlgmr.msra.gmra.mrb[124].mxu1 %vm636_vm3, %v5755_v30  ;;  %v15108_v30 = vsel %vm1345_vm2, %v5774_v63, %v5776_v51 }
 0x709   : > { %10760 = vmatpush3.bf16.msra.mxu1 %v6215_v27  ;;  %10715 = vmatprep.mubr.msk.bf16.mxu1 %vm636_vm3, %v5757_v58  ;;  %v15103_v27 = vsel %vm1345_vm2, %v5772_v44, %v5774_v63  ;;  %16162 = vst [vmem:[#allocation16_spill] sm:$0xff] %v15108_v30  ;;  %v5778_v58 = vrot.slane %v14768_v32, 1  ;;  %v5786_v44 = vrot.slane %v14836_v9, 1  ;;  %v5788_v63 = vrot.slane %v14853_v40, 1 }
 0x70a   : > { %12288 = vmatprep.subr.msk.bf16.mxu1 %vm724_vm0, %v15045_v31  ;;  %16161 = vst [vmem:[#allocation15_spill] sm:$0xff] %v15103_v27 }
 0x70b   : > { %v15115_v37 = vsel %vm1345_vm2, %v5776_v51, %v5778_v58  ;;  %v15120_v21 = vsel %vm1345_vm2, %v5778_v58, %v5780_v48  ;;  %v15139_v51 = vsel %vm1345_vm2, %v5784_v14, %v5786_v44  ;;  %v15144_v58 = vsel %vm1345_vm2, %v5786_v44, %v5788_v63 }
 0x70c   : > { %16163 = vst [vmem:[#allocation3_spill] sm:$0xff] %v15115_v37  ;;  %16164 = vst [vmem:[#allocation2_spill] sm:$0xff] %v15120_v21  ;;  %v5790_v48 = vrot.slane %v14870_v26, 1  ;;  %v5794_v44 = vrot.slane %v14914_v25, 1 }
 0x70d   : > { %16167 = vst [vmem:[#allocation38_spill] sm:$0xff] %v15139_v51  ;;  %16168 = vst [vmem:[#allocation39_spill] sm:$0xff] %v15144_v58 }
 0x70e   : > { %v15156_v14 = vsel %vm1345_vm2, %v5790_v48, %v5792_v34 }
 0x70f   : > { %16170 = vst [vmem:[#allocation41_spill] sm:$0xff] %v15156_v14 }
 0x710   : > { %10716 = vmatmul.mubr.msk.bf16.gmra.mrb[128].mxu1 %vm636_vm3, %v15055_v35 }
 0x711   : > { %10719 = vmatprep.mubr.msk.bf16.mxu1 %vm636_vm3, %v15060_v4 }
 0x718   : > { %10720 = vmatmul.mubr.msk.bf16.gmra.mrb[132].mxu1 %vm636_vm3, %v15067_v6  ;;  %v6471_v6 = vshrl.u32 %v14571_v41, 16 }
 0x719   : > { %10723 = vmatprep.mubr.msk.bf16.mxu1 %vm636_vm3, %v15072_v42 }
 0x720   : > { %10724 = vmatmul.mubr.msk.bf16.gmra.mrb[136].mxu1 %vm636_vm3, %v15079_v18  ;;  %v6481_v18 = vshll.u32 %v14606_v28, 16 }
 0x721   : > { %10727 = vmatprep.mubr.msk.bf16.mxu1 %vm636_vm3, %v15084_v49 }
 0x722   : > { %v6483_v4 = vrot.slane %v6481_v18, 1 }
 0x728   : > { %10728 = vmatmul.mubr.msk.bf16.gmra.mrb[140].mxu1 %vm636_vm3, %v15091_v36  ;;  %v6474_v36 = vshll.u32 %v14589_v0, 16 }
 0x729   : > { %10731 = vmatprep.mubr.msk.bf16.mxu1 %vm636_vm3, %v15096_v38 }
 0x72a   : > { %v6476_v42 = vrot.slane %v6474_v36, 1  ;;  %v6495_v36 = vshll.u32 %v14640_v20, 16 }
 0x72c   : > { %v6497_v18 = vrot.slane %v6495_v36, 1 }
 0x730   : > { %10732 = vmatmul.mubr.msk.bf16.gmra.mrb[144].mxu1 %vm636_vm3, %v15103_v27 }
 0x731   : > { %10735 = vmatprep.mubr.msk.bf16.mxu1 %vm636_vm3, %v15108_v30  ;;  %v6461_v30 = vshrl.u32 %v14559_v50, 16 }
 0x738   : > { %10736 = vmatmul.mubr.msk.bf16.gmra.mrb[148].mxu1 %vm636_vm3, %v15115_v37 }
 0x739   : > { %10739 = vmatprep.mubr.msk.bf16.mxu1 %vm636_vm3, %v15120_v21  ;;  %v16182_v21 = vld [vmem:[#allocation26_spill] sm:$0xff] }
 0x740   : > { %10740 = vmatmul.mubr.msk.bf16.gmra.mrb[152].mxu1 %vm636_vm3, %v15127_v61  ;;  %v6467_v61 = vshll.u32 %v14571_v41, 16 }
 0x741   : > { %10743 = vmatprep.mubr.msk.bf16.mxu1 %vm636_vm3, %v15132_v13  ;;  %v15151_v13 = vsel %vm1345_vm2, %v5788_v63, %v5790_v48  ;;  %v5798_v48 = vrot.slane %v14946_v24, 1  ;;  %v16174_v24 = vld [vmem:[#allocation20_spill] sm:$0xff] }
 0x742   : > { %16169 = vst [vmem:[#allocation40_spill] sm:$0xff] %v15151_v13  ;;  %v6469_v27 = vrot.slane %v6467_v61, 1  ;;  %v6488_v61 = vshll.u32 %v14623_v39, 16 }
 0x744   : > { %v6473_v35 = vor.u32 %v6471_v6, %v6469_v27  ;;  %v6490_v6 = vrot.slane %v6488_v61, 1 }
 0x746   : > { %v6477_v16 = vsel %vm404_vm4, %v6473_v35, %v6476_v42  ;;  %v6485_v35 = vshrl.u32 %v14606_v28, 16 }
 0x748   : > { %10744 = vmatmul.mubr.msk.bf16.gmra.mrb[156].mxu1 %vm636_vm3, %v15139_v51  ;;  %v15165_v51 = vsel %vm1345_vm2, %v5792_v34, %v5794_v44  ;;  %v6706_v34 = vsel %vm724_vm0, %v15045_v31, 0  ;;  %v16175_v31 = vld [vmem:[#allocation36_spill] sm:$0xff] }
 0x749   : > { %10747 = vmatprep.mubr.msk.bf16.mxu1 %vm636_vm3, %v15144_v58  ;;  %v15162_v58 = vrot.slane %v14931_v59, 1  ;;  %16172 = vst [vmem:[#allocation53_spill] sm:$0xff] %v15165_v51 }
 0x74b   : > { %16171 = vst [vmem:[#allocation42_spill] sm:$0xff] %v15162_v58  ;;  %v15171_v63 = vsel %vm1345_vm2, %v5794_v44, %v15162_v58  ;;  %v8947_v44 = vld [vmem:[%s15822_s2 + $0xa] sm:$0x3] }
 0x74c   : > { %16173 = vst [vmem:[#allocation54_spill] sm:$0xff] %v15171_v63 }
 0x750   : > { %10748 = vmatmul.mubr.msk.bf16.gmra.mrb[160].mxu1 %vm636_vm3, %v15151_v13  ;;  %v16181_v13 = vld [vmem:[#allocation24_spill] sm:$0xff] }
 0x751   : > { %10751 = vmatprep.mubr.msk.bf16.mxu1 %vm636_vm3, %v15156_v14  ;;  %v5799_v14 = vsel %vm1345_vm2, %v15162_v58, %v5798_v48  ;;  %v16177_v48 = vld [vmem:[#allocation7_spill] sm:$0xff] }
 0x752   : > { %v16179_v58 = vld [vmem:[#allocation11_spill] sm:$0xff] }
 0x758   : > { %10752 = vmatmul.mubr.msk.bf16.gmra.mrb[164].mxu1 %vm636_vm3, %v15165_v51  ;;  %v6463_v51 = vshll.u32 %v14559_v50, 16 }
 0x759   : > { %10755 = vmatprep.mubr.msk.bf16.mxu1 %vm636_vm3, %v15171_v63  ;;  %v16180_v63 = vld [vmem:[#allocation22_spill] sm:$0xff] }
 0x75a   : > { %v6465_v37 = vrot.slane %v6463_v51, 1  ;;  %v6478_v51 = vshrl.u32 %v14589_v0, 16 }
 0x75c   : > { %v6466_v38 = vor.u32 %v6465_v37, %v6461_v30  ;;  %v7098_v30 = vsel %vm724_vm0, %v8947_v44, 0  ;;  %v6480_v37 = vor.u32 %v6478_v51, %v6476_v42  ;;  %v6492_v42 = vshrl.u32 %v14623_v39, 16 }
 0x75e   : > { %v6470_v49 = vsel %vm404_vm4, %v6466_v38, %v6469_v27  ;;  %v15248_v38 = vld [vmem:[%s15822_s2 + $0xc] sm:$0x3]  ;;  %v6487_v27 = vor.u32 %v6485_v35, %v6483_v4 }
 0x760   : > { %10756 = vmatmul.mubr.msk.bf16.gmra.mrb[168].mxu1 %vm636_vm3, %v5799_v14  ;;  %v16176_v14 = vld [vmem:[#allocation5_spill] sm:$0xff]  ;;  %v6491_v51 = vsel %vm404_vm4, %v6487_v27, %v6490_v6 }
 0x761   : > { %10761 = vmatprep.mubr.msk.bf16.mxu1 %vm636_vm3, %v14559_v50 }
 0x768   : > { %10762 = vmatmul.mubr.msk.bf16.vlgmr.msra.gmra.mrb[124].mxu1 %vm636_vm3, %v14571_v41 }
 0x769   : > { %10810 = vmatpush3.bf16.msra.mxu1 %v6706_v34  ;;  %10765 = vmatprep.mubr.msk.bf16.mxu1 %vm636_vm3, %v14589_v0  ;;  %v16178_v34 = vld [vmem:[#allocation9_spill] sm:$0xff] }
 0x76a   : > { %12289 = vmatprep.subr.msk.bf16.mxu1 %vm724_vm0, %v8947_v44  ;;  %v6494_v44 = vor.u32 %v6492_v42, %v6490_v6  ;;  %v6516_v42 = vshll.u32 %v14691_v45, 16 }
 0x770   : > { %10766 = vmatmul.mubr.msk.bf16.gmra.mrb[128].mxu1 %vm636_vm3, %v14606_v28 }
 0x771   : > { %10769 = vmatprep.mubr.msk.bf16.mxu1 %vm636_vm3, %v14623_v39 }
 0x778   : > { %10770 = vmatmul.mubr.msk.bf16.gmra.mrb[132].mxu1 %vm636_vm3, %v14640_v20 }
 0x779   : > { %10773 = vmatprep.mubr.msk.bf16.mxu1 %vm636_vm3, %v14657_v12 }
 0x780   : > { %10774 = vmatmul.mubr.msk.bf16.gmra.mrb[136].mxu1 %vm636_vm3, %v14674_v43 }
 0x781   : > { %10777 = vmatprep.mubr.msk.bf16.mxu1 %vm636_vm3, %v14691_v45 }
 0x788   : > { %10778 = vmatmul.mubr.msk.bf16.gmra.mrb[140].mxu1 %vm636_vm3, %v14715_v47 }
 0x789   : > { %10781 = vmatprep.mubr.msk.bf16.mxu1 %vm636_vm3, %v14732_v60 }
 0x790   : > { %10782 = vmatmul.mubr.msk.bf16.gmra.mrb[144].mxu1 %vm636_vm3, %v14749_v54 }
 0x791   : > { %10785 = vmatprep.mubr.msk.bf16.mxu1 %vm636_vm3, %v14766_v62 }
 0x798   : > { %10786 = vmatmul.mubr.msk.bf16.gmra.mrb[148].mxu1 %vm636_vm3, %v14783_v56 }
 0x799   : > { %10789 = vmatprep.mubr.msk.bf16.mxu1 %vm636_vm3, %v16174_v24 }
 0x7a0   : > { %10790 = vmatmul.mubr.msk.bf16.gmra.mrb[152].mxu1 %vm636_vm3, %v16175_v31 }
 0x7a1   : > { %10793 = vmatprep.mubr.msk.bf16.mxu1 %vm636_vm3, %v16176_v14 }
 0x7a8   : > { %10794 = vmatmul.mubr.msk.bf16.gmra.mrb[156].mxu1 %vm636_vm3, %v16177_v48 }
 0x7a9   : > { %10797 = vmatprep.mubr.msk.bf16.mxu1 %vm636_vm3, %v16178_v34 }
 0x7b0   : > { %10798 = vmatmul.mubr.msk.bf16.gmra.mrb[160].mxu1 %vm636_vm3, %v16179_v58 }
 0x7b1   : > { %10801 = vmatprep.mubr.msk.bf16.mxu1 %vm636_vm3, %v16180_v63 }
 0x7b8   : > { %10802 = vmatmul.mubr.msk.bf16.gmra.mrb[164].mxu1 %vm636_vm3, %v16181_v13 }
 0x7b9   : > { %10805 = vmatprep.mubr.msk.bf16.mxu1 %vm636_vm3, %v16182_v21 }
 0x7c0   : > { %10806 = vmatmul.mubr.msk.bf16.gmra.mrb[168].mxu1 %vm636_vm3, %v14967_v23 }
 0x7c1   : > { %10811 = vmatprep.mubr.msk.bf16.mxu1 %vm636_vm3, %v6470_v49  ;;  %v6484_v49 = vsel %vm404_vm4, %v6480_v37, %v6483_v4  ;;  %v6509_v37 = vshll.u32 %v14674_v43, 16 }
 0x7c3   : > { %v6511_v36 = vrot.slane %v6509_v37, 1 }
 0x7c8   : > { %10812 = vmatmul.mubr.msk.bf16.vlgmr.msra.gmra.mrb[124].mxu1 %vm636_vm3, %v6477_v16  ;;  %v6502_v16 = vshll.u32 %v14657_v12, 16 }
 0x7c9   : > { %10860 = vmatpush3.bf16.msra.mxu1 %v7098_v30  ;;  %10815 = vmatprep.mubr.msk.bf16.mxu1 %vm636_vm3, %v6484_v49  ;;  %v6498_v30 = vsel %vm404_vm4, %v6494_v44, %v6497_v18  ;;  %v6499_v49 = vshrl.u32 %v14640_v20, 16  ;;  %v6523_v44 = vshll.u32 %v14715_v47, 16 }
 0x7ca   : > { %12290 = vmatprep.subr.msk.bf16.mxu1 %vm724_vm0, %v15248_v38  ;;  %v6504_v61 = vrot.slane %v6502_v16, 1  ;;  %v6518_v16 = vrot.slane %v6516_v42, 1 }
 0x7cb   : > { %v6501_v4 = vor.u32 %v6499_v49, %v6497_v18  ;;  %v6525_v37 = vrot.slane %v6523_v44, 1  ;;  %v6530_v49 = vshll.u32 %v14732_v60, 16 }
 0x7cc   : > { %v6508_v35 = vor.u32 %v6506_v10, %v6504_v61 }
 0x7cd   : > { %v6505_v6 = vsel %vm404_vm4, %v6501_v4, %v6504_v61  ;;  %v6532_v42 = vrot.slane %v6530_v49, 1 }
 0x7ce   : > { %v6512_v27 = vsel %vm404_vm4, %v6508_v35, %v6511_v36  ;;  %v6537_v35 = vshll.u32 %v14749_v54, 16 }
 0x7d0   : > { %10816 = vmatmul.mubr.msk.bf16.gmra.mrb[128].mxu1 %vm636_vm3, %v6491_v51  ;;  %v6513_v51 = vshrl.u32 %v14674_v43, 16  ;;  %v6539_v44 = vrot.slane %v6537_v35, 1 }
 0x7d1   : > { %10819 = vmatprep.mubr.msk.bf16.mxu1 %vm636_vm3, %v6498_v30  ;;  %v6520_v30 = vshrl.u32 %v14691_v45, 16 }
 0x7d2   : > { %v6515_v18 = vor.u32 %v6513_v51, %v6511_v36 }
 0x7d3   : > { %v6522_v10 = vor.u32 %v6520_v30, %v6518_v16  ;;  %v6544_v30 = vshll.u32 %v14766_v62, 16 }
 0x7d4   : > { %v6519_v61 = vsel %vm404_vm4, %v6515_v18, %v6518_v16 }
 0x7d5   : > { %v6526_v4 = vsel %vm404_vm4, %v6522_v10, %v6525_v37  ;;  %v6551_v10 = vshll.u32 %v14783_v56, 16  ;;  %v6546_v49 = vrot.slane %v6544_v30, 1 }
 0x7d7   : > { %v6553_v35 = vrot.slane %v6551_v10, 1 }
 0x7d8   : > { %10820 = vmatmul.mubr.msk.bf16.gmra.mrb[132].mxu1 %vm636_vm3, %v6505_v6  ;;  %v6527_v6 = vshrl.u32 %v14715_v47, 16 }
 0x7d9   : > { %10823 = vmatprep.mubr.msk.bf16.mxu1 %vm636_vm3, %v6512_v27  ;;  %v6534_v27 = vshrl.u32 %v14732_v60, 16 }
 0x7da   : > { %v6529_v36 = vor.u32 %v6527_v6, %v6525_v37 }
 0x7db   : > { %v6536_v51 = vor.u32 %v6534_v27, %v6532_v42  ;;  %v6558_v27 = vshll.u32 %v16174_v24, 16 }
 0x7dc   : > { %v6533_v16 = vsel %vm404_vm4, %v6529_v36, %v6532_v42 }
 0x7dd   : > { %v6540_v18 = vsel %vm404_vm4, %v6536_v51, %v6539_v44  ;;  %v6565_v51 = vshll.u32 %v16175_v31, 16  ;;  %v6560_v30 = vrot.slane %v6558_v27, 1 }
 0x7df   : > { %v6567_v10 = vrot.slane %v6565_v51, 1 }
 0x7e0   : > { %10824 = vmatmul.mubr.msk.bf16.gmra.mrb[136].mxu1 %vm636_vm3, %v6519_v61  ;;  %v6541_v61 = vshrl.u32 %v14749_v54, 16 }
 0x7e1   : > { %10827 = vmatprep.mubr.msk.bf16.mxu1 %vm636_vm3, %v6526_v4  ;;  %v6548_v4 = vshrl.u32 %v14766_v62, 16 }
 0x7e2   : > { %v6543_v37 = vor.u32 %v6541_v61, %v6539_v44 }
 0x7e3   : > { %v6550_v6 = vor.u32 %v6548_v4, %v6546_v49  ;;  %v6572_v4 = vshll.u32 %v16176_v14, 16 }
 0x7e4   : > { %v6547_v42 = vsel %vm404_vm4, %v6543_v37, %v6546_v49 }
 0x7e5   : > { %v6554_v36 = vsel %vm404_vm4, %v6550_v6, %v6553_v35  ;;  %v6579_v6 = vshll.u32 %v16177_v48, 16  ;;  %v6574_v27 = vrot.slane %v6572_v4, 1 }
 0x7e7   : > { %v6581_v51 = vrot.slane %v6579_v6, 1 }
 0x7e8   : > { %10828 = vmatmul.mubr.msk.bf16.gmra.mrb[140].mxu1 %vm636_vm3, %v6533_v16  ;;  %v6555_v16 = vshrl.u32 %v14783_v56, 16 }
 0x7e9   : > { %10831 = vmatprep.mubr.msk.bf16.mxu1 %vm636_vm3, %v6540_v18  ;;  %v6562_v18 = vshrl.u32 %v16174_v24, 16 }
 0x7ea   : > { %v6557_v44 = vor.u32 %v6555_v16, %v6553_v35 }
 0x7eb   : > { %v6564_v61 = vor.u32 %v6562_v18, %v6560_v30  ;;  %v6586_v18 = vshll.u32 %v16178_v34, 16 }
 0x7ec   : > { %v6561_v49 = vsel %vm404_vm4, %v6557_v44, %v6560_v30 }
 0x7ed   : > { %v6568_v37 = vsel %vm404_vm4, %v6564_v61, %v6567_v10  ;;  %v6593_v61 = vshll.u32 %v16179_v58, 16  ;;  %v6588_v4 = vrot.slane %v6586_v18, 1 }
 0x7ef   : > { %v6595_v6 = vrot.slane %v6593_v61, 1 }
 0x7f0   : > { %10832 = vmatmul.mubr.msk.bf16.gmra.mrb[144].mxu1 %vm636_vm3, %v6547_v42  ;;  %v6569_v42 = vshrl.u32 %v16175_v31, 16 }
 0x7f1   : > { %10835 = vmatprep.mubr.msk.bf16.mxu1 %vm636_vm3, %v6554_v36  ;;  %v6576_v36 = vshrl.u32 %v16176_v14, 16 }
 0x7f2   : > { %v6571_v35 = vor.u32 %v6569_v42, %v6567_v10 }
 0x7f3   : > { %v6578_v16 = vor.u32 %v6576_v36, %v6574_v27  ;;  %v6600_v36 = vshll.u32 %v16180_v63, 16 }
 0x7f4   : > { %v6575_v30 = vsel %vm404_vm4, %v6571_v35, %v6574_v27 }
 0x7f5   : > { %v6582_v44 = vsel %vm404_vm4, %v6578_v16, %v6581_v51  ;;  %v6607_v16 = vshll.u32 %v16181_v13, 16  ;;  %v6602_v18 = vrot.slane %v6600_v36, 1 }
 0x7f7   : > { %v6609_v61 = vrot.slane %v6607_v16, 1 }
 0x7f8   : > { %10836 = vmatmul.mubr.msk.bf16.gmra.mrb[148].mxu1 %vm636_vm3, %v6561_v49  ;;  %v6583_v49 = vshrl.u32 %v16177_v48, 16 }
 0x7f9   : > { %10839 = vmatprep.mubr.msk.bf16.mxu1 %vm636_vm3, %v6568_v37  ;;  %v6590_v37 = vshrl.u32 %v16178_v34, 16 }
 0x7fa   : > { %v6585_v10 = vor.u32 %v6583_v49, %v6581_v51 }
 0x7fb   : > { %v6592_v42 = vor.u32 %v6590_v37, %v6588_v4  ;;  %v6614_v37 = vshll.u32 %v16182_v21, 16 }
 0x7fc   : > { %v6589_v27 = vsel %vm404_vm4, %v6585_v10, %v6588_v4 }
 0x7fd   : > { %v6596_v35 = vsel %vm404_vm4, %v6592_v42, %v6595_v6  ;;  %v6621_v42 = vshll.u32 %v14967_v23, 16  ;;  %v6616_v36 = vrot.slane %v6614_v37, 1 }
 0x7ff   : > { %v6623_v16 = vrot.slane %v6621_v42, 1  ;;  %v6976_v42 = vrot.slane %v14559_v50, 1  ;;  %v15354_v50 = vld [vmem:[%s15822_s2 + $0xe] sm:$0x3] }
 0x800   : > { %10840 = vmatmul.mubr.msk.bf16.gmra.mrb[152].mxu1 %vm636_vm3, %v6575_v30  ;;  %v6597_v30 = vshrl.u32 %v16179_v58, 16 }
 0x801   : > { %10843 = vmatprep.mubr.msk.bf16.mxu1 %vm636_vm3, %v6582_v44  ;;  %v6604_v44 = vshrl.u32 %v16180_v63, 16 }
 0x802   : > { %v6599_v51 = vor.u32 %v6597_v30, %v6595_v6  ;;  %v6611_v6 = vshrl.u32 %v16181_v13, 16 }
 0x803   : > { %v6606_v49 = vor.u32 %v6604_v44, %v6602_v18 }
 0x804   : > { %v6603_v4 = vsel %vm404_vm4, %v6599_v51, %v6602_v18  ;;  %v6613_v30 = vor.u32 %v6611_v6, %v6609_v61  ;;  %v6979_v6 = vrot.slane %v14589_v0, 1  ;;  %v6983_v0 = vrot.slane %v14623_v39, 1 }
 0x805   : > { %v6610_v10 = vsel %vm404_vm4, %v6606_v49, %v6609_v61 }
 0x806   : > { %v6617_v44 = vsel %vm404_vm4, %v6613_v30, %v6616_v36 }
 0x808   : > { %10844 = vmatmul.mubr.msk.bf16.gmra.mrb[156].mxu1 %vm636_vm3, %v6589_v27  ;;  %v15330_v27 = vpack.c.bf16 %v14962_v8, %v14962_v8  ;;  %v6625_v8 = vshrl.u32 %v14967_v23, 16 }
 0x809   : > { %10847 = vmatprep.mubr.msk.bf16.mxu1 %vm636_vm3, %v6596_v35  ;;  %v6618_v35 = vshrl.u32 %v16182_v21, 16 }
 0x80a   : > { %v6629_v51 = vshll.u32 %v15330_v27, 16  ;;  %v6627_v37 = vor.u32 %v6625_v8, %v6623_v16  ;;  %v6993_v8 = vrot.slane %v14715_v47, 1  ;;  %v6999_v47 = vrot.slane %v14766_v62, 1 }
 0x80b   : > { %v6620_v18 = vor.u32 %v6618_v35, %v6616_v36  ;;  %v6981_v35 = vrot.slane %v14606_v28, 1  ;;  %v6985_v28 = vrot.slane %v14640_v20, 1  ;;  %v6991_v20 = vrot.slane %v14691_v45, 1 }
 0x80d   : > { %v6624_v49 = vsel %vm404_vm4, %v6620_v18, %v6623_v16  ;;  %v7356_v16 = vsel %vm724_vm0, %v15248_v38, 0  ;;  %v6984_v38 = vsel %vm1345_vm2, %v6981_v35, %v6983_v0  ;;  %v6986_v18 = vsel %vm1345_vm2, %v6983_v0, %v6985_v28 }
 0x80e   : > { %v7017_v0 = vrot.slane %v16181_v13, 1  ;;  %v7023_v13 = vrot.slane %v15330_v27, 1 }
 0x810   : > { %10848 = vmatmul.mubr.msk.bf16.gmra.mrb[160].mxu1 %vm636_vm3, %v6603_v4  ;;  %v6631_v4 = vrot.slane %v6629_v51, 1  ;;  %v6989_v51 = vrot.slane %v14674_v43, 1  ;;  %v6995_v43 = vrot.slane %v14732_v60, 1 }
 0x811   : > { %10851 = vmatprep.mubr.msk.bf16.mxu1 %vm636_vm3, %v6610_v10  ;;  %v6977_v10 = vrot.slane %v14571_v41, 1  ;;  %v6982_v41 = vsel %vm1345_vm2, %v6979_v6, %v6981_v35  ;;  %v7009_v35 = vrot.slane %v16177_v48, 1  ;;  %v7015_v48 = vrot.slane %v16180_v63, 1 }
 0x812   : > { %v6632_v61 = vsel %vm404_vm4, %v6627_v37, %v6631_v4  ;;  %v6992_v37 = vsel %vm1345_vm2, %v6989_v51, %v6991_v20  ;;  %v6997_v4 = vrot.slane %v14749_v54, 1  ;;  %v7003_v54 = vrot.slane %v16174_v24, 1 }
 0x813   : > { %v6978_v36 = vsel %vm1345_vm2, %v6976_v42, %v6977_v10  ;;  %v6980_v30 = vsel %vm1345_vm2, %v6977_v10, %v6979_v6  ;;  %v6996_v10 = vsel %vm1345_vm2, %v6993_v8, %v6995_v43  ;;  %v7001_v42 = vrot.slane %v14783_v56, 1 }
 0x814   : > { %v6998_v45 = vsel %vm1345_vm2, %v6995_v43, %v6997_v4  ;;  %v7007_v56 = vrot.slane %v16176_v14, 1  ;;  %v7609_v43 = vshll.u32 %v14974_v33, 16 }
 0x815   : > { %v7002_v60 = vsel %vm1345_vm2, %v6999_v47, %v7001_v42  ;;  %v7004_v6 = vsel %vm1345_vm2, %v7001_v42, %v7003_v54  ;;  %v7616_v42 = vshll.u32 %v14990_v17, 16 }
 0x816   : > { %v7010_v24 = vsel %vm1345_vm2, %v7007_v56, %v7009_v35 }
 0x818   : > { %10852 = vmatmul.mubr.msk.bf16.gmra.mrb[164].mxu1 %vm636_vm3, %v6617_v44  ;;  %v6987_v44 = vrot.slane %v14657_v12, 1  ;;  %v6994_v12 = vsel %vm1345_vm2, %v6991_v20, %v6993_v8  ;;  %v16203_v20 = vld [vmem:[#allocation23_spill] sm:$0xff] }
 0x819   : > { %10855 = vmatprep.mubr.msk.bf16.mxu1 %vm636_vm3, %v6624_v49 }
 0x81a   : > { %v6988_v49 = vsel %vm1345_vm2, %v6985_v28, %v6987_v44  ;;  %v6990_v39 = vsel %vm1345_vm2, %v6987_v44, %v6989_v51 }
 0x820   : > { %10856 = vmatmul.mubr.msk.bf16.gmra.mrb[168].mxu1 %vm636_vm3, %v6632_v61  ;;  %v7000_v61 = vsel %vm1345_vm2, %v6997_v4, %v6999_v47 }
 0x821   : > { %10861 = vmatprep.mubr.msk.bf16.mxu1 %vm636_vm3, %v6978_v36  ;;  %v7005_v36 = vrot.slane %v16175_v31, 1  ;;  %v7011_v31 = vrot.slane %v16178_v34, 1  ;;  %v7018_v34 = vsel %vm1345_vm2, %v7015_v48, %v7017_v0 }
 0x823   : > { %v7006_v62 = vsel %vm1345_vm2, %v7003_v54, %v7005_v36 }
 0x828   : > { %10862 = vmatmul.mubr.msk.bf16.vlgmr.msra.gmra.mrb[124].mxu1 %vm636_vm3, %v6980_v30  ;;  %v7013_v30 = vrot.slane %v16179_v58, 1  ;;  %v7019_v58 = vrot.slane %v16182_v21, 1  ;;  %v9022_v21 = vld [vmem:[%s15822_s2 + $0x10] sm:$0x3] }
 0x829   : > { %10910 = vmatpush3.bf16.msra.mxu1 %v7356_v16  ;;  %10865 = vmatprep.mubr.msk.bf16.mxu1 %vm636_vm3, %v6982_v41  ;;  %v7008_v16 = vsel %vm1345_vm2, %v7005_v36, %v7007_v56  ;;  %v7012_v41 = vsel %vm1345_vm2, %v7009_v35, %v7011_v31  ;;  %v7613_v36 = vshrl.u32 %v14974_v33, 16 }
 0x82a   : > { %12291 = vmatprep.subr.msk.bf16.mxu1 %vm724_vm0, %v15354_v50  ;;  %v7014_v14 = vsel %vm1345_vm2, %v7011_v31, %v7013_v30  ;;  %v7016_v28 = vsel %vm1345_vm2, %v7013_v30, %v7015_v48  ;;  %v7620_v31 = vshrl.u32 %v14990_v17, 16  ;;  %v16206_v48 = vld [vmem:[#allocation29_spill] sm:$0xff] }
 0x830   : > { %10866 = vmatmul.mubr.msk.bf16.gmra.mrb[128].mxu1 %vm636_vm3, %v6984_v38  ;;  %v7021_v38 = vrot.slane %v14967_v23, 1  ;;  %v7641_v23 = vsel %vm724_vm0, %v15354_v50, 0  ;;  %v12313_v50 = vld [vmem:[%s15824_s4] ss:$0 sm:$0xff] }
 0x831   : > { %10869 = vmatprep.mubr.msk.bf16.mxu1 %vm636_vm3, %v6986_v18  ;;  %v7020_v18 = vsel %vm1345_vm2, %v7017_v0, %v7019_v58  ;;  %v16207_v0 = vld [vmem:[#allocation13_spill] sm:$0xff] }
 0x832   : > { %v7022_v63 = vsel %vm1345_vm2, %v7019_v58, %v7021_v38  ;;  %v7024_v44 = vsel %vm1345_vm2, %v7021_v38, %v7023_v13  ;;  %v16210_v58 = vld [vmem:[#allocation17_spill] sm:$0xff]  ;;  %v16211_v38 = vld [vmem:[#allocation14_spill] sm:$0xff]  ;;  %v16214_v13 = vld [vmem:[#allocation15_spill] sm:$0xff] }
 0x838   : > { %10870 = vmatmul.mubr.msk.bf16.gmra.mrb[132].mxu1 %vm636_vm3, %v6988_v49  ;;  %v16202_v49 = vld [vmem:[#allocation12_spill] sm:$0xff] }
 0x839   : > { %10873 = vmatprep.mubr.msk.bf16.mxu1 %vm636_vm3, %v6990_v39 }
 0x840   : > { %10874 = vmatmul.mubr.msk.bf16.gmra.mrb[136].mxu1 %vm636_vm3, %v6992_v37 }
 0x841   : > { %10877 = vmatprep.mubr.msk.bf16.mxu1 %vm636_vm3, %v6994_v12  ;;  %v4899_v12 = vpop.permute.xlu0 %4898 }
 0x848   : > { %10878 = vmatmul.mubr.msk.bf16.gmra.mrb[140].mxu1 %vm636_vm3, %v6996_v10  ;;  %v16204_v10 = vld [vmem:[#allocation25_spill] sm:$0xff] }
 0x849   : > { %10881 = vmatprep.mubr.msk.bf16.mxu1 %vm636_vm3, %v6998_v45  ;;  %v16205_v45 = vld [vmem:[#allocation4_spill] sm:$0xff] }
 0x850   : > { %10882 = vmatmul.mubr.msk.bf16.gmra.mrb[144].mxu1 %vm636_vm3, %v7000_v61  ;;  %v7611_v61 = vrot.slane %v7609_v43, 1 }
 0x851   : > { %10885 = vmatprep.mubr.msk.bf16.mxu1 %vm636_vm3, %v7002_v60 }
 0x852   : > { %v7615_v56 = vor.u32 %v7613_v36, %v7611_v61 }
 0x858   : > { %10886 = vmatmul.mubr.msk.bf16.gmra.mrb[148].mxu1 %vm636_vm3, %v7004_v6  ;;  %v7618_v6 = vrot.slane %v7616_v42, 1 }
 0x859   : > { %10889 = vmatprep.mubr.msk.bf16.mxu1 %vm636_vm3, %v7006_v62 }
 0x860   : > { %10890 = vmatmul.mubr.msk.bf16.gmra.mrb[152].mxu1 %vm636_vm3, %v7008_v16 }
 0x861   : > { %10893 = vmatprep.mubr.msk.bf16.mxu1 %vm636_vm3, %v7010_v24  ;;  %v7619_v24 = vsel %vm404_vm4, %v7615_v56, %v7618_v6 }
 0x868   : > { %10894 = vmatmul.mubr.msk.bf16.gmra.mrb[156].mxu1 %vm636_vm3, %v7012_v41  ;;  %v7622_v41 = vor.u32 %v7620_v31, %v7618_v6  ;;  %v12321_v31 = vld [vmem:[%s12446_s12 + $0x58] sm:$0xff] }
 0x869   : > { %10897 = vmatprep.mubr.msk.bf16.mxu1 %vm636_vm3, %v7014_v14 }
 0x870   : > { %10898 = vmatmul.mubr.msk.bf16.gmra.mrb[160].mxu1 %vm636_vm3, %v7016_v28  ;;  %v16208_v28 = vld [vmem:[#allocation30_spill] sm:$0xff] }
 0x871   : > { %10901 = vmatprep.mubr.msk.bf16.mxu1 %vm636_vm3, %v7018_v34  ;;  %v16209_v34 = vld [vmem:[#allocation31_spill] sm:$0xff] }
 0x878   : > { %10902 = vmatmul.mubr.msk.bf16.gmra.mrb[164].mxu1 %vm636_vm3, %v7020_v18  ;;  %v16212_v18 = vld [vmem:[#allocation33_spill] sm:$0xff] }
 0x879   : > { %10905 = vmatprep.mubr.msk.bf16.mxu1 %vm636_vm3, %v7022_v63  ;;  %v16213_v63 = vld [vmem:[#allocation35_spill] sm:$0xff] }
 0x880   : > { %10906 = vmatmul.mubr.msk.bf16.gmra.mrb[168].mxu1 %vm636_vm3, %v7024_v44  ;;  %v16215_v44 = vld [vmem:[#allocation16_spill] sm:$0xff] }
 0x881   : > { %10911 = vmatprep.mubr.msk.bf16.mxu1 %vm636_vm3, %v14576_v11  ;;  %v16183_v11 = vld [vmem:[#allocation27_spill] sm:$0xff] }
 0x882   : > { %v7602_v39 = vshll.u32 %v16183_v11, 16  ;;  %v7606_v54 = vshrl.u32 %v16183_v11, 16 }
 0x884   : > { %v7604_v37 = vrot.slane %v7602_v39, 1 }
 0x886   : > { %v7605_v47 = vsel %vm404_vm4, %v16205_v45, %v7604_v37  ;;  %v7608_v62 = vor.u32 %v7606_v54, %v7604_v37 }
 0x888   : > { %10912 = vmatmul.mubr.msk.bf16.vlgmr.msra.gmra.mrb[124].mxu1 %vm636_vm3, %v14591_v22  ;;  %v16184_v22 = vld [vmem:[#allocation43_spill] sm:$0xff]  ;;  %v7612_v35 = vsel %vm404_vm4, %v7608_v62, %v7611_v61  ;;  %v12319_v62 = vld [vmem:[%s12446_s12 + $0x60] sm:$0xff] }
 0x889   : > { %10960 = vmatpush3.bf16.msra.mxu1 %v7641_v23  ;;  %10915 = vmatprep.mubr.msk.bf16.mxu1 %vm636_vm3, %v14608_v19  ;;  %v7911_v19 = vsel %vm724_vm0, %v9022_v21, 0  ;;  %v16216_v23 = vld [vmem:[#allocation3_spill] sm:$0xff]  ;;  %v8291_v56 = vrot.slane %v12319_v62, 2 }
 0x88a   : > { %12292 = vmatprep.subr.msk.bf16.mxu1 %vm724_vm0, %v9022_v21  ;;  %v16217_v21 = vld [vmem:[#allocation2_spill] sm:$0xff] }
 0x890   : > { %10916 = vmatmul.mubr.msk.bf16.gmra.mrb[128].mxu1 %vm636_vm3, %v14625_v53  ;;  %v16185_v53 = vld [vmem:[#allocation44_spill] sm:$0xff] }
 0x891   : > { %10919 = vmatprep.mubr.msk.bf16.mxu1 %vm636_vm3, %v14642_v2  ;;  %v16186_v2 = vld [vmem:[#allocation45_spill] sm:$0xff] }
 0x898   : > { %10920 = vmatmul.mubr.msk.bf16.gmra.mrb[132].mxu1 %vm636_vm3, %v14659_v55  ;;  %v16187_v55 = vld [vmem:[#allocation46_spill] sm:$0xff] }
 0x899   : > { %10923 = vmatprep.mubr.msk.bf16.mxu1 %vm636_vm3, %v14676_v52  ;;  %v16188_v52 = vld [vmem:[#allocation47_spill] sm:$0xff] }
 0x8a0   : > { %10924 = vmatmul.mubr.msk.bf16.gmra.mrb[136].mxu1 %vm636_vm3, %v14693_v15  ;;  %v16189_v15 = vld [vmem:[#allocation48_spill] sm:$0xff] }
 0x8a1   : > { %10927 = vmatprep.mubr.msk.bf16.mxu1 %vm636_vm3, %v14717_v3  ;;  %v16190_v3 = vld [vmem:[#allocation49_spill] sm:$0xff] }
 0x8a8   : > { %10928 = vmatmul.mubr.msk.bf16.gmra.mrb[140].mxu1 %vm636_vm3, %v14734_v57  ;;  %v16191_v57 = vld [vmem:[#allocation50_spill] sm:$0xff] }
 0x8a9   : > { %10931 = vmatprep.mubr.msk.bf16.mxu1 %vm636_vm3, %v14751_v1  ;;  %v16192_v1 = vld [vmem:[#allocation51_spill] sm:$0xff] }
 0x8b0   : > { %10932 = vmatmul.mubr.msk.bf16.gmra.mrb[144].mxu1 %vm636_vm3, %v14768_v32  ;;  %v16193_v32 = vld [vmem:[#allocation52_spill] sm:$0xff] }
 0x8b1   : > { %10935 = vmatprep.mubr.msk.bf16.mxu1 %vm636_vm3, %v14785_v5  ;;  %v16194_v5 = vld [vmem:[#allocation18_spill] sm:$0xff] }
 0x8b8   : > { %10936 = vmatmul.mubr.msk.bf16.gmra.mrb[148].mxu1 %vm636_vm3, %v14802_v7  ;;  %v16195_v7 = vld [vmem:[#allocation19_spill] sm:$0xff] }
 0x8b9   : > { %10939 = vmatprep.mubr.msk.bf16.mxu1 %vm636_vm3, %v14819_v46  ;;  %v16196_v46 = vld [vmem:[#allocation21_spill] sm:$0xff] }
 0x8c0   : > { %10940 = vmatmul.mubr.msk.bf16.gmra.mrb[152].mxu1 %vm636_vm3, %v14836_v9  ;;  %v16197_v9 = vld [vmem:[#allocation37_spill] sm:$0xff] }
 0x8c1   : > { %10943 = vmatprep.mubr.msk.bf16.mxu1 %vm636_vm3, %v14853_v40  ;;  %v16198_v40 = vld [vmem:[#allocation6_spill] sm:$0xff] }
 0x8c8   : > { %10944 = vmatmul.mubr.msk.bf16.gmra.mrb[156].mxu1 %vm636_vm3, %v14870_v26  ;;  %v16199_v26 = vld [vmem:[#allocation8_spill] sm:$0xff] }
 0x8c9   : > { %10947 = vmatprep.mubr.msk.bf16.mxu1 %vm636_vm3, %v14892_v29  ;;  %v16200_v29 = vld [vmem:[#allocation10_spill] sm:$0xff] }
 0x8d0   : > { %10948 = vmatmul.mubr.msk.bf16.gmra.mrb[160].mxu1 %vm636_vm3, %v14914_v25  ;;  %v12312_v25 = vld [vmem:[%s15823_s3] ss:$0 sm:$0xff] }
 0x8d1   : > { %10951 = vmatprep.mubr.msk.bf16.mxu1 %vm636_vm3, %v14931_v59  ;;  %v16201_v59 = vld [vmem:[#allocation28_spill] sm:$0xff] }
 0x8d2   : > { %v4453_v27 = vmul.f32 %v12312_v25, %v16201_v59 }
 0x8d4   : > { %v4515_v51 = vadd.f32 %v12313_v50, %v4453_v27  ;;  %v12316_v27 = vld [vmem:[%s12446_s12 + $0x48] sm:$0xff] }
 0x8d5   : > { %v8286_v50 = vrot.slane %v12316_v27, 2 }
 0x8d6   : > { %v4570_v8 = vmax.f32 %v4515_v51, 0.0  ;;  %v12317_v51 = vld [vmem:[%s12446_s12 + $0x50] sm:$0xff] }
 0x8d8   : > { %10952 = vmatmul.mubr.msk.bf16.gmra.mrb[164].mxu1 %vm636_vm3, %v16183_v11  ;;  %v4955_v4 = vmul.f32 %v4899_v12, %v4570_v8  ;;  %v12318_v8 = vld [vmem:[%s12446_s12 + $0x40] sm:$0xff] }
 0x8d9   : > { %10955 = vmatprep.mubr.msk.bf16.mxu1 %vm636_vm3, %v14974_v33  ;;  %v8284_v37 = vrot.slane %v12318_v8, 2 }
 0x8da   : > { %v7599_v60 = vpack.c.bf16 %v4955_v4, %v4955_v4 }
 0x8dc   : > { %v7624_v16 = vshll.u32 %v7599_v60, 16 }
 0x8de   : > { %v7626_v30 = vrot.slane %v7624_v16, 1 }
 0x8e0   : > { %10956 = vmatmul.mubr.msk.bf16.gmra.mrb[168].mxu1 %vm636_vm3, %v14990_v17  ;;  %v7627_v14 = vsel %vm404_vm4, %v7622_v41, %v7626_v30  ;;  %v8289_v30 = vrot.slane %v12321_v31, 2 }
 0x8e1   : > { %10961 = vmatprep.mubr.msk.bf16.mxu1 %vm636_vm3, %v16184_v22  ;;  %v16218_v22 = vld [vmem:[#allocation32_spill] sm:$0xff] }
 0x8e8   : > { %10962 = vmatmul.mubr.msk.bf16.vlgmr.msra.gmra.mrb[124].mxu1 %vm636_vm3, %v16185_v53  ;;  %v16220_v53 = vld [vmem:[#allocation38_spill] sm:$0xff] }
 0x8e9   : > { %11010 = vmatpush3.bf16.msra.mxu1 %v7911_v19  ;;  %10965 = vmatprep.mubr.msk.bf16.mxu1 %vm636_vm3, %v16186_v2  ;;  %v16219_v19 = vld [vmem:[#allocation34_spill] sm:$0xff]  ;;  %v16221_v2 = vld [vmem:[#allocation39_spill] sm:$0xff] }
 0x8f0   : > { %10966 = vmatmul.mubr.msk.bf16.gmra.mrb[128].mxu1 %vm636_vm3, %v16187_v55  ;;  %v16222_v55 = vld [vmem:[#allocation40_spill] sm:$0xff] }
 0x8f1   : > { %10969 = vmatprep.mubr.msk.bf16.mxu1 %vm636_vm3, %v16188_v52  ;;  %v16223_v52 = vld [vmem:[#allocation41_spill] sm:$0xff] }
 0x8f8   : > { %10970 = vmatmul.mubr.msk.bf16.gmra.mrb[132].mxu1 %vm636_vm3, %v16189_v15  ;;  %v16224_v15 = vld [vmem:[#allocation53_spill] sm:$0xff] }
 0x8f9   : > { %10973 = vmatprep.mubr.msk.bf16.mxu1 %vm636_vm3, %v16190_v3  ;;  %v7890_v3 = vrot.slane %v16183_v11, 1 }
 0x900   : > { %10974 = vmatmul.mubr.msk.bf16.gmra.mrb[136].mxu1 %vm636_vm3, %v16191_v57  ;;  %v16225_v57 = vld [vmem:[#allocation54_spill] sm:$0xff] }
 0x901   : > { %10977 = vmatprep.mubr.msk.bf16.mxu1 %vm636_vm3, %v16192_v1  ;;  %v16226_v1 = vld [vmem:[#allocation42_spill] sm:$0xff] }
 0x908   : > { %10978 = vmatmul.mubr.msk.bf16.gmra.mrb[140].mxu1 %vm636_vm3, %v16193_v32  ;;  %v7891_v32 = vsel %vm1345_vm2, %v16226_v1, %v7890_v3  ;;  %v12324_v1 = vld [vmem:[%s12446_s12 + $0x88] sm:$0xff] }
 0x909   : > { %10981 = vmatprep.mubr.msk.bf16.mxu1 %vm636_vm3, %v16194_v5  ;;  %v7892_v5 = vrot.slane %v14974_v33, 1  ;;  %v15596_v33 = vld [vmem:[%s15825_s5] ss:$0 sm:$0xff] }
 0x910   : > { %10982 = vmatmul.mubr.msk.bf16.gmra.mrb[144].mxu1 %vm636_vm3, %v16195_v7  ;;  %v7894_v7 = vrot.slane %v14990_v17, 1  ;;  %v12314_v17 = vld [vmem:[%s12446_s12 + $0x30] sm:$0xff] }
 0x911   : > { %10985 = vmatprep.mubr.msk.bf16.mxu1 %vm636_vm3, %v16196_v46  ;;  %v7893_v46 = vsel %vm1345_vm2, %v7890_v3, %v7892_v5  ;;  %v12323_v3 = vld [vmem:[%s12446_s12 + $0x80] sm:$0xff] }
 0x912   : > { %v7895_v11 = vsel %vm1345_vm2, %v7892_v5, %v7894_v7 }
 0x918   : > { %10986 = vmatmul.mubr.msk.bf16.gmra.mrb[148].mxu1 %vm636_vm3, %v16197_v9  ;;  %v7896_v9 = vrot.slane %v7599_v60, 1 }
 0x919   : > { %10989 = vmatprep.mubr.msk.bf16.mxu1 %vm636_vm3, %v16198_v40 }
 0x91a   : > { %v7897_v40 = vsel %vm1345_vm2, %v7894_v7, %v7896_v9 }
 0x920   : > { %10990 = vmatmul.mubr.msk.bf16.gmra.mrb[152].mxu1 %vm636_vm3, %v16199_v26  ;;  %v8281_v26 = vrot.slane %v12314_v17, 2 }
 0x921   : > { %10993 = vmatprep.mubr.msk.bf16.mxu1 %vm636_vm3, %v16200_v29  ;;  %v12315_v29 = vld [vmem:[%s12446_s12 + $0x38] sm:$0xff] }
 0x922   : > { %v8282_v25 = vrot.slane %v12315_v29, 2 }
 0x924   : > { %v8283_v4 = vsel %vm8280_vm5, %v8281_v26, %v8282_v25  ;;  %v8285_v54 = vsel %vm8280_vm5, %v8282_v25, %v8284_v37  ;;  %v12325_v26 = vld [vmem:[%s12446_s12 + $0x78] sm:$0xff] }
 0x925   : > { %v8296_v29 = vrot.slane %v12325_v26, 2 }
 0x928   : > { %10994 = vmatmul.mubr.msk.bf16.gmra.mrb[156].mxu1 %vm636_vm3, %v16202_v49  ;;  %v8287_v49 = vrot.slane %v12317_v51, 2 }
 0x929   : > { %10997 = vmatprep.mubr.msk.bf16.mxu1 %vm636_vm3, %v16203_v20  ;;  %v15605_v20 = vld [vmem:[%s15826_s6] ss:$0 sm:$0xff] }
 0x92a   : > { %v8288_v42 = vsel %vm8280_vm5, %v8286_v50, %v8287_v49 }
 0x930   : > { %10998 = vmatmul.mubr.msk.bf16.gmra.mrb[160].mxu1 %vm636_vm3, %v16204_v10 }
 0x931   : > { %11001 = vmatprep.mubr.msk.bf16.mxu1 %vm636_vm3, %v7605_v47 }
 0x938   : > { %11002 = vmatmul.mubr.msk.bf16.gmra.mrb[164].mxu1 %vm636_vm3, %v7612_v35  ;;  %v12320_v35 = vld [vmem:[%s12446_s12 + $0x68] sm:$0xff] }
 0x939   : > { %11005 = vmatprep.mubr.msk.bf16.mxu1 %vm636_vm3, %v7619_v24  ;;  %v8292_v16 = vrot.slane %v12320_v35, 2 }
 0x940   : > { %11006 = vmatmul.mubr.msk.bf16.gmra.mrb[168].mxu1 %vm636_vm3, %v7627_v14 }
 0x941   : > { %11011 = vmatprep.mubr.msk.bf16.mxu1 %vm636_vm3, %v16206_v48 }
 0x948   : > { %11012 = vmatmul.mubr.msk.bf16.vlgmr.msra.gmra.mrb[124].mxu1 %vm636_vm3, %v16207_v0  ;;  %v12322_v0 = vld [vmem:[%s12446_s12 + $0x70] sm:$0xff] }
 0x949   : > { %11015 = vmatprep.mubr.msk.bf16.mxu1 %vm636_vm3, %v16208_v28  ;;  %v8294_v28 = vrot.slane %v12322_v0, 2 }
 0x950   : > { %11016 = vmatmul.mubr.msk.bf16.gmra.mrb[128].mxu1 %vm636_vm3, %v16209_v34 }
 0x951   : > { %11019 = vmatprep.mubr.msk.bf16.mxu1 %vm636_vm3, %v16210_v58 }
 0x958   : > { %11020 = vmatmul.mubr.msk.bf16.gmra.mrb[132].mxu1 %vm636_vm3, %v16211_v38 }
 0x959   : > { %11023 = vmatprep.mubr.msk.bf16.mxu1 %vm636_vm3, %v16212_v18 }
 0x960   : > { %11024 = vmatmul.mubr.msk.bf16.gmra.mrb[136].mxu1 %vm636_vm3, %v16213_v63  ;;  %v8293_v63 = vsel %vm8280_vm5, %v8291_v56, %v8292_v16 }
 0x961   : > { %11027 = vmatprep.mubr.msk.bf16.mxu1 %vm636_vm3, %v16214_v13 }
 0x968   : > { %11028 = vmatmul.mubr.msk.bf16.gmra.mrb[140].mxu1 %vm636_vm3, %v16215_v44 }
 0x969   : > { %11031 = vmatprep.mubr.msk.bf16.mxu1 %vm636_vm3, %v16216_v23 }
 0x970   : > { %11032 = vmatmul.mubr.msk.bf16.gmra.mrb[144].mxu1 %vm636_vm3, %v16217_v21  ;;  %v8290_v21 = vsel %vm8280_vm5, %v8287_v49, %v8289_v30 }
 0x971   : > { %11035 = vmatprep.mubr.msk.bf16.mxu1 %vm636_vm3, %v16218_v22 }
 0x978   : > { %11036 = vmatmul.mubr.msk.bf16.gmra.mrb[148].mxu1 %vm636_vm3, %v16219_v19 }
 0x979   : > { %11039 = vmatprep.mubr.msk.bf16.mxu1 %vm636_vm3, %v16220_v53 }
 0x980   : > { %11040 = vmatmul.mubr.msk.bf16.gmra.mrb[152].mxu1 %vm636_vm3, %v16221_v2  ;;  %v8295_v2 = vsel %vm8280_vm5, %v8292_v16, %v8294_v28 }
 0x981   : > { %11043 = vmatprep.mubr.msk.bf16.mxu1 %vm636_vm3, %v16222_v55 }
 0x988   : > { %11044 = vmatmul.mubr.msk.bf16.gmra.mrb[156].mxu1 %vm636_vm3, %v16223_v52 }
 0x989   : > { %11047 = vmatprep.mubr.msk.bf16.mxu1 %vm636_vm3, %v16224_v15 }
 0x990   : > { %11048 = vmatmul.mubr.msk.bf16.gmra.mrb[160].mxu1 %vm636_vm3, %v16225_v57  ;;  %v8297_v57 = vrot.slane %v12323_v3, 2 }
 0x991   : > { %11051 = vmatprep.mubr.msk.bf16.mxu1 %vm636_vm3, %v7891_v32  ;;  %v8299_v32 = vrot.slane %v12324_v1, 2 }
 0x993   : > { %v8300_v25 = vsel %vm8280_vm5, %v8297_v57, %v8299_v32 }
 0x998   : > { %11052 = vmatmul.mubr.msk.bf16.gmra.mrb[164].mxu1 %vm636_vm3, %v7893_v46 }
 0x999   : > { %11055 = vmatprep.mubr.msk.bf16.mxu1 %vm636_vm3, %v7895_v11 }
 0x9a0   : > { %11056 = vmatmul.mubr.msk.bf16.gmra.mrb[168].mxu1 %vm636_vm3, %v7897_v40 }
 0xa1b   : > { %v11013_v59 = vpop.f32.mrb[124].mxu1 }
 0xa1c   : > { %v7947_v39 = vpop.f32.mrb[125].mxu1 }
 0xa1d   : > { %v8161_v12 = vmul.f32 %v15596_v33, %v7947_v39  ;;  %v11014_v43 = vpop.f32.mrb[126].mxu1  ;;  %v8298_v39 = vsel %vm8280_vm5, %v8296_v29, %v8297_v57 }
 0xa1e   : > { %v8163_v10 = vmul.f32 %v11014_v43, %v15596_v33  ;;  %v7950_v45 = vpop.f32.mrb[127].mxu1 }
 0xa1f   : > { %v8200_v47 = vadd.f32 %v15605_v20, %v8161_v12  ;;  %v8162_v61 = vmul.f32 %v15596_v33, %v7950_v45  ;;  %v12326_v12 = vld [vmem:[%s12446_s12 + $0x90] sm:$0xff] }
 0xa20   : > { %v8202_v60 = vadd.f32 %v15605_v20, %v8163_v10  ;;  %v8301_v43 = vrot.slane %v12326_v12, 2 }
 0xa21   : > { %v8393_v36 = vadd.f32 %v8283_v4, %v8200_v47  ;;  %v8201_v6 = vadd.f32 %v15605_v20, %v8162_v61  ;;  %v12327_v4 = vld [vmem:[%s12446_s12 + $0x98] sm:$0xff] }
 0xa22   : > { %v8395_v24 = vadd.f32 %v8288_v42, %v8202_v60  ;;  %v8302_v10 = vrot.slane %v12327_v4, 2  ;;  %v12328_v42 = vld [vmem:[%s12446_s12 + $0xa8] sm:$0xff]  ;;  %v12329_v60 = vld [vmem:[%s12446_s12 + $0xb0] sm:$0xff] }
 0xa23   : > { %v8425_v41 = vmax.f32 %v8393_v36, 0.0  ;;  %v8394_v14 = vadd.f32 %v8285_v54, %v8201_v6  ;;  %v11017_v48 = vpop.f32.mrb[128].mxu1  ;;  %v8306_v61 = vrot.slane %v12328_v42, 2  ;;  %v8307_v54 = vrot.slane %v12329_v60, 2  ;;  %v12330_v6 = vld [vmem:[%s12446_s12 + $0xa0] sm:$0xff] }
 0xa24   : > { %v8427_v34 = vmax.f32 %v8395_v24, 0.0  ;;  %v8165_v58 = vmul.f32 %v11017_v48, %v15596_v33  ;;  %v7962_v38 = vpop.f32.mrb[129].mxu1  ;;  %v8304_v62 = vrot.slane %v12330_v6, 2  ;;  %v8303_v24 = vsel %vm8280_vm5, %v8301_v43, %v8302_v10 }
 0xa25   : > { %8457 = vst.msk [vmem:[%s15623_s23] sm:$0xff] %vm636_vm3, %v8425_v41  ;;  %v8426_v18 = vmax.f32 %v8394_v14, 0.0  ;;  %v8164_v13 = vmul.f32 %v15596_v33, %v7962_v38  ;;  %v11018_v44 = vpop.f32.mrb[130].mxu1  ;;  %v8308_v14 = vsel %vm8280_vm5, %v8306_v61, %v8307_v54  ;;  %v12331_v38 = vld [vmem:[%s12446_s12 + $0xc0] sm:$0xff] }
 0xa26   : > { %8459 = vst.msk [vmem:[%s15623_s23 + $0x10] sm:$0xff] %vm636_vm3, %v8427_v34  ;;  %v8204_v23 = vadd.f32 %v15605_v20, %v8165_v58  ;;  %v8166_v22 = vmul.f32 %v11018_v44, %v15596_v33  ;;  %v7965_v19 = vpop.f32.mrb[131].mxu1  ;;  %v8305_v28 = vsel %vm8280_vm5, %v8302_v10, %v8304_v62  ;;  %v12337_v10 = vld [vmem:[%s12446_s12 + $0xd8] sm:$0xff] }
 0xa27   : > { %8458 = vst.msk [vmem:[%s15623_s23 + $0x8] sm:$0xff] %vm636_vm3, %v8426_v18  ;;  %v8203_v53 = vadd.f32 %v15605_v20, %v8164_v13  ;;  %v8311_v18 = vrot.slane %v12331_v38, 2 }
 0xa28   : > { %v8397_v55 = vadd.f32 %v8293_v63, %v8204_v23  ;;  %v8205_v52 = vadd.f32 %v15605_v20, %v8166_v22  ;;  %v12332_v63 = vld [vmem:[%s12446_s12 + $0xc8] sm:$0xff]  ;;  %v12333_v23 = vld [vmem:[%s12446_s12 + $0xb8] sm:$0xff] }
 0xa29   : > { %v8396_v15 = vadd.f32 %v8290_v21, %v8203_v53  ;;  %v8312_v13 = vrot.slane %v12332_v63, 2  ;;  %v8309_v21 = vrot.slane %v12333_v23, 2 }
 0xa2a   : > { %v8429_v5 = vmax.f32 %v8397_v55, 0.0  ;;  %v8398_v7 = vadd.f32 %v8295_v2, %v8205_v52  ;;  %v12334_v2 = vld [vmem:[%s12446_s12 + $0xd0] sm:$0xff] }
 0xa2b   : > { %v8428_v46 = vmax.f32 %v8396_v15, 0.0  ;;  %v11021_v11 = vpop.f32.mrb[132].mxu1  ;;  %v8314_v55 = vrot.slane %v12334_v2, 2  ;;  %v8313_v1 = vsel %vm8280_vm5, %v8311_v18, %v8312_v13 }
 0xa2c   : > { %8461 = vst.msk [vmem:[%s15623_s23 + $0x20] sm:$0xff] %vm636_vm3, %v8429_v5  ;;  %v8430_v9 = vmax.f32 %v8398_v7, 0.0  ;;  %v8168_v40 = vmul.f32 %v11021_v11, %v15596_v33  ;;  %v7977_v17 = vpop.f32.mrb[133].mxu1 }
 0xa2d   : > { %8460 = vst.msk [vmem:[%s15623_s23 + $0x18] sm:$0xff] %vm636_vm3, %v8428_v46  ;;  %v11022_v59 = vpop.f32.mrb[134].mxu1  ;;  %v8310_v46 = vsel %vm8280_vm5, %v8307_v54, %v8309_v21  ;;  %v8315_v17 = vsel %vm8280_vm5, %v8312_v13, %v8314_v55 }
 0xa2e   : > { %8462 = vst.msk [vmem:[%s15623_s23 + $0x28] sm:$0xff] %vm636_vm3, %v8430_v9  ;;  %v8207_v27 = vadd.f32 %v15605_v20, %v8168_v40  ;;  %v7979_v50 = vpop.f32.mrb[135].mxu1  ;;  %v12335_v59 = vld [vmem:[%s12446_s12 + $0xe0] sm:$0xff] }
 0xa2f   : > { %v8167_v51 = vmul.f32 %v15596_v33, %v7979_v50  ;;  %v12336_v50 = vld [vmem:[%s12446_s12 + $0xe8] sm:$0xff] }
 0xa30   : > { %v8400_v49 = vadd.f32 %v8300_v25, %v8207_v27  ;;  %v8317_v27 = vrot.slane %v12335_v59, 2 }
 0xa31   : > { %v8206_v8 = vadd.f32 %v15605_v20, %v8167_v51  ;;  %v8319_v51 = vrot.slane %v12336_v50, 2 }
 0xa32   : > { %v8432_v37 = vmax.f32 %v8400_v49, 0.0 }
 0xa33   : > { %v8399_v45 = vadd.f32 %v8298_v39, %v8206_v8  ;;  %v11025_v47 = vpop.f32.mrb[136].mxu1 }
 0xa34   : > { %8464 = vst.msk [vmem:[%s15623_s23 + $0x38] sm:$0xff] %vm636_vm3, %v8432_v37  ;;  %v7991_v36 = vpop.f32.mrb[137].mxu1  ;;  %v8320_v47 = vsel %vm8280_vm5, %v8317_v27, %v8319_v51 }
 0xa35   : > { %v8431_v56 = vmax.f32 %v8399_v45, 0.0  ;;  %v8169_v35 = vmul.f32 %v15596_v33, %v7991_v36  ;;  %v11026_v16 = vpop.f32.mrb[138].mxu1  ;;  %v8316_v45 = vrot.slane %v12337_v10, 2 }
 0xa36   : > { %v8171_v31 = vmul.f32 %v11026_v16, %v15596_v33  ;;  %v7994_v30 = vpop.f32.mrb[139].mxu1 }
 0xa37   : > { %8463 = vst.msk [vmem:[%s15623_s23 + $0x30] sm:$0xff] %vm636_vm3, %v8431_v56  ;;  %v8208_v41 = vadd.f32 %v15605_v20, %v8169_v35  ;;  %v8170_v48 = vmul.f32 %v15596_v33, %v7994_v30  ;;  %v8318_v6 = vsel %vm8280_vm5, %v8316_v45, %v8317_v27  ;;  %v12338_v35 = vld [vmem:[%s12446_s12 + $0xf0] sm:$0xff] }
 0xa38   : > { %v8210_v0 = vadd.f32 %v15605_v20, %v8171_v31  ;;  %v8321_v16 = vrot.slane %v12338_v35, 2 }
 0xa39   : > { %v8401_v34 = vadd.f32 %v8303_v24, %v8208_v41  ;;  %v8209_v58 = vadd.f32 %v15605_v20, %v8170_v48  ;;  %v12339_v24 = vld [vmem:[%s12446_s12 + $0xf8] sm:$0xff] }
 0xa3a   : > { %v8403_v44 = vadd.f32 %v8308_v14, %v8210_v0  ;;  %v8322_v31 = vrot.slane %v12339_v24, 2  ;;  %v12340_v14 = vld [vmem:[%s12446_s12 + $0x108] sm:$0xff]  ;;  %v12341_v0 = vld [vmem:[%s12446_s12 + $0x110] sm:$0xff] }
 0xa3b   : > { %v8433_v22 = vmax.f32 %v8401_v34, 0.0  ;;  %v8402_v19 = vadd.f32 %v8305_v28, %v8209_v58  ;;  %v11029_v53 = vpop.f32.mrb[140].mxu1  ;;  %v8326_v48 = vrot.slane %v12340_v14, 2  ;;  %v8327_v28 = vrot.slane %v12341_v0, 2  ;;  %v12342_v58 = vld [vmem:[%s12446_s12 + $0x100] sm:$0xff] }
 0xa3c   : > { %v8435_v52 = vmax.f32 %v8403_v44, 0.0  ;;  %v8173_v15 = vmul.f32 %v11029_v53, %v15596_v33  ;;  %v8006_v3 = vpop.f32.mrb[141].mxu1  ;;  %v8324_v38 = vrot.slane %v12342_v58, 2  ;;  %v8323_v44 = vsel %vm8280_vm5, %v8321_v16, %v8322_v31 }
 0xa3d   : > { %8465 = vst.msk [vmem:[%s15623_s23 + $0x40] sm:$0xff] %vm636_vm3, %v8433_v22  ;;  %v8434_v57 = vmax.f32 %v8402_v19, 0.0  ;;  %v8172_v32 = vmul.f32 %v15596_v33, %v8006_v3  ;;  %v11030_v5 = vpop.f32.mrb[142].mxu1  ;;  %v8328_v19 = vsel %vm8280_vm5, %v8326_v48, %v8327_v28  ;;  %v12343_v3 = vld [vmem:[%s12446_s12 + $0x120] sm:$0xff] }
 0xa3e   : > { %8467 = vst.msk [vmem:[%s15623_s23 + $0x50] sm:$0xff] %vm636_vm3, %v8435_v52  ;;  %v8212_v7 = vadd.f32 %v15605_v20, %v8173_v15  ;;  %v8174_v11 = vmul.f32 %v11030_v5, %v15596_v33  ;;  %v8009_v9 = vpop.f32.mrb[143].mxu1  ;;  %v8325_v55 = vsel %vm8280_vm5, %v8322_v31, %v8324_v38  ;;  %v12349_v31 = vld [vmem:[%s12446_s12 + $0x138] sm:$0xff] }
 0xa3f   : > { %8466 = vst.msk [vmem:[%s15623_s23 + $0x48] sm:$0xff] %vm636_vm3, %v8434_v57  ;;  %v8211_v40 = vadd.f32 %v15605_v20, %v8172_v32  ;;  %v8331_v57 = vrot.slane %v12343_v3, 2 }
 0xa40   : > { %v8405_v26 = vadd.f32 %v8313_v1, %v8212_v7  ;;  %v8213_v29 = vadd.f32 %v15605_v20, %v8174_v11  ;;  %v12344_v1 = vld [vmem:[%s12446_s12 + $0x128] sm:$0xff]  ;;  %v12345_v7 = vld [vmem:[%s12446_s12 + $0x118] sm:$0xff] }
 0xa41   : > { %v8404_v25 = vadd.f32 %v8310_v46, %v8211_v40  ;;  %v8332_v32 = vrot.slane %v12344_v1, 2  ;;  %v8329_v46 = vrot.slane %v12345_v7, 2 }
 0xa42   : > { %v8437_v49 = vmax.f32 %v8405_v26, 0.0  ;;  %v8406_v39 = vadd.f32 %v8315_v17, %v8213_v29  ;;  %v12346_v17 = vld [vmem:[%s12446_s12 + $0x130] sm:$0xff] }
 0xa43   : > { %v8436_v8 = vmax.f32 %v8404_v25, 0.0  ;;  %v11033_v37 = vpop.f32.mrb[144].mxu1  ;;  %v8334_v26 = vrot.slane %v12346_v17, 2  ;;  %v8333_v50 = vsel %vm8280_vm5, %v8331_v57, %v8332_v32 }
 0xa44   : > { %8469 = vst.msk [vmem:[%s15623_s23 + $0x60] sm:$0xff] %vm636_vm3, %v8437_v49  ;;  %v8438_v12 = vmax.f32 %v8406_v39, 0.0  ;;  %v8176_v43 = vmul.f32 %v11033_v37, %v15596_v33  ;;  %v8021_v4 = vpop.f32.mrb[145].mxu1 }
 0xa45   : > { %8468 = vst.msk [vmem:[%s15623_s23 + $0x58] sm:$0xff] %vm636_vm3, %v8436_v8  ;;  %v11034_v42 = vpop.f32.mrb[146].mxu1  ;;  %v8330_v8 = vsel %vm8280_vm5, %v8327_v28, %v8329_v46  ;;  %v8335_v4 = vsel %vm8280_vm5, %v8332_v32, %v8334_v26 }
 0xa46   : > { %8470 = vst.msk [vmem:[%s15623_s23 + $0x68] sm:$0xff] %vm636_vm3, %v8438_v12  ;;  %v8215_v61 = vadd.f32 %v15605_v20, %v8176_v43  ;;  %v8023_v60 = vpop.f32.mrb[147].mxu1  ;;  %v12347_v42 = vld [vmem:[%s12446_s12 + $0x140] sm:$0xff] }
 0xa47   : > { %v8175_v54 = vmul.f32 %v15596_v33, %v8023_v60  ;;  %v12348_v60 = vld [vmem:[%s12446_s12 + $0x148] sm:$0xff] }
 0xa48   : > { %v8408_v36 = vadd.f32 %v8320_v47, %v8215_v61  ;;  %v8337_v61 = vrot.slane %v12347_v42, 2 }
 0xa49   : > { %v8214_v62 = vadd.f32 %v15605_v20, %v8175_v54  ;;  %v8339_v54 = vrot.slane %v12348_v60, 2 }
 0xa4a   : > { %v8440_v56 = vmax.f32 %v8408_v36, 0.0 }
 0xa4b   : > { %v8407_v30 = vadd.f32 %v8318_v6, %v8214_v62  ;;  %v11037_v41 = vpop.f32.mrb[148].mxu1 }
 0xa4c   : > { %8472 = vst.msk [vmem:[%s15623_s23 + $0x78] sm:$0xff] %vm636_vm3, %v8440_v56  ;;  %v8035_v34 = vpop.f32.mrb[149].mxu1  ;;  %v8340_v41 = vsel %vm8280_vm5, %v8337_v61, %v8339_v54 }
 0xa4d   : > { %v8439_v18 = vmax.f32 %v8407_v30, 0.0  ;;  %v8177_v63 = vmul.f32 %v15596_v33, %v8035_v34  ;;  %v11038_v13 = vpop.f32.mrb[150].mxu1  ;;  %v8336_v30 = vrot.slane %v12349_v31, 2 }
 0xa4e   : > { %v8179_v23 = vmul.f32 %v11038_v13, %v15596_v33  ;;  %v8038_v21 = vpop.f32.mrb[151].mxu1 }
 0xa4f   : > { %8471 = vst.msk [vmem:[%s15623_s23 + $0x70] sm:$0xff] %vm636_vm3, %v8439_v18  ;;  %v8216_v22 = vadd.f32 %v15605_v20, %v8177_v63  ;;  %v8178_v53 = vmul.f32 %v15596_v33, %v8038_v21  ;;  %v8338_v58 = vsel %vm8280_vm5, %v8336_v30, %v8337_v61  ;;  %v12350_v63 = vld [vmem:[%s12446_s12 + $0x150] sm:$0xff] }
 0xa50   : > { %v8218_v2 = vadd.f32 %v15605_v20, %v8179_v23  ;;  %v8341_v13 = vrot.slane %v12350_v63, 2 }
 0xa51   : > { %v8409_v52 = vadd.f32 %v8323_v44, %v8216_v22  ;;  %v8217_v15 = vadd.f32 %v15605_v20, %v8178_v53  ;;  %v12351_v44 = vld [vmem:[%s12446_s12 + $0x158] sm:$0xff] }
 0xa52   : > { %v8411_v5 = vadd.f32 %v8328_v19, %v8218_v2  ;;  %v8342_v23 = vrot.slane %v12351_v44, 2  ;;  %v12352_v19 = vld [vmem:[%s12446_s12 + $0x168] sm:$0xff]  ;;  %v12353_v2 = vld [vmem:[%s12446_s12 + $0x170] sm:$0xff] }
 0xa53   : > { %v8441_v11 = vmax.f32 %v8409_v52, 0.0  ;;  %v8410_v9 = vadd.f32 %v8325_v55, %v8217_v15  ;;  %v11041_v40 = vpop.f32.mrb[152].mxu1  ;;  %v8346_v53 = vrot.slane %v12352_v19, 2  ;;  %v8347_v55 = vrot.slane %v12353_v2, 2  ;;  %v12354_v15 = vld [vmem:[%s12446_s12 + $0x160] sm:$0xff] }
 0xa54   : > { %v8443_v29 = vmax.f32 %v8411_v5, 0.0  ;;  %v8181_v25 = vmul.f32 %v11041_v40, %v15596_v33  ;;  %v8050_v59 = vpop.f32.mrb[153].mxu1  ;;  %v8344_v3 = vrot.slane %v12354_v15, 2  ;;  %v8343_v5 = vsel %vm8280_vm5, %v8341_v13, %v8342_v23 }
 0xa55   : > { %8473 = vst.msk [vmem:[%s15623_s23 + $0x80] sm:$0xff] %vm636_vm3, %v8441_v11  ;;  %v8442_v27 = vmax.f32 %v8410_v9, 0.0  ;;  %v8180_v51 = vmul.f32 %v15596_v33, %v8050_v59  ;;  %v11042_v49 = vpop.f32.mrb[154].mxu1  ;;  %v8348_v9 = vsel %vm8280_vm5, %v8346_v53, %v8347_v55  ;;  %v12355_v59 = vld [vmem:[%s12446_s12 + $0x180] sm:$0xff] }
 0xa56   : > { %8475 = vst.msk [vmem:[%s15623_s23 + $0x90] sm:$0xff] %vm636_vm3, %v8443_v29  ;;  %v8220_v39 = vadd.f32 %v15605_v20, %v8181_v25  ;;  %v8182_v37 = vmul.f32 %v11042_v49, %v15596_v33  ;;  %v8053_v12 = vpop.f32.mrb[155].mxu1  ;;  %v8345_v26 = vsel %vm8280_vm5, %v8342_v23, %v8344_v3  ;;  %v12361_v23 = vld [vmem:[%s12446_s12 + $0x198] sm:$0xff] }
 0xa57   : > { %8474 = vst.msk [vmem:[%s15623_s23 + $0x88] sm:$0xff] %vm636_vm3, %v8442_v27  ;;  %v8219_v43 = vadd.f32 %v15605_v20, %v8180_v51  ;;  %v8351_v27 = vrot.slane %v12355_v59, 2 }
 0xa58   : > { %v8413_v10 = vadd.f32 %v8333_v50, %v8220_v39  ;;  %v8221_v45 = vadd.f32 %v15605_v20, %v8182_v37  ;;  %v12356_v50 = vld [vmem:[%s12446_s12 + $0x188] sm:$0xff]  ;;  %v12357_v39 = vld [vmem:[%s12446_s12 + $0x178] sm:$0xff] }
 0xa59   : > { %v8412_v47 = vadd.f32 %v8330_v8, %v8219_v43  ;;  %v8352_v51 = vrot.slane %v12356_v50, 2  ;;  %v8349_v8 = vrot.slane %v12357_v39, 2 }
 0xa5a   : > { %v8445_v36 = vmax.f32 %v8413_v10, 0.0  ;;  %v8414_v6 = vadd.f32 %v8335_v4, %v8221_v45  ;;  %v12358_v4 = vld [vmem:[%s12446_s12 + $0x190] sm:$0xff] }
 0xa5b   : > { %v8444_v62 = vmax.f32 %v8412_v47, 0.0  ;;  %v11045_v56 = vpop.f32.mrb[156].mxu1  ;;  %v8354_v10 = vrot.slane %v12358_v4, 2  ;;  %v8353_v60 = vsel %vm8280_vm5, %v8351_v27, %v8352_v51 }
 0xa5c   : > { %8477 = vst.msk [vmem:[%s15623_s23 + $0xa0] sm:$0xff] %vm636_vm3, %v8445_v36  ;;  %v8446_v35 = vmax.f32 %v8414_v6, 0.0  ;;  %v8184_v16 = vmul.f32 %v11045_v56, %v15596_v33  ;;  %v8065_v24 = vpop.f32.mrb[157].mxu1 }
 0xa5d   : > { %8476 = vst.msk [vmem:[%s15623_s23 + $0x98] sm:$0xff] %vm636_vm3, %v8444_v62  ;;  %v11046_v14 = vpop.f32.mrb[158].mxu1  ;;  %v8350_v62 = vsel %vm8280_vm5, %v8347_v55, %v8349_v8  ;;  %v8355_v24 = vsel %vm8280_vm5, %v8352_v51, %v8354_v10 }
 0xa5e   : > { %8478 = vst.msk [vmem:[%s15623_s23 + $0xa8] sm:$0xff] %vm636_vm3, %v8446_v35  ;;  %v8223_v48 = vadd.f32 %v15605_v20, %v8184_v16  ;;  %v8067_v0 = vpop.f32.mrb[159].mxu1  ;;  %v12359_v14 = vld [vmem:[%s12446_s12 + $0x1a0] sm:$0xff] }
 0xa5f   : > { %v8183_v28 = vmul.f32 %v15596_v33, %v8067_v0  ;;  %v12360_v0 = vld [vmem:[%s12446_s12 + $0x1a8] sm:$0xff] }
 0xa60   : > { %v8416_v34 = vadd.f32 %v8340_v41, %v8223_v48  ;;  %v8357_v48 = vrot.slane %v12359_v14, 2 }
 0xa61   : > { %v8222_v38 = vadd.f32 %v15605_v20, %v8183_v28  ;;  %v8359_v28 = vrot.slane %v12360_v0, 2 }
 0xa62   : > { %v8448_v18 = vmax.f32 %v8416_v34, 0.0 }
 0xa63   : > { %v8415_v21 = vadd.f32 %v8338_v58, %v8222_v38  ;;  %v11049_v22 = vpop.f32.mrb[160].mxu1 }
 0xa64   : > { %8480 = vst.msk [vmem:[%s15623_s23 + $0xb8] sm:$0xff] %vm636_vm3, %v8448_v18  ;;  %v8079_v52 = vpop.f32.mrb[161].mxu1  ;;  %v8360_v22 = vsel %vm8280_vm5, %v8357_v48, %v8359_v28 }
 0xa65   : > { %v8447_v57 = vmax.f32 %v8415_v21, 0.0  ;;  %v8185_v1 = vmul.f32 %v15596_v33, %v8079_v52  ;;  %v11050_v32 = vpop.f32.mrb[162].mxu1  ;;  %v8356_v21 = vrot.slane %v12361_v23, 2 }
 0xa66   : > { %v8187_v7 = vmul.f32 %v11050_v32, %v15596_v33  ;;  %v8082_v46 = vpop.f32.mrb[163].mxu1 }
 0xa67   : > { %8479 = vst.msk [vmem:[%s15623_s23 + $0xb0] sm:$0xff] %vm636_vm3, %v8447_v57  ;;  %v8224_v11 = vadd.f32 %v15605_v20, %v8185_v1  ;;  %v8186_v40 = vmul.f32 %v15596_v33, %v8082_v46  ;;  %v8358_v15 = vsel %vm8280_vm5, %v8356_v21, %v8357_v48 }
 0xa68   : > { %v8226_v17 = vadd.f32 %v15605_v20, %v8187_v7 }
 0xa69   : > { %v8417_v29 = vadd.f32 %v8343_v5, %v8224_v11  ;;  %v8225_v25 = vadd.f32 %v15605_v20, %v8186_v40 }
 0xa6a   : > { %v8419_v49 = vadd.f32 %v8348_v9, %v8226_v17 }
 0xa6b   : > { %v8449_v37 = vmax.f32 %v8417_v29, 0.0  ;;  %v8418_v12 = vadd.f32 %v8345_v26, %v8225_v25  ;;  %v11053_v43 = vpop.f32.mrb[164].mxu1 }
 0xa6c   : > { %v8451_v45 = vmax.f32 %v8419_v49, 0.0  ;;  %v8189_v47 = vmul.f32 %v11053_v43, %v15596_v33  ;;  %v8094_v42 = vpop.f32.mrb[165].mxu1 }
 0xa6d   : > { %8481 = vst.msk [vmem:[%s15623_s23 + $0xc0] sm:$0xff] %vm636_vm3, %v8449_v37  ;;  %v8450_v61 = vmax.f32 %v8418_v12, 0.0  ;;  %v8188_v54 = vmul.f32 %v15596_v33, %v8094_v42  ;;  %v11054_v36 = vpop.f32.mrb[166].mxu1 }
 0xa6e   : > { %8483 = vst.msk [vmem:[%s15623_s23 + $0xd0] sm:$0xff] %vm636_vm3, %v8451_v45  ;;  %v8228_v6 = vadd.f32 %v15605_v20, %v8189_v47  ;;  %v8190_v56 = vmul.f32 %v11054_v36, %v15596_v33  ;;  %v8097_v35 = vpop.f32.mrb[167].mxu1 }
 0xa6f   : > { %8482 = vst.msk [vmem:[%s15623_s23 + $0xc8] sm:$0xff] %vm636_vm3, %v8450_v61  ;;  %v8227_v16 = vadd.f32 %v15605_v20, %v8188_v54 }
 0xa70   : > { %v8421_v31 = vadd.f32 %v8353_v60, %v8228_v6  ;;  %v8229_v30 = vadd.f32 %v15605_v20, %v8190_v56 }
 0xa71   : > { %v8420_v41 = vadd.f32 %v8350_v62, %v8227_v16 }
 0xa72   : > { %v8453_v34 = vmax.f32 %v8421_v31, 0.0  ;;  %v8422_v58 = vadd.f32 %v8355_v24, %v8229_v30 }
 0xa73   : > { %v8452_v38 = vmax.f32 %v8420_v41, 0.0  ;;  %v11057_v18 = vpop.f32.mrb[168].mxu1 }
 0xa74   : > { %8485 = vst.msk [vmem:[%s15623_s23 + $0xe0] sm:$0xff] %vm636_vm3, %v8453_v34  ;;  %v8454_v63 = vmax.f32 %v8422_v58, 0.0  ;;  %v8192_v13 = vmul.f32 %v11057_v18, %v15596_v33  ;;  %v8109_v44 = vpop.f32.mrb[169].mxu1 }
 0xa75   : > { %8484 = vst.msk [vmem:[%s15623_s23 + $0xd8] sm:$0xff] %vm636_vm3, %v8452_v38  ;;  %v11058_v19 = vpop.f32.mrb[170].mxu1 }
 0xa76   : > { %8486 = vst.msk [vmem:[%s15623_s23 + $0xe8] sm:$0xff] %vm636_vm3, %v8454_v63  ;;  %v8231_v53 = vadd.f32 %v15605_v20, %v8192_v13  ;;  %v8111_v2 = vpop.f32.mrb[171].mxu1 }
 0xa77   : > { %v8191_v55 = vmul.f32 %v15596_v33, %v8111_v2 }
 0xa78   : > { %v8424_v52 = vadd.f32 %v8360_v22, %v8231_v53 }
 0xa79   : > { %v8230_v3 = vadd.f32 %v15605_v20, %v8191_v55 }
 0xa7a   : > { %v8456_v57 = vmax.f32 %v8424_v52, 0.0 }
 0xa7b   : > { %v8423_v1 = vadd.f32 %v8358_v15, %v8230_v3 }
 0xa7c   : > { %8488 = vst.msk [vmem:[%s15623_s23 + $0xf8] sm:$0xff] %vm636_vm3, %v8456_v57 }
 0xa7d   : > { %v8455_v32 = vmax.f32 %v8423_v1, 0.0 }
 0xa7f   : > { %8487 = vst.msk [vmem:[%s15623_s23 + $0xf0] sm:$0xff] %vm636_vm3, %v8455_v32 }
 0xa80 PF: > { %s18_s27 = sadd.s32 1, %s12368_s27  }
 0xa81   : > { %p15_p4 = scmp.ge.s32.totalorder %s18_s27, 4  }
 0xa83   :  { %17 = sbr.rel (!%p15_p4) target bundleno = 1 (0x1), region = 98 }

</bundles_post_ra>
